<compile_context>
chip_gen: v7x
topology: tpu7x:2x2x1
jax: 0.10.0
libtpu: 0.0.40
codegen_flags: <defaults>
</compile_context>

<pallas_src>
import functools
import math

import jax
import jax.numpy as jnp
from jax.experimental import pallas as pl
from jax.experimental.pallas import tpu as pltpu

EPS = 1e-5


def _vmem_capacity_bytes():
    try:
        return int(pltpu.get_tpu_info().vmem_capacity_bytes)
    except Exception:
        return 64 * 1024 * 1024        # conservative default (v7x per-core VMEM)


_VMEM_CAP = _vmem_capacity_bytes()
_BIG_VMEM = _VMEM_CAP >= 96 * 1024 * 1024          # v5e / v6e: 128 MiB physical
# Never request more scoped VMEM than the chip has (minus headroom).
VMEM_LIMIT = int(min(max(_VMEM_CAP - 16 * 1024 * 1024, 48 * 1024 * 1024),
                     100 * 1024 * 1024))


def _pick_tco(cout):
    """Cout tile width.  Big-VMEM chips (v5e/v6e) take the widest tile that
    fits; v7x keeps >=2 tiles per weight-heavy layer so the parallel Cout axis
    shards across both TensorCores."""
    if _BIG_VMEM:
        cap = 512
    else:
        cap = 256 if cout >= 1024 else 128
    return min(cout, cap)


# ----------------------------------------------------------------------------
# Pallas kernels
# ----------------------------------------------------------------------------
def _conv3x3_bn_relu_kernel(x_ref, w_ref, s_ref, b_ref, o_ref):
    """Fused 3x3 same-conv + folded-BatchNorm + ReLU (sliced / weight-bound path).

    One grid step = one Cout tile; the whole batch is in the block.
      x_ref: (N, H+2, W+2, Cin) zero-padded NHWC input, bf16
      w_ref: (9, Cin, TCO)      conv taps flattened row-major (kh*3+kw), bf16
      s_ref, b_ref: (1, TCO)    folded BN scale / bias, f32
      o_ref: (N, H, W, TCO)     bf16
    Batch is flattened into M: each tap is one (N*H*W, Cin) x (Cin, TCO) dot.
    """
    N, Hp, Wp, Cin = x_ref.shape
    H, W = Hp - 2, Wp - 2
    tco = w_ref.shape[-1]
    acc = None
    for kh in range(3):
        for kw in range(3):
            patch = x_ref[:, kh:kh + H, kw:kw + W, :]            # (N, H, W, Cin)
            patch = patch.reshape(N * H * W, Cin)
            part = jnp.dot(patch, w_ref[kh * 3 + kw],
                           preferred_element_type=jnp.float32)   # (N*H*W, TCO)
            acc = part if acc is None else acc + part
    y = jnp.maximum(acc * s_ref[0] + b_ref[0], 0.0)              # f32 epilogue
    o_ref[...] = y.reshape(N, H, W, tco).astype(o_ref.dtype)


def conv3x3_bn_relu_sliced(x, w, scale, bias):
    """x: (N,H,W,Cin) bf16, w: (9,Cin,Cout) bf16, scale/bias: (Cout,) f32."""
    N, H, W, Cin = x.shape
    Cout = w.shape[-1]
    tco = _pick_tco(Cout)
    assert Cout % tco == 0, (Cout, tco)      # no silent remainder truncation
    xp = jnp.pad(x, ((0, 0), (1, 1), (1, 1), (0, 0)))
    s2 = scale.reshape(1, Cout).astype(jnp.float32)
    b2 = bias.reshape(1, Cout).astype(jnp.float32)
    return pl.pallas_call(
        _conv3x3_bn_relu_kernel,
        out_shape=jax.ShapeDtypeStruct((N, H, W, Cout), jnp.bfloat16),
        grid=(Cout // tco,),
        in_specs=[
            pl.BlockSpec((N, H + 2, W + 2, Cin), lambda co: (0, 0, 0, 0)),
            pl.BlockSpec((9, Cin, tco), lambda co: (0, 0, co)),
            pl.BlockSpec((1, tco), lambda co: (0, co)),
            pl.BlockSpec((1, tco), lambda co: (0, co)),
        ],
        out_specs=pl.BlockSpec((N, H, W, tco), lambda co: (0, 0, 0, co)),
        compiler_params=pltpu.CompilerParams(
            dimension_semantics=("parallel",),
            vmem_limit_bytes=VMEM_LIMIT),
    )(xp, w, s2, b2)


def _gemm_bn_relu_kernel(x_ref, w_ref, s_ref, b_ref, o_ref):
    """im2col GEMM + folded BN + ReLU (blocks 1-2, copy/issue-bound path).

      x_ref: (M, K) bf16  w_ref: (K, TCO) bf16
      s_ref, b_ref: (1, TCO) f32          o_ref: (M, TCO) bf16
    """
    acc = jnp.dot(x_ref[...], w_ref[...], preferred_element_type=jnp.float32)
    o_ref[...] = jnp.maximum(acc * s_ref[0] + b_ref[0], 0.0).astype(o_ref.dtype)


def _im2col(xp, H, W):
    """xp: (N, H+2, W+2, Cin) -> (N*H*W, 9*Cin), tap-major then Cin (row-major
    match for w.reshape(9*Cin, Cout))."""
    N, _, _, Cin = xp.shape
    cols = [xp[:, kh:kh + H, kw:kw + W, :] for kh in range(3) for kw in range(3)]
    col = jnp.stack(cols, axis=3)                     # (N, H, W, 9, Cin)
    return col.reshape(N * H * W, 9 * Cin)


def conv3x3_bn_relu_gemm(x, w, scale, bias):
    """x: (N,H,W,Cin) bf16, w: (9,Cin,Cout) bf16 -> (N,H,W,Cout) bf16."""
    N, H, W, Cin = x.shape
    Cout = w.shape[-1]
    tco = _pick_tco(Cout)
    assert Cout % tco == 0, (Cout, tco)
    xp = jnp.pad(x, ((0, 0), (1, 1), (1, 1), (0, 0)))
    xcol = _im2col(xp, H, W)                          # (M, 9*Cin) bf16
    wk = w.reshape(9 * Cin, Cout)                     # (9*Cin, Cout) bf16
    M, K = xcol.shape
    s2 = scale.reshape(1, Cout).astype(jnp.float32)
    b2 = bias.reshape(1, Cout).astype(jnp.float32)
    y = pl.pallas_call(
        _gemm_bn_relu_kernel,
        out_shape=jax.ShapeDtypeStruct((M, Cout), jnp.bfloat16),
        grid=(Cout // tco,),
        in_specs=[
            pl.BlockSpec((M, K), lambda co: (0, 0)),
            pl.BlockSpec((K, tco), lambda co: (0, co)),
            pl.BlockSpec((1, tco), lambda co: (0, co)),
            pl.BlockSpec((1, tco), lambda co: (0, co)),
        ],
        out_specs=pl.BlockSpec((M, tco), lambda co: (0, co)),
        compiler_params=pltpu.CompilerParams(
            dimension_semantics=("parallel",),
            vmem_limit_bytes=VMEM_LIMIT),
    )(xcol, wk, s2, b2)
    return y.reshape(N, H, W, Cout)


def _mean_mel_pool1d_kernel(x_ref, o_ref):
    """mean over mel, then maxpool1d(3,1,1) + avgpool1d(3,1,1) over time.

      x_ref: (N, T, M, C) bf16 ; o_ref: (N, T, C) f32
    avg_pool1d uses count_include_pad=True (always divide by 3), max_pool1d
    pads with -inf, matching PyTorch defaults.  T is tiny here (2).
    """
    N, T, M, C = x_ref.shape
    ms = [jnp.mean(x_ref[:, t, :, :].astype(jnp.float32), axis=1, keepdims=True)
          for t in range(T)]
    neg = jnp.full_like(ms[0], -jnp.inf)
    zero = jnp.zeros_like(ms[0])
    for t in range(T):
        pm = ms[t - 1] if t > 0 else neg
        nm = ms[t + 1] if t < T - 1 else neg
        mx = jnp.maximum(jnp.maximum(pm, ms[t]), nm)
        pa = ms[t - 1] if t > 0 else zero
        na = ms[t + 1] if t < T - 1 else zero
        av = (pa + ms[t] + na) * (1.0 / 3.0)
        o_ref[:, t:t + 1, :] = (mx + av).astype(o_ref.dtype)


def mean_mel_and_pool1d(x):
    """x: (N, T, M, C) bf16 -> (N, T, C) f32."""
    N, T, M, C = x.shape
    return pl.pallas_call(
        _mean_mel_pool1d_kernel,
        out_shape=jax.ShapeDtypeStruct((N, T, C), jnp.float32),
        grid=(1,),
        in_specs=[pl.BlockSpec((N, T, M, C), lambda i: (0, 0, 0, 0))],
        out_specs=pl.BlockSpec((N, T, C), lambda i: (0, 0, 0)),
        compiler_params=pltpu.CompilerParams(
            dimension_semantics=("arbitrary",)),
    )(x)


def _fc_head_kernel(x_ref, w1_ref, b1_ref, wp_ref, bp_ref, o_ref, h_ref, *, tn):
    """latent = relu(fc1(x)); out = relu(fc1(latent)) @ Wp + bp, fused.

      x_ref: (M, K) f32   w1_ref: (K, K) bf16   b1_ref: (1, K) f32
      wp_ref: (K, E) bf16 bp_ref: (1, E) f32    o_ref: (M, E) f32
      h_ref: (M, K) f32 VMEM scratch (holds latent activation)
    fc1_w is VMEM-resident and read from HBM exactly once (byte-optimal for
    the double application); the second fc1 is fused with the projection
    tile-by-tile over the K dim.
    """
    K = w1_ref.shape[0]
    nt = K // tn
    x = x_ref[...].astype(jnp.bfloat16)
    # latent = relu(x @ W1 + b1), built column-tile by column-tile
    for j in range(nt):
        lo, hi = j * tn, (j + 1) * tn
        acc = jnp.dot(x, w1_ref[:, lo:hi], preferred_element_type=jnp.float32)
        h_ref[:, lo:hi] = jnp.maximum(acc + b1_ref[0, lo:hi], 0.0)
    h1 = h_ref[...].astype(jnp.bfloat16)
    # out = relu(h1 @ W1 + b1) @ Wp + bp  (second fc1 fused with projection)
    out = None
    for j in range(nt):
        lo, hi = j * tn, (j + 1) * tn
        acc = jnp.dot(h1, w1_ref[:, lo:hi], preferred_element_type=jnp.float32)
        h2 = jnp.maximum(acc + b1_ref[0, lo:hi], 0.0).astype(jnp.bfloat16)
        part = jnp.dot(h2, wp_ref[lo:hi, :], preferred_element_type=jnp.float32)
        out = part if out is None else out + part
    o_ref[...] = (out + bp_ref[...]).astype(o_ref.dtype)


def fc_head(x, w1, b1, wp, bp, *, tn=256):
    """x: (M, K) f32, w1: (K, K) bf16, wp: (K, E) bf16 -> (M, E) f32."""
    Mrows, K = x.shape
    E = wp.shape[1]
    assert K % tn == 0, (K, tn)
    b1r = b1.reshape(1, K).astype(jnp.float32)
    bpr = bp.reshape(1, E).astype(jnp.float32)
    return pl.pallas_call(
        functools.partial(_fc_head_kernel, tn=tn),
        out_shape=jax.ShapeDtypeStruct((Mrows, E), jnp.float32),
        grid=(1,),
        in_specs=[
            pl.BlockSpec((Mrows, K), lambda i: (0, 0)),
            pl.BlockSpec((K, K), lambda i: (0, 0)),
            pl.BlockSpec((1, K), lambda i: (0, 0)),
            pl.BlockSpec((K, E), lambda i: (0, 0)),
            pl.BlockSpec((1, E), lambda i: (0, 0)),
        ],
        out_specs=pl.BlockSpec((Mrows, E), lambda i: (0, 0)),
        scratch_shapes=[pltpu.VMEM((Mrows, K), jnp.float32)],
        compiler_params=pltpu.CompilerParams(
            dimension_semantics=("arbitrary",),
            vmem_limit_bytes=VMEM_LIMIT),
    )(x, w1, b1r, wp, bpr)


# ----------------------------------------------------------------------------
# Parameters (deterministic, in-script; matches the module's __init__ shapes)
# ----------------------------------------------------------------------------
def fold_bn(gamma, beta, mean, var):
    scale = gamma / jnp.sqrt(var + EPS)
    return scale, beta - mean * scale


def make_params(key, embed_dim=128):
    chans = [(1, 64), (64, 128), (128, 256), (256, 512), (512, 1024), (1024, 2048)]
    keys = jax.random.split(key, 16)
    ki = 0

    def xavier(k, shape, fan_in, fan_out):
        bound = math.sqrt(6.0 / (fan_in + fan_out))
        return jax.random.uniform(k, shape, jnp.float32, -bound, bound)

    params = {'blocks': []}
    for cin, cout in chans:
        w1 = xavier(keys[ki], (9, cin, cout), cin * 9, cout * 9); ki += 1
        w2 = xavier(keys[ki], (9, cout, cout), cout * 9, cout * 9); ki += 1
        if cin == 1:
            # pad the single input channel to 8 lanes with zero weights
            # (the wrapper zero-pads the input channels to match)
            w1 = jnp.pad(w1, ((0, 0), (0, 7), (0, 0)))
        # bf16 weights: halves HBM weight traffic, native MXU bf16 path
        w1 = w1.astype(jnp.bfloat16)
        w2 = w2.astype(jnp.bfloat16)
        ones = jnp.ones((cout,), jnp.float32)
        zeros = jnp.zeros((cout,), jnp.float32)
        s1, b1 = fold_bn(ones, zeros, zeros, ones)   # init_bn: gamma=1, beta=0
        s2, b2 = fold_bn(ones, zeros, zeros, ones)
        params['blocks'].append(dict(w1=w1, s1=s1, b1=b1, w2=w2, s2=s2, b2=b2))

    params['fc1_w'] = xavier(keys[ki], (2048, 2048), 2048, 2048).astype(jnp.bfloat16); ki += 1
    params['fc1_b'] = jnp.zeros((2048,), jnp.float32)
    params['proj_w'] = xavier(keys[ki], (2048, embed_dim), 2048, embed_dim).astype(jnp.bfloat16); ki += 1
    params['proj_b'] = jnp.zeros((embed_dim,), jnp.float32)
    params['bn0'] = dict(gamma=jnp.ones((128,), jnp.float32),
                         beta=jnp.zeros((128,), jnp.float32),
                         mean=jnp.zeros((128,), jnp.float32),
                         var=jnp.ones((128,), jnp.float32))
    return params


# ----------------------------------------------------------------------------
# Forward pass (glue)
# ----------------------------------------------------------------------------
def cnn14_forward(params, x_nchw):
    """x_nchw: (B, 1, T, 128) spectrogram, T divisible by 4 -> (B, T//4, embed_dim)."""
    bn0 = params['bn0']
    # torch: x.transpose(1,3); BatchNorm2d(128); transpose back == per-mel-bin affine (eval)
    scale0, bias0 = fold_bn(bn0['gamma'], bn0['beta'], bn0['mean'], bn0['var'])
    x = x_nchw.astype(jnp.float32) * scale0 + bias0      # broadcast over last (mel) axis

    # NCHW -> NHWC: (B, T, mel, 1); pad channel 1 -> 8 lanes (weights padded to match)
    x = jnp.transpose(x, (0, 2, 3, 1))
    x = jnp.pad(x, ((0, 0), (0, 0), (0, 0), (0, 7)))
    x = x.astype(jnp.bfloat16)                           # bf16 activations end-to-end

    pool_flags = [True, True, False, False, False, False]   # pool_size (2,2),(2,2),(1,1)...
    for blk, do_pool in zip(params['blocks'], pool_flags):
        for w, s, b in ((blk['w1'], blk['s1'], blk['b1']),
                        (blk['w2'], blk['s2'], blk['b2'])):
            if w.shape[-1] <= 128:
                # blocks 1-2: copy/issue-bound -> single im2col GEMM
                x = conv3x3_bn_relu_gemm(x, w, s, b)
            else:
                # blocks 3-6: weight-DMA-bound -> activation fetched once, sliced taps
                x = conv3x3_bn_relu_sliced(x, w, s, b)
        if do_pool:
            N, H, W, C = x.shape
            # 2x2 average pool (tiny activations; f32 accumulation in glue)
            x = (x.astype(jnp.float32)
                   .reshape(N, H // 2, 2, W // 2, 2, C)
                   .mean(axis=(2, 4))
                   .astype(jnp.bfloat16))
        # dropout(p=0.2): identity in inference mode (see TODO at top of file)

    lat = mean_mel_and_pool1d(x)                          # (B, T', 2048) f32
    Bp, Tp, C = lat.shape
    h = lat.reshape(Bp * Tp, C)
    # PyTorch module applies fc1 twice: latent_x = relu(fc1(.)); x = relu(fc1(latent_x))
    out = fc_head(h, params['fc1_w'], params['fc1_b'],
                  params['proj_w'], params['proj_b'])
    return out.reshape(Bp, Tp, -1)


# ----------------------------------------------------------------------------
if __name__ == "__main__":
    key = jax.random.PRNGKey(0)
    pkey, xkey = jax.random.split(key)
    embed_dim = 128
    params = make_params(pkey, embed_dim=embed_dim)

    # small input consistent with the module: (batch=2, channels=1, time=8, mel=128)
    x = jax.random.normal(xkey, (2, 1, 8, 128), jnp.float32)

    out = cnn14_forward(params, x)
    out = jax.block_until_ready(out)

    assert out.shape == (2, 2, embed_dim), out.shape
    assert bool(jnp.all(jnp.isfinite(out)))
    print("KERNEL_OK")
</pallas_src>

<mosaic_0001>
module attributes {stable_mosaic.version = 11 : i64} {
  func.func @_gemm_bn_relu_kernel(%arg0: i32, %arg1: memref<2048x72xbf16, #tpu.memory_space<vmem>>, %arg2: memref<72x64xbf16, #tpu.memory_space<vmem>>, %arg3: memref<1x64xf32, #tpu.memory_space<vmem>>, %arg4: memref<1x64xf32, #tpu.memory_space<vmem>>, %arg5: memref<2048x64xbf16, #tpu.memory_space<vmem>>) attributes {dimension_semantics = [#tpu.dimension_semantics<parallel>], iteration_bounds = array<i64: 1>, scalar_prefetch = 0 : i64, scratch_operands = 0 : i64, tpu.core_type = #tpu.core_type<tc>, window_params = [{pipeline_mode = #tpu.pipeline_mode<synchronous>, transform_indices = @transform_0, window_bounds = array<i64: 2048, 72>}, {transform_indices = @transform_1, window_bounds = array<i64: 72, 64>}, {transform_indices = @transform_2, window_bounds = array<i64: 1, 64>}, {transform_indices = @transform_3, window_bounds = array<i64: 1, 64>}, {transform_indices = @transform_4, window_bounds = array<i64: 2048, 64>}]} {
    %c0 = arith.constant 0 : index
    %c0_0 = arith.constant 0 : index
    %0 = vector.load %arg1[%c0, %c0_0] : memref<2048x72xbf16, #tpu.memory_space<vmem>>, vector<2048x72xbf16>
    %c0_1 = arith.constant 0 : index
    %c0_2 = arith.constant 0 : index
    %1 = vector.load %arg2[%c0_1, %c0_2] : memref<72x64xbf16, #tpu.memory_space<vmem>>, vector<72x64xbf16>
    %cst = arith.constant dense<0.000000e+00> : vector<2048x64xf32>
    %2 = tpu.matmul %0, %1, %cst {dimension_numbers = #tpu.dot_dimension_numbers<[1], [0], [0], [1], [0, 0, 1, 1], [], []>} : vector<2048x72xbf16>, vector<72x64xbf16>, vector<2048x64xf32> -> vector<2048x64xf32>
    %c0_3 = arith.constant 0 : index
    %c0_4 = arith.constant 0 : index
    %3 = vector.load %arg3[%c0_3, %c0_4] : memref<1x64xf32, #tpu.memory_space<vmem>>, vector<1x64xf32>
    %4 = vector.shape_cast %3 : vector<1x64xf32> to vector<64xf32>
    %5 = vector.shape_cast %4 : vector<64xf32> to vector<1x64xf32>
    %6 = vector.broadcast %5 : vector<1x64xf32> to vector<2048x64xf32>
    %7 = arith.mulf %2, %6 : vector<2048x64xf32>
    %c0_5 = arith.constant 0 : index
    %c0_6 = arith.constant 0 : index
    %8 = vector.load %arg4[%c0_5, %c0_6] : memref<1x64xf32, #tpu.memory_space<vmem>>, vector<1x64xf32>
    %9 = vector.shape_cast %8 : vector<1x64xf32> to vector<64xf32>
    %10 = vector.shape_cast %9 : vector<64xf32> to vector<1x64xf32>
    %11 = vector.broadcast %10 : vector<1x64xf32> to vector<2048x64xf32>
    %12 = arith.addf %7, %11 : vector<2048x64xf32>
    %cst_7 = arith.constant 0.000000e+00 : f32
    %13 = vector.broadcast %cst_7 : f32 to vector<2048x64xf32>
    %14 = arith.maximumf %12, %13 : vector<2048x64xf32>
    %15 = arith.truncf %14 : vector<2048x64xf32> to vector<2048x64xbf16>
    %c0_8 = arith.constant 0 : index
    %c0_9 = arith.constant 0 : index
    %16 = vector.load %arg5[%c0_8, %c0_9] : memref<2048x64xbf16, #tpu.memory_space<vmem>>, vector<2048x64xbf16>
    tpu.vector_store %arg5[%c0_8, %c0_9], %15 {strides = array<i32>} : memref<2048x64xbf16, #tpu.memory_space<vmem>>, vector<2048x64xbf16>,
    return
  }
  func.func @transform_0(%arg0: i32) -> (i32, i32) {
    %c0_i32 = arith.constant 0 : i32
    %c0_i32_0 = arith.constant 0 : i32
    %c0_i32_1 = arith.constant 0 : i32
    return %c0_i32, %c0_i32_0 : i32, i32
  }
  func.func @transform_1(%arg0: i32) -> (i32, i32) {
    %c0_i32 = arith.constant 0 : i32
    %c0_i32_0 = arith.constant 0 : i32
    return %c0_i32, %arg0 : i32, i32
  }
  func.func @transform_2(%arg0: i32) -> (i32, i32) {
    %c0_i32 = arith.constant 0 : i32
    %c0_i32_0 = arith.constant 0 : i32
    return %c0_i32, %arg0 : i32, i32
  }
  func.func @transform_3(%arg0: i32) -> (i32, i32) {
    %c0_i32 = arith.constant 0 : i32
    %c0_i32_0 = arith.constant 0 : i32
    return %c0_i32, %arg0 : i32, i32
  }
  func.func @transform_4(%arg0: i32) -> (i32, i32) {
    %c0_i32 = arith.constant 0 : i32
    %c0_i32_0 = arith.constant 0 : i32
    return %c0_i32, %arg0 : i32, i32
  }
}

</mosaic_0001>

<bundles_post_ra>
// kernel: tpu_custom_call.1
= control target key start
LH: loop header
LB: loop body
LE: loop exit
PB: predicated region body
PF: predicated region fallthrough
CT: control target
= control target key end

     0   :  { %vm950_vm0 = vcmask 588800   ;;  %vm1335_vm1 = vcmask 1043456   ;;  %vm4202_vm2 = vcmask 519168   ;;  %s7904_s1 = inlined_call_operand.vmem [shape: bf16[72,64], index: 1, kind: input, shape index: {}]   ;;  %s7905_s0 = inlined_call_operand.vmem [shape: bf16[2048,72], index: 0, kind: input, shape index: {}]   ;;  %s7906_s2 = inlined_call_operand.vmem [shape: f32[1,64], index: 2, kind: input, shape index: {}]   ;;  %s7907_s3 = inlined_call_operand.vmem [shape: f32[1,64], index: 3, kind: input, shape index: {}]   ;;  %s7908_s4 = inlined_call_operand.vmem [shape: bf16[2048,64], index: 4, kind: output, shape index: {}]  }
   0x1   :  { %v5649_v0 = vld [vmem:[%s7904_s1] sm:$0xff]   ;;  %v5650_v1 = vld [vmem:[%s7904_s1 + $0x8] sm:$0xff]   ;;  %v5651_v2 = vld [vmem:[%s7904_s1 + $0x10] sm:$0xff]  }
   0x2   :  { %5371 = vmatprep.subr.bf16.mxu0 %v5649_v0  ;;  %5637 = vmatprep.subr.bf16.mxu1 %v5649_v0  ;;  %v5654_v3 = vld [vmem:[%s7905_s0] sm:$0xff]   ;;  %v5652_v5 = vld [vmem:[%s7904_s1 + $0x18] sm:$0xff]   ;;  %v5656_v8 = vld [vmem:[%s7905_s0 + $0x8] sm:$0xff]  }
   0x3   :  { %5372 = vmatpush3.bf16.msra.mxu0 %v5649_v0  ;;  %5642 = vmatpush3.bf16.msra.mxu1 %v5649_v0  ;;  %v5655_v4 = vld [vmem:[%s7905_s0 + $0x200] sm:$0xff]   ;;  %v5657_v9 = vld [vmem:[%s7905_s0 + $0x208] sm:$0xff]   ;;  %v5658_v10 = vld [vmem:[%s7905_s0 + $0x10] sm:$0xff]  }
   0x4   :  { %5373 = vmatprep.subr.bf16.mxu0 %v5650_v1  ;;  %5638 = vmatprep.subr.bf16.mxu1 %v5650_v1  ;;  %v5653_v6 = vld [vmem:[%s7904_s1 + $0x20] ss:$0 sps:$4 sm:$0xff]   ;;  %v5659_v11 = vld [vmem:[%s7905_s0 + $0x210] sm:$0xff]   ;;  %v5660_v12 = vld [vmem:[%s7905_s0 + $0x18] sm:$0xff]  }
   0x5   :  { %5381 = vmatprep.mubr.msk.bf16.mxu0 %vm950_vm0, %v5654_v3  ;;  %5509 = vmatprep.mubr.msk.bf16.mxu1 %vm950_vm0, %v5655_v4  ;;  %v1337_v7 = vsel %vm1335_vm1, %v5653_v6, 0  ;;  %v5661_v13 = vld [vmem:[%s7905_s0 + $0x218] sm:$0xff]   ;;  %v5662_v14 = vld [vmem:[%s7905_s0 + $0x20] sm:$0xff]   ;;  %v5664_v16 = vld [vmem:[%s7905_s0 + $0x28] sm:$0xff]  }
   0x6   :  { %v5663_v15 = vld [vmem:[%s7905_s0 + $0x220] sm:$0xff]   ;;  %v5665_v17 = vld [vmem:[%s7905_s0 + $0x228] sm:$0xff]   ;;  %v5666_v18 = vld [vmem:[%s7905_s0 + $0x30] sm:$0xff]  }
   0x7   :  { %5374 = vmatpush3.bf16.msra.mxu0 %v5650_v1  ;;  %5643 = vmatpush3.bf16.msra.mxu1 %v5650_v1  ;;  %v5667_v19 = vld [vmem:[%s7905_s0 + $0x230] sm:$0xff]   ;;  %v5668_v20 = vld [vmem:[%s7905_s0 + $0x38] sm:$0xff]   ;;  %v5670_v22 = vld [vmem:[%s7905_s0 + $0x40] sm:$0xff]  }
   0x8   :  { %5375 = vmatprep.subr.bf16.mxu0 %v5651_v2  ;;  %5639 = vmatprep.subr.bf16.mxu1 %v5651_v2  ;;  %v5669_v21 = vld [vmem:[%s7905_s0 + $0x238] sm:$0xff]   ;;  %v5671_v23 = vld [vmem:[%s7905_s0 + $0x240] sm:$0xff]   ;;  %v5672_v24 = vld [vmem:[%s7905_s0 + $0x48] sm:$0xff]  }
   0x9   :  { %v5673_v25 = vld [vmem:[%s7905_s0 + $0x248] sm:$0xff]   ;;  %v5674_v26 = vld [vmem:[%s7905_s0 + $0x50] sm:$0xff]   ;;  %v5676_v28 = vld [vmem:[%s7905_s0 + $0x58] sm:$0xff]  }
   0xa   :  { %v5675_v27 = vld [vmem:[%s7905_s0 + $0x250] sm:$0xff]   ;;  %v5677_v29 = vld [vmem:[%s7905_s0 + $0x258] sm:$0xff]   ;;  %v5678_v30 = vld [vmem:[%s7905_s0 + $0x60] sm:$0xff]  }
   0xb   :  { %5376 = vmatpush3.bf16.msra.mxu0 %v5651_v2  ;;  %5644 = vmatpush3.bf16.msra.mxu1 %v5651_v2  ;;  %v5679_v31 = vld [vmem:[%s7905_s0 + $0x260] sm:$0xff]   ;;  %v5680_v32 = vld [vmem:[%s7905_s0 + $0x68] sm:$0xff]   ;;  %v5682_v34 = vld [vmem:[%s7905_s0 + $0x70] sm:$0xff]  }
   0xc   :  { %5377 = vmatprep.subr.bf16.mxu0 %v5652_v5  ;;  %5640 = vmatprep.subr.bf16.mxu1 %v5652_v5  ;;  %v5681_v33 = vld [vmem:[%s7905_s0 + $0x268] sm:$0xff]   ;;  %v5683_v35 = vld [vmem:[%s7905_s0 + $0x270] sm:$0xff]   ;;  %v5684_v36 = vld [vmem:[%s7905_s0 + $0x78] sm:$0xff]  }
   0xd   :  { %v5685_v37 = vld [vmem:[%s7905_s0 + $0x278] sm:$0xff]   ;;  %v5686_v38 = vld [vmem:[%s7905_s0 + $0x80] sm:$0xff]   ;;  %v5688_v40 = vld [vmem:[%s7905_s0 + $0x88] sm:$0xff]  }
   0xe   :  { %v5687_v39 = vld [vmem:[%s7905_s0 + $0x280] sm:$0xff]   ;;  %v5689_v41 = vld [vmem:[%s7905_s0 + $0x288] sm:$0xff]   ;;  %v5690_v42 = vld [vmem:[%s7905_s0 + $0x90] sm:$0xff]  }
   0xf   :  { %5378 = vmatpush3.bf16.msra.mxu0 %v5652_v5  ;;  %5645 = vmatpush3.bf16.msra.mxu1 %v5652_v5  ;;  %v5691_v43 = vld [vmem:[%s7905_s0 + $0x290] sm:$0xff]   ;;  %v5692_v44 = vld [vmem:[%s7905_s0 + $0x98] sm:$0xff]   ;;  %v5694_v46 = vld [vmem:[%s7905_s0 + $0xa0] sm:$0xff]  }
  0x10   :  { %5647 = vmatprep.subr.msk.bf16.mxu0 %vm1335_vm1, %v5653_v6  ;;  %5648 = vmatprep.subr.msk.bf16.mxu1 %vm1335_vm1, %v5653_v6  ;;  %v5693_v45 = vld [vmem:[%s7905_s0 + $0x298] sm:$0xff]   ;;  %v5695_v47 = vld [vmem:[%s7905_s0 + $0x2a0] sm:$0xff]   ;;  %v5696_v48 = vld [vmem:[%s7905_s0 + $0xa8] sm:$0xff]  }
  0x11   :  { %v5697_v49 = vld [vmem:[%s7905_s0 + $0x2a8] sm:$0xff]   ;;  %v5698_v50 = vld [vmem:[%s7905_s0 + $0xb0] sm:$0xff]   ;;  %v5700_v52 = vld [vmem:[%s7905_s0 + $0xb8] sm:$0xff]  }
  0x12   :  { %v5699_v51 = vld [vmem:[%s7905_s0 + $0x2b0] sm:$0xff]   ;;  %v5701_v53 = vld [vmem:[%s7905_s0 + $0x2b8] sm:$0xff]   ;;  %v5702_v54 = vld [vmem:[%s7905_s0 + $0xc0] sm:$0xff]  }
  0x13   :  { %5380 = vmatpush3.bf16.msra.mxu0 %v1337_v7  ;;  %5646 = vmatpush3.bf16.msra.mxu1 %v1337_v7  ;;  %v5703_v55 = vld [vmem:[%s7905_s0 + $0x2c0] sm:$0xff]   ;;  %v5704_v56 = vld [vmem:[%s7905_s0 + $0xc8] sm:$0xff]   ;;  %v5706_v58 = vld [vmem:[%s7905_s0 + $0xd0] sm:$0xff]  }
  0x14   :  { %v5705_v57 = vld [vmem:[%s7905_s0 + $0x2c8] sm:$0xff]   ;;  %v5707_v59 = vld [vmem:[%s7905_s0 + $0x2d0] sm:$0xff]   ;;  %v5708_v60 = vld [vmem:[%s7905_s0 + $0xd8] sm:$0xff]  }
  0x15   :  { %v5709_v61 = vld [vmem:[%s7905_s0 + $0x2d8] sm:$0xff]   ;;  %v5710_v62 = vld [vmem:[%s7905_s0 + $0xe0] sm:$0xff]   ;;  %v5712_v0 = vld [vmem:[%s7905_s0 + $0xe8] sm:$0xff]  }
  0x16   :  { %5382 = vmatmul.mubr.msk.bf16.vlgmr.msra.gmra.mrb[0].mxu0 %vm950_vm0, %v5656_v8  ;;  %5510 = vmatmul.mubr.msk.bf16.vlgmr.msra.gmra.mrb[0].mxu1 %vm950_vm0, %v5657_v9  ;;  %v5711_v63 = vld [vmem:[%s7905_s0 + $0x2e0] sm:$0xff]   ;;  %v5713_v1 = vld [vmem:[%s7905_s0 + $0x2e8] sm:$0xff]   ;;  %v5714_v2 = vld [vmem:[%s7905_s0 + $0xf0] sm:$0xff]  }
  0x17   :  { %5385 = vmatprep.mubr.msk.bf16.mxu0 %vm950_vm0, %v5658_v10  ;;  %5513 = vmatprep.mubr.msk.bf16.mxu1 %vm950_vm0, %v5659_v11  ;;  %v5715_v3 = vld [vmem:[%s7905_s0 + $0x2f0] sm:$0xff]   ;;  %v5716_v4 = vld [vmem:[%s7905_s0 + $0xf8] sm:$0xff]   ;;  %v5718_v6 = vld [vmem:[%s7905_s0 + $0x100] sm:$0xff]  }
  0x18   :  { %v5717_v5 = vld [vmem:[%s7905_s0 + $0x2f8] sm:$0xff]   ;;  %v5719_v7 = vld [vmem:[%s7905_s0 + $0x300] sm:$0xff]   ;;  %v5720_v8 = vld [vmem:[%s7905_s0 + $0x108] sm:$0xff]  }
  0x19   :  { %v5721_v9 = vld [vmem:[%s7905_s0 + $0x308] sm:$0xff]   ;;  %v5722_v10 = vld [vmem:[%s7905_s0 + $0x110] sm:$0xff]  }
  0x1a   :  { %v5723_v11 = vld [vmem:[%s7905_s0 + $0x310] sm:$0xff]  }
  0x1e   :  { %5386 = vmatmul.mubr.msk.bf16.gmra.mrb[4].mxu0 %vm950_vm0, %v5660_v12  ;;  %5514 = vmatmul.mubr.msk.bf16.gmra.mrb[4].mxu1 %vm950_vm0, %v5661_v13  ;;  %v5724_v12 = vld [vmem:[%s7905_s0 + $0x118] sm:$0xff]  }
  0x1f   :  { %5389 = vmatprep.mubr.msk.bf16.mxu0 %vm950_vm0, %v5662_v14  ;;  %5517 = vmatprep.mubr.msk.bf16.mxu1 %vm950_vm0, %v5663_v15  ;;  %v5725_v13 = vld [vmem:[%s7905_s0 + $0x318] sm:$0xff]   ;;  %v5726_v14 = vld [vmem:[%s7905_s0 + $0x120] sm:$0xff]  }
  0x20   :  { %v5727_v15 = vld [vmem:[%s7905_s0 + $0x320] sm:$0xff]  }
  0x26   :  { %5390 = vmatmul.mubr.msk.bf16.gmra.mrb[8].mxu0 %vm950_vm0, %v5664_v16  ;;  %5518 = vmatmul.mubr.msk.bf16.gmra.mrb[8].mxu1 %vm950_vm0, %v5665_v17  ;;  %v5728_v16 = vld [vmem:[%s7905_s0 + $0x128] sm:$0xff]  }
  0x27   :  { %5393 = vmatprep.mubr.msk.bf16.mxu0 %vm950_vm0, %v5666_v18  ;;  %5521 = vmatprep.mubr.msk.bf16.mxu1 %vm950_vm0, %v5667_v19  ;;  %v5729_v17 = vld [vmem:[%s7905_s0 + $0x328] sm:$0xff]   ;;  %v5730_v18 = vld [vmem:[%s7905_s0 + $0x130] sm:$0xff]  }
  0x28   :  { %v5731_v19 = vld [vmem:[%s7905_s0 + $0x330] sm:$0xff]  }
  0x2e   :  { %5394 = vmatmul.mubr.msk.bf16.gmra.mrb[12].mxu0 %vm950_vm0, %v5668_v20  ;;  %5522 = vmatmul.mubr.msk.bf16.gmra.mrb[12].mxu1 %vm950_vm0, %v5669_v21  ;;  %v5732_v20 = vld [vmem:[%s7905_s0 + $0x138] sm:$0xff]  }
  0x2f   :  { %5397 = vmatprep.mubr.msk.bf16.mxu0 %vm950_vm0, %v5670_v22  ;;  %5525 = vmatprep.mubr.msk.bf16.mxu1 %vm950_vm0, %v5671_v23  ;;  %v5733_v21 = vld [vmem:[%s7905_s0 + $0x338] sm:$0xff]   ;;  %v5734_v22 = vld [vmem:[%s7905_s0 + $0x140] sm:$0xff]  }
  0x30   :  { %v5735_v23 = vld [vmem:[%s7905_s0 + $0x340] sm:$0xff]  }
  0x36   :  { %5398 = vmatmul.mubr.msk.bf16.gmra.mrb[16].mxu0 %vm950_vm0, %v5672_v24  ;;  %5526 = vmatmul.mubr.msk.bf16.gmra.mrb[16].mxu1 %vm950_vm0, %v5673_v25  ;;  %v5736_v24 = vld [vmem:[%s7905_s0 + $0x148] sm:$0xff]  }
  0x37   :  { %5401 = vmatprep.mubr.msk.bf16.mxu0 %vm950_vm0, %v5674_v26  ;;  %5529 = vmatprep.mubr.msk.bf16.mxu1 %vm950_vm0, %v5675_v27  ;;  %v5737_v25 = vld [vmem:[%s7905_s0 + $0x348] sm:$0xff]   ;;  %v5738_v26 = vld [vmem:[%s7905_s0 + $0x150] sm:$0xff]  }
  0x38   :  { %v5739_v27 = vld [vmem:[%s7905_s0 + $0x350] sm:$0xff]  }
  0x3e   :  { %5402 = vmatmul.mubr.msk.bf16.gmra.mrb[20].mxu0 %vm950_vm0, %v5676_v28  ;;  %5530 = vmatmul.mubr.msk.bf16.gmra.mrb[20].mxu1 %vm950_vm0, %v5677_v29  ;;  %v5740_v28 = vld [vmem:[%s7905_s0 + $0x158] sm:$0xff]  }
  0x3f   :  { %5405 = vmatprep.mubr.msk.bf16.mxu0 %vm950_vm0, %v5678_v30  ;;  %5533 = vmatprep.mubr.msk.bf16.mxu1 %vm950_vm0, %v5679_v31  ;;  %v5741_v29 = vld [vmem:[%s7905_s0 + $0x358] sm:$0xff]   ;;  %v5742_v30 = vld [vmem:[%s7905_s0 + $0x160] sm:$0xff]  }
  0x40   :  { %v5743_v31 = vld [vmem:[%s7905_s0 + $0x360] sm:$0xff]  }
  0x46   :  { %5406 = vmatmul.mubr.msk.bf16.gmra.mrb[24].mxu0 %vm950_vm0, %v5680_v32  ;;  %5534 = vmatmul.mubr.msk.bf16.gmra.mrb[24].mxu1 %vm950_vm0, %v5681_v33  ;;  %v5744_v32 = vld [vmem:[%s7905_s0 + $0x168] sm:$0xff]  }
  0x47   :  { %5409 = vmatprep.mubr.msk.bf16.mxu0 %vm950_vm0, %v5682_v34  ;;  %5537 = vmatprep.mubr.msk.bf16.mxu1 %vm950_vm0, %v5683_v35  ;;  %v5745_v33 = vld [vmem:[%s7905_s0 + $0x368] sm:$0xff]   ;;  %v5746_v34 = vld [vmem:[%s7905_s0 + $0x170] sm:$0xff]  }
  0x48   :  { %v5747_v35 = vld [vmem:[%s7905_s0 + $0x370] sm:$0xff]  }
  0x4e   :  { %5410 = vmatmul.mubr.msk.bf16.gmra.mrb[28].mxu0 %vm950_vm0, %v5684_v36  ;;  %5538 = vmatmul.mubr.msk.bf16.gmra.mrb[28].mxu1 %vm950_vm0, %v5685_v37  ;;  %v5748_v36 = vld [vmem:[%s7905_s0 + $0x178] sm:$0xff]  }
  0x4f   :  { %5413 = vmatprep.mubr.msk.bf16.mxu0 %vm950_vm0, %v5686_v38  ;;  %5541 = vmatprep.mubr.msk.bf16.mxu1 %vm950_vm0, %v5687_v39  ;;  %v5749_v37 = vld [vmem:[%s7905_s0 + $0x378] sm:$0xff]   ;;  %v5750_v38 = vld [vmem:[%s7905_s0 + $0x180] sm:$0xff]  }
  0x50   :  { %v5751_v39 = vld [vmem:[%s7905_s0 + $0x380] sm:$0xff]  }
  0x56   :  { %5414 = vmatmul.mubr.msk.bf16.gmra.mrb[32].mxu0 %vm950_vm0, %v5688_v40  ;;  %5542 = vmatmul.mubr.msk.bf16.gmra.mrb[32].mxu1 %vm950_vm0, %v5689_v41  ;;  %v5752_v40 = vld [vmem:[%s7905_s0 + $0x188] sm:$0xff]  }
  0x57   :  { %5417 = vmatprep.mubr.msk.bf16.mxu0 %vm950_vm0, %v5690_v42  ;;  %5545 = vmatprep.mubr.msk.bf16.mxu1 %vm950_vm0, %v5691_v43  ;;  %v5753_v41 = vld [vmem:[%s7905_s0 + $0x388] sm:$0xff]   ;;  %v5754_v42 = vld [vmem:[%s7905_s0 + $0x190] sm:$0xff]  }
  0x58   :  { %v5755_v43 = vld [vmem:[%s7905_s0 + $0x390] sm:$0xff]  }
  0x5e   :  { %5418 = vmatmul.mubr.msk.bf16.gmra.mrb[36].mxu0 %vm950_vm0, %v5692_v44  ;;  %5546 = vmatmul.mubr.msk.bf16.gmra.mrb[36].mxu1 %vm950_vm0, %v5693_v45  ;;  %v5756_v44 = vld [vmem:[%s7905_s0 + $0x198] sm:$0xff]  }
  0x5f   :  { %5421 = vmatprep.mubr.msk.bf16.mxu0 %vm950_vm0, %v5694_v46  ;;  %5549 = vmatprep.mubr.msk.bf16.mxu1 %vm950_vm0, %v5695_v47  ;;  %v5757_v45 = vld [vmem:[%s7905_s0 + $0x398] sm:$0xff]   ;;  %v5758_v46 = vld [vmem:[%s7905_s0 + $0x1a0] sm:$0xff]  }
  0x60   :  { %v5759_v47 = vld [vmem:[%s7905_s0 + $0x3a0] sm:$0xff]  }
  0x66   :  { %5422 = vmatmul.mubr.msk.bf16.gmra.mrb[40].mxu0 %vm950_vm0, %v5696_v48  ;;  %5550 = vmatmul.mubr.msk.bf16.gmra.mrb[40].mxu1 %vm950_vm0, %v5697_v49  ;;  %v5760_v48 = vld [vmem:[%s7905_s0 + $0x1a8] sm:$0xff]  }
  0x67   :  { %5425 = vmatprep.mubr.msk.bf16.mxu0 %vm950_vm0, %v5698_v50  ;;  %5553 = vmatprep.mubr.msk.bf16.mxu1 %vm950_vm0, %v5699_v51  ;;  %v5761_v49 = vld [vmem:[%s7905_s0 + $0x3a8] sm:$0xff]   ;;  %v5762_v50 = vld [vmem:[%s7905_s0 + $0x1b0] sm:$0xff]  }
  0x68   :  { %v5763_v51 = vld [vmem:[%s7905_s0 + $0x3b0] sm:$0xff]  }
  0x6e   :  { %5426 = vmatmul.mubr.msk.bf16.gmra.mrb[44].mxu0 %vm950_vm0, %v5700_v52  ;;  %5554 = vmatmul.mubr.msk.bf16.gmra.mrb[44].mxu1 %vm950_vm0, %v5701_v53  ;;  %v6267_v52 = vld [vmem:[%s7906_s2] ss:$0 sm:$0xff] }
  0x6f   :  { %5429 = vmatprep.mubr.msk.bf16.mxu0 %vm950_vm0, %v5702_v54  ;;  %5557 = vmatprep.mubr.msk.bf16.mxu1 %vm950_vm0, %v5703_v55  ;;  %v6274_v54 = vld [vmem:[%s7907_s3] ss:$0 sm:$0xff] }
  0x76   :  { %5430 = vmatmul.mubr.msk.bf16.gmra.mrb[48].mxu0 %vm950_vm0, %v5704_v56  ;;  %5558 = vmatmul.mubr.msk.bf16.gmra.mrb[48].mxu1 %vm950_vm0, %v5705_v57 }
  0x77   :  { %5433 = vmatprep.mubr.msk.bf16.mxu0 %vm950_vm0, %v5706_v58  ;;  %5561 = vmatprep.mubr.msk.bf16.mxu1 %vm950_vm0, %v5707_v59 }
  0x7e   :  { %5434 = vmatmul.mubr.msk.bf16.gmra.mrb[52].mxu0 %vm950_vm0, %v5708_v60  ;;  %5562 = vmatmul.mubr.msk.bf16.gmra.mrb[52].mxu1 %vm950_vm0, %v5709_v61  ;;  %v5764_v60 = vld [vmem:[%s7905_s0 + $0x1b8] sm:$0xff]  }
  0x7f   :  { %5437 = vmatprep.mubr.msk.bf16.mxu0 %vm950_vm0, %v5710_v62  ;;  %5565 = vmatprep.mubr.msk.bf16.mxu1 %vm950_vm0, %v5711_v63  ;;  %v5765_v61 = vld [vmem:[%s7905_s0 + $0x3b8] sm:$0xff]  }
  0x86   :  { %5438 = vmatmul.mubr.msk.bf16.gmra.mrb[56].mxu0 %vm950_vm0, %v5712_v0  ;;  %5566 = vmatmul.mubr.msk.bf16.gmra.mrb[56].mxu1 %vm950_vm0, %v5713_v1 }
  0x87   :  { %5441 = vmatprep.mubr.msk.bf16.mxu0 %vm950_vm0, %v5714_v2  ;;  %5569 = vmatprep.mubr.msk.bf16.mxu1 %vm950_vm0, %v5715_v3  ;;  %v5766_v2 = vld [vmem:[%s7905_s0 + $0x1c0] sm:$0xff]  }
  0x88   :  { %v5767_v3 = vld [vmem:[%s7905_s0 + $0x3c0] sm:$0xff]  }
  0x8e   :  { %5442 = vmatmul.mubr.msk.bf16.gmra.mrb[60].mxu0 %vm950_vm0, %v5716_v4  ;;  %5570 = vmatmul.mubr.msk.bf16.gmra.mrb[60].mxu1 %vm950_vm0, %v5717_v5 }
  0x8f   :  { %5445 = vmatprep.mubr.msk.bf16.mxu0 %vm950_vm0, %v5718_v6  ;;  %5573 = vmatprep.mubr.msk.bf16.mxu1 %vm950_vm0, %v5719_v7 }
  0x96   :  { %5446 = vmatmul.mubr.msk.bf16.gmra.mrb[64].mxu0 %vm950_vm0, %v5720_v8  ;;  %5574 = vmatmul.mubr.msk.bf16.gmra.mrb[64].mxu1 %vm950_vm0, %v5721_v9 }
  0x97   :  { %5449 = vmatprep.mubr.msk.bf16.mxu0 %vm950_vm0, %v5722_v10  ;;  %5577 = vmatprep.mubr.msk.bf16.mxu1 %vm950_vm0, %v5723_v11 }
  0x9e   :  { %5450 = vmatmul.mubr.msk.bf16.gmra.mrb[68].mxu0 %vm950_vm0, %v5724_v12  ;;  %5578 = vmatmul.mubr.msk.bf16.gmra.mrb[68].mxu1 %vm950_vm0, %v5725_v13 }
  0x9f   :  { %5453 = vmatprep.mubr.msk.bf16.mxu0 %vm950_vm0, %v5726_v14  ;;  %5581 = vmatprep.mubr.msk.bf16.mxu1 %vm950_vm0, %v5727_v15 }
  0xa6   :  { %5454 = vmatmul.mubr.msk.bf16.gmra.mrb[72].mxu0 %vm950_vm0, %v5728_v16  ;;  %5582 = vmatmul.mubr.msk.bf16.gmra.mrb[72].mxu1 %vm950_vm0, %v5729_v17 }
  0xa7   :  { %5457 = vmatprep.mubr.msk.bf16.mxu0 %vm950_vm0, %v5730_v18  ;;  %5585 = vmatprep.mubr.msk.bf16.mxu1 %vm950_vm0, %v5731_v19 }
  0xae   :  { %5458 = vmatmul.mubr.msk.bf16.gmra.mrb[76].mxu0 %vm950_vm0, %v5732_v20  ;;  %5586 = vmatmul.mubr.msk.bf16.gmra.mrb[76].mxu1 %vm950_vm0, %v5733_v21 }
  0xaf   :  { %5461 = vmatprep.mubr.msk.bf16.mxu0 %vm950_vm0, %v5734_v22  ;;  %5589 = vmatprep.mubr.msk.bf16.mxu1 %vm950_vm0, %v5735_v23 }
  0xb6   :  { %5462 = vmatmul.mubr.msk.bf16.gmra.mrb[80].mxu0 %vm950_vm0, %v5736_v24  ;;  %5590 = vmatmul.mubr.msk.bf16.gmra.mrb[80].mxu1 %vm950_vm0, %v5737_v25 }
  0xb7   :  { %5465 = vmatprep.mubr.msk.bf16.mxu0 %vm950_vm0, %v5738_v26  ;;  %5593 = vmatprep.mubr.msk.bf16.mxu1 %vm950_vm0, %v5739_v27 }
  0xbe   :  { %5466 = vmatmul.mubr.msk.bf16.gmra.mrb[84].mxu0 %vm950_vm0, %v5740_v28  ;;  %5594 = vmatmul.mubr.msk.bf16.gmra.mrb[84].mxu1 %vm950_vm0, %v5741_v29 }
  0xbf   :  { %5469 = vmatprep.mubr.msk.bf16.mxu0 %vm950_vm0, %v5742_v30  ;;  %5597 = vmatprep.mubr.msk.bf16.mxu1 %vm950_vm0, %v5743_v31 }
  0xc6   :  { %5470 = vmatmul.mubr.msk.bf16.gmra.mrb[88].mxu0 %vm950_vm0, %v5744_v32  ;;  %5598 = vmatmul.mubr.msk.bf16.gmra.mrb[88].mxu1 %vm950_vm0, %v5745_v33 }
  0xc7   :  { %5473 = vmatprep.mubr.msk.bf16.mxu0 %vm950_vm0, %v5746_v34  ;;  %5601 = vmatprep.mubr.msk.bf16.mxu1 %vm950_vm0, %v5747_v35 }
  0xce   :  { %5474 = vmatmul.mubr.msk.bf16.gmra.mrb[92].mxu0 %vm950_vm0, %v5748_v36  ;;  %5602 = vmatmul.mubr.msk.bf16.gmra.mrb[92].mxu1 %vm950_vm0, %v5749_v37 }
  0xcf   :  { %5477 = vmatprep.mubr.msk.bf16.mxu0 %vm950_vm0, %v5750_v38  ;;  %5605 = vmatprep.mubr.msk.bf16.mxu1 %vm950_vm0, %v5751_v39  ;;  %v5768_v38 = vld [vmem:[%s7905_s0 + $0x1c8] sm:$0xff]  }
  0xd0   :  { %v5769_v39 = vld [vmem:[%s7905_s0 + $0x3c8] sm:$0xff]  }
  0xd6   :  { %5478 = vmatmul.mubr.msk.bf16.gmra.mrb[96].mxu0 %vm950_vm0, %v5752_v40  ;;  %5606 = vmatmul.mubr.msk.bf16.gmra.mrb[96].mxu1 %vm950_vm0, %v5753_v41 }
  0xd7   :  { %5481 = vmatprep.mubr.msk.bf16.mxu0 %vm950_vm0, %v5754_v42  ;;  %5609 = vmatprep.mubr.msk.bf16.mxu1 %vm950_vm0, %v5755_v43 }
  0xde   :  { %5482 = vmatmul.mubr.msk.bf16.gmra.mrb[100].mxu0 %vm950_vm0, %v5756_v44  ;;  %5610 = vmatmul.mubr.msk.bf16.gmra.mrb[100].mxu1 %vm950_vm0, %v5757_v45 }
  0xdf   :  { %5485 = vmatprep.mubr.msk.bf16.mxu0 %vm950_vm0, %v5758_v46  ;;  %5613 = vmatprep.mubr.msk.bf16.mxu1 %vm950_vm0, %v5759_v47  ;;  %v5770_v46 = vld [vmem:[%s7905_s0 + $0x1d0] sm:$0xff]  }
  0xe0   :  { %v5771_v47 = vld [vmem:[%s7905_s0 + $0x3d0] sm:$0xff]  }
  0xe6   :  { %5486 = vmatmul.mubr.msk.bf16.gmra.mrb[104].mxu0 %vm950_vm0, %v5760_v48  ;;  %5614 = vmatmul.mubr.msk.bf16.gmra.mrb[104].mxu1 %vm950_vm0, %v5761_v49 }
  0xe7   :  { %5489 = vmatprep.mubr.msk.bf16.mxu0 %vm950_vm0, %v5762_v50  ;;  %5617 = vmatprep.mubr.msk.bf16.mxu1 %vm950_vm0, %v5763_v51 }
  0xe9   :  { %v5383_v53 = vpop.f32.mrb[0].mxu0  ;;  %v5511_v55 = vpop.f32.mrb[0].mxu1 }
  0xea   :  { %v2405_v56 = vmul.f32 %v5383_v53, %v6267_v52  ;;  %v2533_v57 = vmul.f32 %v5511_v55, %v6267_v52  ;;  %v1373_v58 = vpop.f32.mrb[1].mxu0  ;;  %v1885_v59 = vpop.f32.mrb[1].mxu1 }
  0xeb   :  { %v2403_v62 = vmul.f32 %v6267_v52, %v1373_v58  ;;  %v2531_v63 = vmul.f32 %v6267_v52, %v1885_v59  ;;  %v5384_v0 = vpop.f32.mrb[2].mxu0  ;;  %v5512_v1 = vpop.f32.mrb[2].mxu1 }
  0xec   :  { %v2668_v4 = vadd.f32 %v6274_v54, %v2405_v56  ;;  %v2796_v5 = vadd.f32 %v6274_v54, %v2533_v57  ;;  %v2406_v6 = vmul.f32 %v5384_v0, %v6267_v52  ;;  %v2534_v7 = vmul.f32 %v5512_v1, %v6267_v52  ;;  %v1376_v8 = vpop.f32.mrb[3].mxu0  ;;  %v1888_v9 = vpop.f32.mrb[3].mxu1 }
  0xed   :  { %v2666_v10 = vadd.f32 %v6274_v54, %v2403_v62  ;;  %v2794_v11 = vadd.f32 %v6274_v54, %v2531_v63  ;;  %v2404_v12 = vmul.f32 %v6267_v52, %v1376_v8  ;;  %v2532_v13 = vmul.f32 %v6267_v52, %v1888_v9 }
  0xee   :  { %v2924_v14 = vmax.f32 %v2668_v4, 0.0  ;;  %v3052_v15 = vmax.f32 %v2796_v5, 0.0  ;;  %v2669_v16 = vadd.f32 %v6274_v54, %v2406_v6  ;;  %v2797_v17 = vadd.f32 %v6274_v54, %v2534_v7  ;;  %5490 = vmatmul.mubr.msk.bf16.gmra.mrb[108].mxu0 %vm950_vm0, %v5764_v60  ;;  %5618 = vmatmul.mubr.msk.bf16.gmra.mrb[108].mxu1 %vm950_vm0, %v5765_v61 }
  0xef   :  { %v2922_v18 = vmax.f32 %v2666_v10, 0.0  ;;  %v3050_v19 = vmax.f32 %v2794_v11, 0.0  ;;  %v2667_v20 = vadd.f32 %v6274_v54, %v2404_v12  ;;  %v2795_v21 = vadd.f32 %v6274_v54, %v2532_v13  ;;  %5493 = vmatprep.mubr.msk.bf16.mxu0 %vm950_vm0, %v5766_v2  ;;  %5621 = vmatprep.mubr.msk.bf16.mxu1 %vm950_vm0, %v5767_v3 }
  0xf0   :  { %v4984_v22 = vpack.c.bf16 %v2924_v14, %v2924_v14  ;;  %v5112_v23 = vpack.c.bf16 %v3052_v15, %v3052_v15  ;;  %v2925_v24 = vmax.f32 %v2669_v16, 0.0  ;;  %v3053_v25 = vmax.f32 %v2797_v17, 0.0 }
  0xf1   :  { %v4982_v26 = vpack.c.bf16 %v2922_v18, %v2922_v18  ;;  %v5110_v27 = vpack.c.bf16 %v3050_v19, %v3050_v19  ;;  %v2923_v28 = vmax.f32 %v2667_v20, 0.0  ;;  %v3051_v29 = vmax.f32 %v2795_v21, 0.0  ;;  %v5387_v30 = vpop.f32.mrb[4].mxu0  ;;  %v5515_v31 = vpop.f32.mrb[4].mxu1  ;;  %v5772_v20 = vld [vmem:[%s7905_s0 + $0x1d8] sm:$0xff]  }
  0xf2   :  { %4205 = vst.msk [vmem:[%s7908_s4 + $0x8] sm:$0xf] %vm4202_vm2, %v4984_v22  ;;  %4333 = vst.msk [vmem:[%s7908_s4 + $0x208] sm:$0xf] %vm4202_vm2, %v5112_v23  ;;  %v4985_v32 = vpack.c.bf16 %v2925_v24, %v2925_v24  ;;  %v5113_v33 = vpack.c.bf16 %v3053_v25, %v3053_v25  ;;  %v2409_v34 = vmul.f32 %v5387_v30, %v6267_v52  ;;  %v1389_v36 = vpop.f32.mrb[5].mxu0  ;;  %v1901_v37 = vpop.f32.mrb[5].mxu1 }
  0xf3   :  { %v2537_v35 = vmul.f32 %v5515_v31, %v6267_v52  ;;  %4203 = vst.msk [vmem:[%s7908_s4] sm:$0xf] %vm4202_vm2, %v4982_v26  ;;  %4331 = vst.msk [vmem:[%s7908_s4 + $0x200] sm:$0xf] %vm4202_vm2, %v5110_v27  ;;  %v4983_v40 = vpack.c.bf16 %v2923_v28, %v2923_v28  ;;  %v5111_v41 = vpack.c.bf16 %v3051_v29, %v3051_v29  ;;  %v5388_v44 = vpop.f32.mrb[6].mxu0  ;;  %v5516_v45 = vpop.f32.mrb[6].mxu1 }
  0xf4   :  { %v2407_v42 = vmul.f32 %v6267_v52, %v1389_v36  ;;  %v2535_v43 = vmul.f32 %v6267_v52, %v1901_v37  ;;  %4206 = vst.msk [vmem:[%s7908_s4 + $0xc] sm:$0xf] %vm4202_vm2, %v4985_v32  ;;  %4334 = vst.msk [vmem:[%s7908_s4 + $0x20c] sm:$0xf] %vm4202_vm2, %v5113_v33  ;;  %v2672_v48 = vadd.f32 %v6274_v54, %v2409_v34  ;;  %v1392_v53 = vpop.f32.mrb[7].mxu0  ;;  %v1904_v55 = vpop.f32.mrb[7].mxu1 }
  0xf5   :  { %v2800_v49 = vadd.f32 %v6274_v54, %v2537_v35  ;;  %v2410_v50 = vmul.f32 %v5388_v44, %v6267_v52  ;;  %v2538_v51 = vmul.f32 %v5516_v45, %v6267_v52  ;;  %4204 = vst.msk [vmem:[%s7908_s4 + $0x4] sm:$0xf] %vm4202_vm2, %v4983_v40  ;;  %4332 = vst.msk [vmem:[%s7908_s4 + $0x204] sm:$0xf] %vm4202_vm2, %v5111_v41  ;;  %v5773_v21 = vld [vmem:[%s7905_s0 + $0x3d8] sm:$0xff]   ;;  %v5774_v28 = vld [vmem:[%s7905_s0 + $0x1e0] sm:$0xff]  }
  0xf6   :  { %v2670_v56 = vadd.f32 %v6274_v54, %v2407_v42  ;;  %v2798_v57 = vadd.f32 %v6274_v54, %v2535_v43  ;;  %v2408_v58 = vmul.f32 %v6267_v52, %v1392_v53  ;;  %v2536_v59 = vmul.f32 %v6267_v52, %v1904_v55  ;;  %5494 = vmatmul.mubr.msk.bf16.gmra.mrb[112].mxu0 %vm950_vm0, %v5768_v38  ;;  %v5775_v29 = vld [vmem:[%s7905_s0 + $0x3e0] sm:$0xff]  }
  0xf7   :  { %v2928_v60 = vmax.f32 %v2672_v48, 0.0  ;;  %v3056_v61 = vmax.f32 %v2800_v49, 0.0  ;;  %v2673_v62 = vadd.f32 %v6274_v54, %v2410_v50  ;;  %v2801_v63 = vadd.f32 %v6274_v54, %v2538_v51  ;;  %5622 = vmatmul.mubr.msk.bf16.gmra.mrb[112].mxu1 %vm950_vm0, %v5769_v39  ;;  %5497 = vmatprep.mubr.msk.bf16.mxu0 %vm950_vm0, %v5770_v46 }
  0xf8   :  { %v2926_v0 = vmax.f32 %v2670_v56, 0.0  ;;  %v3054_v1 = vmax.f32 %v2798_v57, 0.0  ;;  %v2671_v2 = vadd.f32 %v6274_v54, %v2408_v58  ;;  %v2799_v3 = vadd.f32 %v6274_v54, %v2536_v59  ;;  %5625 = vmatprep.mubr.msk.bf16.mxu1 %vm950_vm0, %v5771_v47 }
  0xf9   :  { %v4988_v4 = vpack.c.bf16 %v2928_v60, %v2928_v60  ;;  %v5116_v5 = vpack.c.bf16 %v3056_v61, %v3056_v61  ;;  %v2929_v6 = vmax.f32 %v2673_v62, 0.0  ;;  %v3057_v7 = vmax.f32 %v2801_v63, 0.0  ;;  %v5391_v12 = vpop.f32.mrb[8].mxu0  ;;  %v5519_v13 = vpop.f32.mrb[8].mxu1 }
  0xfa   :  { %v4986_v8 = vpack.c.bf16 %v2926_v0, %v2926_v0  ;;  %v5114_v9 = vpack.c.bf16 %v3054_v1, %v3054_v1  ;;  %v2927_v10 = vmax.f32 %v2671_v2, 0.0  ;;  %v3055_v11 = vmax.f32 %v2799_v3, 0.0  ;;  %v1405_v18 = vpop.f32.mrb[9].mxu0  ;;  %v1917_v19 = vpop.f32.mrb[9].mxu1  ;;  %v5776_v2 = vld [vmem:[%s7905_s0 + $0x1e8] sm:$0xff]  }
  0xfb   :  { %4209 = vst.msk [vmem:[%s7908_s4 + $0x18] sm:$0xf] %vm4202_vm2, %v4988_v4  ;;  %4337 = vst.msk [vmem:[%s7908_s4 + $0x218] sm:$0xf] %vm4202_vm2, %v5116_v5  ;;  %v4989_v14 = vpack.c.bf16 %v2929_v6, %v2929_v6  ;;  %v5117_v15 = vpack.c.bf16 %v3057_v7, %v3057_v7  ;;  %v2413_v16 = vmul.f32 %v5391_v12, %v6267_v52  ;;  %v5392_v26 = vpop.f32.mrb[10].mxu0  ;;  %v5520_v27 = vpop.f32.mrb[10].mxu1 }
  0xfc   :  { %v2541_v17 = vmul.f32 %v5519_v13, %v6267_v52  ;;  %4207 = vst.msk [vmem:[%s7908_s4 + $0x10] sm:$0xf] %vm4202_vm2, %v4986_v8  ;;  %4335 = vst.msk [vmem:[%s7908_s4 + $0x210] sm:$0xf] %vm4202_vm2, %v5114_v9  ;;  %v4987_v22 = vpack.c.bf16 %v2927_v10, %v2927_v10  ;;  %v5115_v23 = vpack.c.bf16 %v3055_v11, %v3055_v11  ;;  %v1408_v34 = vpop.f32.mrb[11].mxu0  ;;  %v1920_v35 = vpop.f32.mrb[11].mxu1 }
  0xfd   :  { %v2411_v24 = vmul.f32 %v6267_v52, %v1405_v18  ;;  %v2539_v25 = vmul.f32 %v6267_v52, %v1917_v19  ;;  %4210 = vst.msk [vmem:[%s7908_s4 + $0x1c] sm:$0xf] %vm4202_vm2, %v4989_v14  ;;  %4338 = vst.msk [vmem:[%s7908_s4 + $0x21c] sm:$0xf] %vm4202_vm2, %v5117_v15  ;;  %v2676_v30 = vadd.f32 %v6274_v54, %v2413_v16  ;;  %v5777_v3 = vld [vmem:[%s7905_s0 + $0x3e8] sm:$0xff]   ;;  %v5778_v10 = vld [vmem:[%s7905_s0 + $0x1f0] sm:$0xff]  }
  0xfe   :  { %v2804_v31 = vadd.f32 %v6274_v54, %v2541_v17  ;;  %v2414_v32 = vmul.f32 %v5392_v26, %v6267_v52  ;;  %v2542_v33 = vmul.f32 %v5520_v27, %v6267_v52  ;;  %4208 = vst.msk [vmem:[%s7908_s4 + $0x14] sm:$0xf] %vm4202_vm2, %v4987_v22  ;;  %4336 = vst.msk [vmem:[%s7908_s4 + $0x214] sm:$0xf] %vm4202_vm2, %v5115_v23  ;;  %5498 = vmatmul.mubr.msk.bf16.gmra.mrb[116].mxu0 %vm950_vm0, %v5772_v20  ;;  %v5779_v11 = vld [vmem:[%s7905_s0 + $0x3f0] sm:$0xff]  }
  0xff   :  { %v2674_v36 = vadd.f32 %v6274_v54, %v2411_v24  ;;  %v2802_v37 = vadd.f32 %v6274_v54, %v2539_v25  ;;  %v2412_v38 = vmul.f32 %v6267_v52, %v1408_v34  ;;  %v2540_v39 = vmul.f32 %v6267_v52, %v1920_v35  ;;  %5626 = vmatmul.mubr.msk.bf16.gmra.mrb[116].mxu1 %vm950_vm0, %v5773_v21 }
 0x100   :  { %v2932_v40 = vmax.f32 %v2676_v30, 0.0  ;;  %v3060_v41 = vmax.f32 %v2804_v31, 0.0  ;;  %v2677_v42 = vadd.f32 %v6274_v54, %v2414_v32  ;;  %v2805_v43 = vadd.f32 %v6274_v54, %v2542_v33  ;;  %5501 = vmatprep.mubr.msk.bf16.mxu0 %vm950_vm0, %v5774_v28  ;;  %5629 = vmatprep.mubr.msk.bf16.mxu1 %vm950_vm0, %v5775_v29 }
 0x101   :  { %v2930_v44 = vmax.f32 %v2674_v36, 0.0  ;;  %v3058_v45 = vmax.f32 %v2802_v37, 0.0  ;;  %v2675_v46 = vadd.f32 %v6274_v54, %v2412_v38  ;;  %v2803_v47 = vadd.f32 %v6274_v54, %v2540_v39  ;;  %v5395_v58 = vpop.f32.mrb[12].mxu0  ;;  %v5523_v59 = vpop.f32.mrb[12].mxu1 }
 0x102   :  { %v4992_v48 = vpack.c.bf16 %v2932_v40, %v2932_v40  ;;  %v5120_v49 = vpack.c.bf16 %v3060_v41, %v3060_v41  ;;  %v2933_v50 = vmax.f32 %v2677_v42, 0.0  ;;  %v3061_v51 = vmax.f32 %v2805_v43, 0.0  ;;  %v1421_v0 = vpop.f32.mrb[13].mxu0  ;;  %v1933_v1 = vpop.f32.mrb[13].mxu1 }
 0x103   :  { %v4990_v53 = vpack.c.bf16 %v2930_v44, %v2930_v44  ;;  %v5118_v55 = vpack.c.bf16 %v3058_v45, %v3058_v45  ;;  %v2931_v56 = vmax.f32 %v2675_v46, 0.0  ;;  %v3059_v57 = vmax.f32 %v2803_v47, 0.0  ;;  %v5396_v8 = vpop.f32.mrb[14].mxu0  ;;  %v5524_v9 = vpop.f32.mrb[14].mxu1  ;;  %v5780_v46 = vld [vmem:[%s7905_s0 + $0x1f8] sm:$0xff]  }
 0x104   :  { %4213 = vst.msk [vmem:[%s7908_s4 + $0x28] sm:$0xf] %vm4202_vm2, %v4992_v48  ;;  %4341 = vst.msk [vmem:[%s7908_s4 + $0x228] sm:$0xf] %vm4202_vm2, %v5120_v49  ;;  %v4993_v60 = vpack.c.bf16 %v2933_v50, %v2933_v50  ;;  %v5121_v61 = vpack.c.bf16 %v3061_v51, %v3061_v51  ;;  %v2417_v62 = vmul.f32 %v5395_v58, %v6267_v52  ;;  %v1424_v16 = vpop.f32.mrb[15].mxu0  ;;  %v1936_v17 = vpop.f32.mrb[15].mxu1 }
 0x105   :  { %v2545_v63 = vmul.f32 %v5523_v59, %v6267_v52  ;;  %4211 = vst.msk [vmem:[%s7908_s4 + $0x20] sm:$0xf] %vm4202_vm2, %v4990_v53  ;;  %4339 = vst.msk [vmem:[%s7908_s4 + $0x220] sm:$0xf] %vm4202_vm2, %v5118_v55  ;;  %v4991_v4 = vpack.c.bf16 %v2931_v56, %v2931_v56  ;;  %v5119_v5 = vpack.c.bf16 %v3059_v57, %v3059_v57  ;;  %v5781_v47 = vld [vmem:[%s7905_s0 + $0x3f8] sm:$0xff]  }
 0x106   :  { %v2415_v6 = vmul.f32 %v6267_v52, %v1421_v0  ;;  %v2543_v7 = vmul.f32 %v6267_v52, %v1933_v1  ;;  %4214 = vst.msk [vmem:[%s7908_s4 + $0x2c] sm:$0xf] %vm4202_vm2, %v4993_v60  ;;  %4342 = vst.msk [vmem:[%s7908_s4 + $0x22c] sm:$0xf] %vm4202_vm2, %v5121_v61  ;;  %v2680_v12 = vadd.f32 %v6274_v54, %v2417_v62  ;;  %5502 = vmatmul.mubr.msk.bf16.gmra.mrb[120].mxu0 %vm950_vm0, %v5776_v2 }
 0x107   :  { %v2808_v13 = vadd.f32 %v6274_v54, %v2545_v63  ;;  %v2418_v14 = vmul.f32 %v5396_v8, %v6267_v52  ;;  %v2546_v15 = vmul.f32 %v5524_v9, %v6267_v52  ;;  %4212 = vst.msk [vmem:[%s7908_s4 + $0x24] sm:$0xf] %vm4202_vm2, %v4991_v4  ;;  %4340 = vst.msk [vmem:[%s7908_s4 + $0x224] sm:$0xf] %vm4202_vm2, %v5119_v5  ;;  %5630 = vmatmul.mubr.msk.bf16.gmra.mrb[120].mxu1 %vm950_vm0, %v5777_v3 }
 0x108   :  { %v2678_v18 = vadd.f32 %v6274_v54, %v2415_v6  ;;  %v2806_v19 = vadd.f32 %v6274_v54, %v2543_v7  ;;  %v2416_v20 = vmul.f32 %v6267_v52, %v1424_v16  ;;  %v2544_v21 = vmul.f32 %v6267_v52, %v1936_v17  ;;  %5505 = vmatprep.mubr.msk.bf16.mxu0 %vm950_vm0, %v5778_v10 }
 0x109   :  { %v2936_v22 = vmax.f32 %v2680_v12, 0.0  ;;  %v3064_v23 = vmax.f32 %v2808_v13, 0.0  ;;  %v2681_v24 = vadd.f32 %v6274_v54, %v2418_v14  ;;  %v2809_v25 = vadd.f32 %v6274_v54, %v2546_v15  ;;  %5633 = vmatprep.mubr.msk.bf16.mxu1 %vm950_vm0, %v5779_v11  ;;  %v5399_v38 = vpop.f32.mrb[16].mxu0  ;;  %v5527_v39 = vpop.f32.mrb[16].mxu1 }
 0x10a   :  { %v2934_v26 = vmax.f32 %v2678_v18, 0.0  ;;  %v3062_v27 = vmax.f32 %v2806_v19, 0.0  ;;  %v2679_v28 = vadd.f32 %v6274_v54, %v2416_v20  ;;  %v2807_v29 = vadd.f32 %v6274_v54, %v2544_v21  ;;  %v1437_v44 = vpop.f32.mrb[17].mxu0  ;;  %v1949_v45 = vpop.f32.mrb[17].mxu1 }
 0x10b   :  { %v4996_v30 = vpack.c.bf16 %v2936_v22, %v2936_v22  ;;  %v5124_v31 = vpack.c.bf16 %v3064_v23, %v3064_v23  ;;  %v2937_v32 = vmax.f32 %v2681_v24, 0.0  ;;  %v3065_v33 = vmax.f32 %v2809_v25, 0.0  ;;  %v5400_v53 = vpop.f32.mrb[18].mxu0  ;;  %v5528_v55 = vpop.f32.mrb[18].mxu1 }
 0x10c   :  { %v4994_v34 = vpack.c.bf16 %v2934_v26, %v2934_v26  ;;  %v5122_v35 = vpack.c.bf16 %v3062_v27, %v3062_v27  ;;  %v2935_v36 = vmax.f32 %v2679_v28, 0.0  ;;  %v3063_v37 = vmax.f32 %v2807_v29, 0.0  ;;  %v1440_v60 = vpop.f32.mrb[19].mxu0  ;;  %v1952_v61 = vpop.f32.mrb[19].mxu1 }
 0x10d   :  { %4217 = vst.msk [vmem:[%s7908_s4 + $0x38] sm:$0xf] %vm4202_vm2, %v4996_v30  ;;  %4345 = vst.msk [vmem:[%s7908_s4 + $0x238] sm:$0xf] %vm4202_vm2, %v5124_v31  ;;  %v4997_v40 = vpack.c.bf16 %v2937_v32, %v2937_v32  ;;  %v5125_v41 = vpack.c.bf16 %v3065_v33, %v3065_v33  ;;  %v2421_v42 = vmul.f32 %v5399_v38, %v6267_v52 }
 0x10e   :  { %v2549_v43 = vmul.f32 %v5527_v39, %v6267_v52  ;;  %4215 = vst.msk [vmem:[%s7908_s4 + $0x30] sm:$0xf] %vm4202_vm2, %v4994_v34  ;;  %4343 = vst.msk [vmem:[%s7908_s4 + $0x230] sm:$0xf] %vm4202_vm2, %v5122_v35  ;;  %v4995_v48 = vpack.c.bf16 %v2935_v36, %v2935_v36  ;;  %v5123_v49 = vpack.c.bf16 %v3063_v37, %v3063_v37  ;;  %5506 = vmatmul.mubr.msk.bf16.gmra.mrb[124].mxu0 %vm950_vm0, %v5780_v46 }
 0x10f   :  { %v2419_v50 = vmul.f32 %v6267_v52, %v1437_v44  ;;  %v2547_v51 = vmul.f32 %v6267_v52, %v1949_v45  ;;  %4218 = vst.msk [vmem:[%s7908_s4 + $0x3c] sm:$0xf] %vm4202_vm2, %v4997_v40  ;;  %4346 = vst.msk [vmem:[%s7908_s4 + $0x23c] sm:$0xf] %vm4202_vm2, %v5125_v41  ;;  %v2684_v56 = vadd.f32 %v6274_v54, %v2421_v42  ;;  %5634 = vmatmul.mubr.msk.bf16.gmra.mrb[124].mxu1 %vm950_vm0, %v5781_v47 }
 0x110   :  { %v2812_v57 = vadd.f32 %v6274_v54, %v2549_v43  ;;  %v2422_v58 = vmul.f32 %v5400_v53, %v6267_v52  ;;  %v2550_v59 = vmul.f32 %v5528_v55, %v6267_v52  ;;  %4216 = vst.msk [vmem:[%s7908_s4 + $0x34] sm:$0xf] %vm4202_vm2, %v4995_v48  ;;  %4344 = vst.msk [vmem:[%s7908_s4 + $0x234] sm:$0xf] %vm4202_vm2, %v5123_v49 }
 0x111   :  { %v2682_v62 = vadd.f32 %v6274_v54, %v2419_v50  ;;  %v2810_v63 = vadd.f32 %v6274_v54, %v2547_v51  ;;  %v2420_v0 = vmul.f32 %v6267_v52, %v1440_v60  ;;  %v2548_v1 = vmul.f32 %v6267_v52, %v1952_v61  ;;  %v5403_v18 = vpop.f32.mrb[20].mxu0  ;;  %v5531_v19 = vpop.f32.mrb[20].mxu1 }
 0x112   :  { %v2940_v2 = vmax.f32 %v2684_v56, 0.0  ;;  %v3068_v3 = vmax.f32 %v2812_v57, 0.0  ;;  %v2685_v4 = vadd.f32 %v6274_v54, %v2422_v58  ;;  %v2813_v5 = vadd.f32 %v6274_v54, %v2550_v59  ;;  %v1453_v24 = vpop.f32.mrb[21].mxu0  ;;  %v1965_v25 = vpop.f32.mrb[21].mxu1 }
 0x113   :  { %v2938_v6 = vmax.f32 %v2682_v62, 0.0  ;;  %v3066_v7 = vmax.f32 %v2810_v63, 0.0  ;;  %v2683_v8 = vadd.f32 %v6274_v54, %v2420_v0  ;;  %v2811_v9 = vadd.f32 %v6274_v54, %v2548_v1  ;;  %v5404_v30 = vpop.f32.mrb[22].mxu0  ;;  %v5532_v31 = vpop.f32.mrb[22].mxu1 }
 0x114   :  { %v5000_v10 = vpack.c.bf16 %v2940_v2, %v2940_v2  ;;  %v5128_v11 = vpack.c.bf16 %v3068_v3, %v3068_v3  ;;  %v2941_v12 = vmax.f32 %v2685_v4, 0.0  ;;  %v3069_v13 = vmax.f32 %v2813_v5, 0.0  ;;  %v1456_v36 = vpop.f32.mrb[23].mxu0  ;;  %v1968_v37 = vpop.f32.mrb[23].mxu1 }
 0x115   :  { %v4998_v14 = vpack.c.bf16 %v2938_v6, %v2938_v6  ;;  %v5126_v15 = vpack.c.bf16 %v3066_v7, %v3066_v7  ;;  %v2939_v16 = vmax.f32 %v2683_v8, 0.0  ;;  %v3067_v17 = vmax.f32 %v2811_v9, 0.0 }
 0x116   :  { %4221 = vst.msk [vmem:[%s7908_s4 + $0x48] sm:$0xf] %vm4202_vm2, %v5000_v10  ;;  %4349 = vst.msk [vmem:[%s7908_s4 + $0x248] sm:$0xf] %vm4202_vm2, %v5128_v11  ;;  %v5001_v20 = vpack.c.bf16 %v2941_v12, %v2941_v12  ;;  %v5129_v21 = vpack.c.bf16 %v3069_v13, %v3069_v13  ;;  %v2425_v22 = vmul.f32 %v5403_v18, %v6267_v52 }
 0x117   :  { %v2553_v23 = vmul.f32 %v5531_v19, %v6267_v52  ;;  %4219 = vst.msk [vmem:[%s7908_s4 + $0x40] sm:$0xf] %vm4202_vm2, %v4998_v14  ;;  %4347 = vst.msk [vmem:[%s7908_s4 + $0x240] sm:$0xf] %vm4202_vm2, %v5126_v15  ;;  %v4999_v26 = vpack.c.bf16 %v2939_v16, %v2939_v16  ;;  %v5127_v27 = vpack.c.bf16 %v3067_v17, %v3067_v17 }
 0x118   :  { %v2423_v28 = vmul.f32 %v6267_v52, %v1453_v24  ;;  %v2551_v29 = vmul.f32 %v6267_v52, %v1965_v25  ;;  %4222 = vst.msk [vmem:[%s7908_s4 + $0x4c] sm:$0xf] %vm4202_vm2, %v5001_v20  ;;  %4350 = vst.msk [vmem:[%s7908_s4 + $0x24c] sm:$0xf] %vm4202_vm2, %v5129_v21  ;;  %v2688_v32 = vadd.f32 %v6274_v54, %v2425_v22 }
 0x119   :  { %v2816_v33 = vadd.f32 %v6274_v54, %v2553_v23  ;;  %v2426_v34 = vmul.f32 %v5404_v30, %v6267_v52  ;;  %v2554_v35 = vmul.f32 %v5532_v31, %v6267_v52  ;;  %4220 = vst.msk [vmem:[%s7908_s4 + $0x44] sm:$0xf] %vm4202_vm2, %v4999_v26  ;;  %4348 = vst.msk [vmem:[%s7908_s4 + $0x244] sm:$0xf] %vm4202_vm2, %v5127_v27  ;;  %v5407_v60 = vpop.f32.mrb[24].mxu0  ;;  %v5535_v61 = vpop.f32.mrb[24].mxu1 }
 0x11a   :  { %v2686_v38 = vadd.f32 %v6274_v54, %v2423_v28  ;;  %v2814_v39 = vadd.f32 %v6274_v54, %v2551_v29  ;;  %v2424_v40 = vmul.f32 %v6267_v52, %v1456_v36  ;;  %v2552_v41 = vmul.f32 %v6267_v52, %v1968_v37  ;;  %v1469_v2 = vpop.f32.mrb[25].mxu0  ;;  %v1981_v3 = vpop.f32.mrb[25].mxu1 }
 0x11b   :  { %v2944_v42 = vmax.f32 %v2688_v32, 0.0  ;;  %v3072_v43 = vmax.f32 %v2816_v33, 0.0  ;;  %v2689_v44 = vadd.f32 %v6274_v54, %v2426_v34  ;;  %v2817_v45 = vadd.f32 %v6274_v54, %v2554_v35  ;;  %v5408_v8 = vpop.f32.mrb[26].mxu0  ;;  %v5536_v9 = vpop.f32.mrb[26].mxu1 }
 0x11c   :  { %v2942_v46 = vmax.f32 %v2686_v38, 0.0  ;;  %v3070_v47 = vmax.f32 %v2814_v39, 0.0  ;;  %v2687_v48 = vadd.f32 %v6274_v54, %v2424_v40  ;;  %v2815_v49 = vadd.f32 %v6274_v54, %v2552_v41  ;;  %v1472_v14 = vpop.f32.mrb[27].mxu0  ;;  %v1984_v15 = vpop.f32.mrb[27].mxu1 }
 0x11d   :  { %v5004_v50 = vpack.c.bf16 %v2944_v42, %v2944_v42  ;;  %v5132_v51 = vpack.c.bf16 %v3072_v43, %v3072_v43  ;;  %v2945_v53 = vmax.f32 %v2689_v44, 0.0  ;;  %v3073_v55 = vmax.f32 %v2817_v45, 0.0 }
 0x11e   :  { %v5002_v56 = vpack.c.bf16 %v2942_v46, %v2942_v46  ;;  %v5130_v57 = vpack.c.bf16 %v3070_v47, %v3070_v47  ;;  %v2943_v58 = vmax.f32 %v2687_v48, 0.0  ;;  %v3071_v59 = vmax.f32 %v2815_v49, 0.0 }
 0x11f   :  { %4225 = vst.msk [vmem:[%s7908_s4 + $0x58] sm:$0xf] %vm4202_vm2, %v5004_v50  ;;  %4353 = vst.msk [vmem:[%s7908_s4 + $0x258] sm:$0xf] %vm4202_vm2, %v5132_v51  ;;  %v5005_v62 = vpack.c.bf16 %v2945_v53, %v2945_v53  ;;  %v5133_v63 = vpack.c.bf16 %v3073_v55, %v3073_v55  ;;  %v2429_v0 = vmul.f32 %v5407_v60, %v6267_v52 }
 0x120   :  { %v2557_v1 = vmul.f32 %v5535_v61, %v6267_v52  ;;  %4223 = vst.msk [vmem:[%s7908_s4 + $0x50] sm:$0xf] %vm4202_vm2, %v5002_v56  ;;  %4351 = vst.msk [vmem:[%s7908_s4 + $0x250] sm:$0xf] %vm4202_vm2, %v5130_v57  ;;  %v5003_v4 = vpack.c.bf16 %v2943_v58, %v2943_v58  ;;  %v5131_v5 = vpack.c.bf16 %v3071_v59, %v3071_v59 }
 0x121   :  { %v2427_v6 = vmul.f32 %v6267_v52, %v1469_v2  ;;  %v2555_v7 = vmul.f32 %v6267_v52, %v1981_v3  ;;  %4226 = vst.msk [vmem:[%s7908_s4 + $0x5c] sm:$0xf] %vm4202_vm2, %v5005_v62  ;;  %4354 = vst.msk [vmem:[%s7908_s4 + $0x25c] sm:$0xf] %vm4202_vm2, %v5133_v63  ;;  %v2692_v10 = vadd.f32 %v6274_v54, %v2429_v0  ;;  %v5411_v36 = vpop.f32.mrb[28].mxu0  ;;  %v5539_v37 = vpop.f32.mrb[28].mxu1 }
 0x122   :  { %v2820_v11 = vadd.f32 %v6274_v54, %v2557_v1  ;;  %v2430_v12 = vmul.f32 %v5408_v8, %v6267_v52  ;;  %v2558_v13 = vmul.f32 %v5536_v9, %v6267_v52  ;;  %4224 = vst.msk [vmem:[%s7908_s4 + $0x54] sm:$0xf] %vm4202_vm2, %v5003_v4  ;;  %4352 = vst.msk [vmem:[%s7908_s4 + $0x254] sm:$0xf] %vm4202_vm2, %v5131_v5  ;;  %v1485_v42 = vpop.f32.mrb[29].mxu0  ;;  %v1997_v43 = vpop.f32.mrb[29].mxu1 }
 0x123   :  { %v2690_v16 = vadd.f32 %v6274_v54, %v2427_v6  ;;  %v2818_v17 = vadd.f32 %v6274_v54, %v2555_v7  ;;  %v2428_v18 = vmul.f32 %v6267_v52, %v1472_v14  ;;  %v2556_v19 = vmul.f32 %v6267_v52, %v1984_v15  ;;  %v5412_v48 = vpop.f32.mrb[30].mxu0  ;;  %v5540_v49 = vpop.f32.mrb[30].mxu1 }
 0x124   :  { %v2948_v20 = vmax.f32 %v2692_v10, 0.0  ;;  %v3076_v21 = vmax.f32 %v2820_v11, 0.0  ;;  %v2693_v22 = vadd.f32 %v6274_v54, %v2430_v12  ;;  %v2821_v23 = vadd.f32 %v6274_v54, %v2558_v13  ;;  %v1488_v56 = vpop.f32.mrb[31].mxu0  ;;  %v2000_v57 = vpop.f32.mrb[31].mxu1 }
 0x125   :  { %v2946_v24 = vmax.f32 %v2690_v16, 0.0  ;;  %v3074_v25 = vmax.f32 %v2818_v17, 0.0  ;;  %v2691_v26 = vadd.f32 %v6274_v54, %v2428_v18  ;;  %v2819_v27 = vadd.f32 %v6274_v54, %v2556_v19 }
 0x126   :  { %v5008_v28 = vpack.c.bf16 %v2948_v20, %v2948_v20  ;;  %v5136_v29 = vpack.c.bf16 %v3076_v21, %v3076_v21  ;;  %v2949_v30 = vmax.f32 %v2693_v22, 0.0  ;;  %v3077_v31 = vmax.f32 %v2821_v23, 0.0 }
 0x127   :  { %v5006_v32 = vpack.c.bf16 %v2946_v24, %v2946_v24  ;;  %v5134_v33 = vpack.c.bf16 %v3074_v25, %v3074_v25  ;;  %v2947_v34 = vmax.f32 %v2691_v26, 0.0  ;;  %v3075_v35 = vmax.f32 %v2819_v27, 0.0 }
 0x128   :  { %4229 = vst.msk [vmem:[%s7908_s4 + $0x68] sm:$0xf] %vm4202_vm2, %v5008_v28  ;;  %4357 = vst.msk [vmem:[%s7908_s4 + $0x268] sm:$0xf] %vm4202_vm2, %v5136_v29  ;;  %v5009_v38 = vpack.c.bf16 %v2949_v30, %v2949_v30  ;;  %v5137_v39 = vpack.c.bf16 %v3077_v31, %v3077_v31  ;;  %v2433_v40 = vmul.f32 %v5411_v36, %v6267_v52 }
 0x129   :  { %v2561_v41 = vmul.f32 %v5539_v37, %v6267_v52  ;;  %4227 = vst.msk [vmem:[%s7908_s4 + $0x60] sm:$0xf] %vm4202_vm2, %v5006_v32  ;;  %4355 = vst.msk [vmem:[%s7908_s4 + $0x260] sm:$0xf] %vm4202_vm2, %v5134_v33  ;;  %v5007_v44 = vpack.c.bf16 %v2947_v34, %v2947_v34  ;;  %v5135_v45 = vpack.c.bf16 %v3075_v35, %v3075_v35  ;;  %v5415_v14 = vpop.f32.mrb[32].mxu0  ;;  %v5543_v15 = vpop.f32.mrb[32].mxu1 }
 0x12a   :  { %v2431_v46 = vmul.f32 %v6267_v52, %v1485_v42  ;;  %v2559_v47 = vmul.f32 %v6267_v52, %v1997_v43  ;;  %4230 = vst.msk [vmem:[%s7908_s4 + $0x6c] sm:$0xf] %vm4202_vm2, %v5009_v38  ;;  %4358 = vst.msk [vmem:[%s7908_s4 + $0x26c] sm:$0xf] %vm4202_vm2, %v5137_v39  ;;  %v2696_v50 = vadd.f32 %v6274_v54, %v2433_v40  ;;  %v1501_v20 = vpop.f32.mrb[33].mxu0  ;;  %v2013_v21 = vpop.f32.mrb[33].mxu1 }
 0x12b   :  { %v2824_v51 = vadd.f32 %v6274_v54, %v2561_v41  ;;  %v2434_v53 = vmul.f32 %v5412_v48, %v6267_v52  ;;  %v2562_v55 = vmul.f32 %v5540_v49, %v6267_v52  ;;  %4228 = vst.msk [vmem:[%s7908_s4 + $0x64] sm:$0xf] %vm4202_vm2, %v5007_v44  ;;  %4356 = vst.msk [vmem:[%s7908_s4 + $0x264] sm:$0xf] %vm4202_vm2, %v5135_v45  ;;  %v5416_v26 = vpop.f32.mrb[34].mxu0  ;;  %v5544_v27 = vpop.f32.mrb[34].mxu1 }
 0x12c   :  { %v2694_v58 = vadd.f32 %v6274_v54, %v2431_v46  ;;  %v2822_v59 = vadd.f32 %v6274_v54, %v2559_v47  ;;  %v2432_v60 = vmul.f32 %v6267_v52, %v1488_v56  ;;  %v2560_v61 = vmul.f32 %v6267_v52, %v2000_v57  ;;  %v1504_v32 = vpop.f32.mrb[35].mxu0  ;;  %v2016_v33 = vpop.f32.mrb[35].mxu1 }
 0x12d   :  { %v2952_v62 = vmax.f32 %v2696_v50, 0.0  ;;  %v3080_v63 = vmax.f32 %v2824_v51, 0.0  ;;  %v2697_v0 = vadd.f32 %v6274_v54, %v2434_v53  ;;  %v2825_v1 = vadd.f32 %v6274_v54, %v2562_v55 }
 0x12e   :  { %v2950_v2 = vmax.f32 %v2694_v58, 0.0  ;;  %v3078_v3 = vmax.f32 %v2822_v59, 0.0  ;;  %v2695_v4 = vadd.f32 %v6274_v54, %v2432_v60  ;;  %v2823_v5 = vadd.f32 %v6274_v54, %v2560_v61 }
 0x12f   :  { %v5012_v6 = vpack.c.bf16 %v2952_v62, %v2952_v62  ;;  %v5140_v7 = vpack.c.bf16 %v3080_v63, %v3080_v63  ;;  %v2953_v8 = vmax.f32 %v2697_v0, 0.0  ;;  %v3081_v9 = vmax.f32 %v2825_v1, 0.0 }
 0x130   :  { %v5010_v10 = vpack.c.bf16 %v2950_v2, %v2950_v2  ;;  %v5138_v11 = vpack.c.bf16 %v3078_v3, %v3078_v3  ;;  %v2951_v12 = vmax.f32 %v2695_v4, 0.0  ;;  %v3079_v13 = vmax.f32 %v2823_v5, 0.0 }
 0x131   :  { %4233 = vst.msk [vmem:[%s7908_s4 + $0x78] sm:$0xf] %vm4202_vm2, %v5012_v6  ;;  %4361 = vst.msk [vmem:[%s7908_s4 + $0x278] sm:$0xf] %vm4202_vm2, %v5140_v7  ;;  %v5013_v16 = vpack.c.bf16 %v2953_v8, %v2953_v8  ;;  %v5141_v17 = vpack.c.bf16 %v3081_v9, %v3081_v9  ;;  %v2437_v18 = vmul.f32 %v5415_v14, %v6267_v52  ;;  %v5419_v56 = vpop.f32.mrb[36].mxu0  ;;  %v5547_v57 = vpop.f32.mrb[36].mxu1 }
 0x132   :  { %v2565_v19 = vmul.f32 %v5543_v15, %v6267_v52  ;;  %4231 = vst.msk [vmem:[%s7908_s4 + $0x70] sm:$0xf] %vm4202_vm2, %v5010_v10  ;;  %4359 = vst.msk [vmem:[%s7908_s4 + $0x270] sm:$0xf] %vm4202_vm2, %v5138_v11  ;;  %v5011_v22 = vpack.c.bf16 %v2951_v12, %v2951_v12  ;;  %v5139_v23 = vpack.c.bf16 %v3079_v13, %v3079_v13  ;;  %v1517_v62 = vpop.f32.mrb[37].mxu0  ;;  %v2029_v63 = vpop.f32.mrb[37].mxu1 }
 0x133   :  { %v2435_v24 = vmul.f32 %v6267_v52, %v1501_v20  ;;  %v2563_v25 = vmul.f32 %v6267_v52, %v2013_v21  ;;  %4234 = vst.msk [vmem:[%s7908_s4 + $0x7c] sm:$0xf] %vm4202_vm2, %v5013_v16  ;;  %4362 = vst.msk [vmem:[%s7908_s4 + $0x27c] sm:$0xf] %vm4202_vm2, %v5141_v17  ;;  %v2700_v28 = vadd.f32 %v6274_v54, %v2437_v18  ;;  %v5420_v4 = vpop.f32.mrb[38].mxu0  ;;  %v5548_v5 = vpop.f32.mrb[38].mxu1 }
 0x134   :  { %v2828_v29 = vadd.f32 %v6274_v54, %v2565_v19  ;;  %v2438_v30 = vmul.f32 %v5416_v26, %v6267_v52  ;;  %v2566_v31 = vmul.f32 %v5544_v27, %v6267_v52  ;;  %4232 = vst.msk [vmem:[%s7908_s4 + $0x74] sm:$0xf] %vm4202_vm2, %v5011_v22  ;;  %4360 = vst.msk [vmem:[%s7908_s4 + $0x274] sm:$0xf] %vm4202_vm2, %v5139_v23  ;;  %v1520_v10 = vpop.f32.mrb[39].mxu0  ;;  %v2032_v11 = vpop.f32.mrb[39].mxu1 }
 0x135   :  { %v2698_v34 = vadd.f32 %v6274_v54, %v2435_v24  ;;  %v2826_v35 = vadd.f32 %v6274_v54, %v2563_v25  ;;  %v2436_v36 = vmul.f32 %v6267_v52, %v1504_v32  ;;  %v2564_v37 = vmul.f32 %v6267_v52, %v2016_v33 }
 0x136   :  { %v2956_v38 = vmax.f32 %v2700_v28, 0.0  ;;  %v3084_v39 = vmax.f32 %v2828_v29, 0.0  ;;  %v2701_v40 = vadd.f32 %v6274_v54, %v2438_v30  ;;  %v2829_v41 = vadd.f32 %v6274_v54, %v2566_v31 }
 0x137   :  { %v2954_v42 = vmax.f32 %v2698_v34, 0.0  ;;  %v3082_v43 = vmax.f32 %v2826_v35, 0.0  ;;  %v2699_v44 = vadd.f32 %v6274_v54, %v2436_v36  ;;  %v2827_v45 = vadd.f32 %v6274_v54, %v2564_v37  ;;  %v6807_v34 = vld [vmem:[%s7906_s2] ss:$0 sm:$0xff] }
 0x138   :  { %v5016_v46 = vpack.c.bf16 %v2956_v38, %v2956_v38  ;;  %v5144_v47 = vpack.c.bf16 %v3084_v39, %v3084_v39  ;;  %v2957_v48 = vmax.f32 %v2701_v40, 0.0  ;;  %v3085_v49 = vmax.f32 %v2829_v41, 0.0 }
 0x139   :  { %v5014_v50 = vpack.c.bf16 %v2954_v42, %v2954_v42  ;;  %v5142_v51 = vpack.c.bf16 %v3082_v43, %v3082_v43  ;;  %v2955_v53 = vmax.f32 %v2699_v44, 0.0  ;;  %v3083_v55 = vmax.f32 %v2827_v45, 0.0  ;;  %v5423_v31 = vpop.f32.mrb[40].mxu0  ;;  %v5551_v32 = vpop.f32.mrb[40].mxu1  ;;  %v6832_v45 = vld [vmem:[%s7907_s3] ss:$0 sm:$0xff] }
 0x13a   :  { %4237 = vst.msk [vmem:[%s7908_s4 + $0x88] sm:$0xf] %vm4202_vm2, %v5016_v46  ;;  %4365 = vst.msk [vmem:[%s7908_s4 + $0x288] sm:$0xf] %vm4202_vm2, %v5144_v47  ;;  %v5017_v58 = vpack.c.bf16 %v2957_v48, %v2957_v48  ;;  %v5145_v59 = vpack.c.bf16 %v3085_v49, %v3085_v49  ;;  %v2441_v60 = vmul.f32 %v5419_v56, %v6267_v52  ;;  %v1533_v37 = vpop.f32.mrb[41].mxu0  ;;  %v2045_v38 = vpop.f32.mrb[41].mxu1 }
 0x13b   :  { %v2569_v61 = vmul.f32 %v5547_v57, %v6267_v52  ;;  %4235 = vst.msk [vmem:[%s7908_s4 + $0x80] sm:$0xf] %vm4202_vm2, %v5014_v50  ;;  %4363 = vst.msk [vmem:[%s7908_s4 + $0x280] sm:$0xf] %vm4202_vm2, %v5142_v51  ;;  %v5015_v0 = vpack.c.bf16 %v2955_v53, %v2955_v53  ;;  %v5143_v1 = vpack.c.bf16 %v3083_v55, %v3083_v55  ;;  %v5424_v43 = vpop.f32.mrb[42].mxu0  ;;  %v5552_v44 = vpop.f32.mrb[42].mxu1 }
 0x13c   :  { %v2439_v2 = vmul.f32 %v6267_v52, %v1517_v62  ;;  %v2567_v3 = vmul.f32 %v6267_v52, %v2029_v63  ;;  %4238 = vst.msk [vmem:[%s7908_s4 + $0x8c] sm:$0xf] %vm4202_vm2, %v5017_v58  ;;  %4366 = vst.msk [vmem:[%s7908_s4 + $0x28c] sm:$0xf] %vm4202_vm2, %v5145_v59  ;;  %v2704_v6 = vadd.f32 %v6274_v54, %v2441_v60  ;;  %v1536_v50 = vpop.f32.mrb[43].mxu0  ;;  %v2048_v51 = vpop.f32.mrb[43].mxu1 }
 0x13d   :  { %v2832_v7 = vadd.f32 %v6274_v54, %v2569_v61  ;;  %v2442_v8 = vmul.f32 %v5420_v4, %v6267_v52  ;;  %v2570_v9 = vmul.f32 %v5548_v5, %v6267_v52  ;;  %4236 = vst.msk [vmem:[%s7908_s4 + $0x84] sm:$0xf] %vm4202_vm2, %v5015_v0  ;;  %4364 = vst.msk [vmem:[%s7908_s4 + $0x284] sm:$0xf] %vm4202_vm2, %v5143_v1 }
 0x13e   :  { %v2702_v12 = vadd.f32 %v6274_v54, %v2439_v2  ;;  %v2830_v13 = vadd.f32 %v6274_v54, %v2567_v3  ;;  %v2440_v14 = vmul.f32 %v6267_v52, %v1520_v10  ;;  %v2568_v15 = vmul.f32 %v6267_v52, %v2032_v11 }
 0x13f   :  { %v2960_v16 = vmax.f32 %v2704_v6, 0.0  ;;  %v3088_v17 = vmax.f32 %v2832_v7, 0.0  ;;  %v2705_v18 = vadd.f32 %v6274_v54, %v2442_v8  ;;  %v2833_v19 = vadd.f32 %v6274_v54, %v2570_v9 }
 0x140   :  { %v2958_v20 = vmax.f32 %v2702_v12, 0.0  ;;  %v3086_v21 = vmax.f32 %v2830_v13, 0.0  ;;  %v2703_v22 = vadd.f32 %v6274_v54, %v2440_v14  ;;  %v2831_v23 = vadd.f32 %v6274_v54, %v2568_v15 }
 0x141   :  { %v5020_v24 = vpack.c.bf16 %v2960_v16, %v2960_v16  ;;  %v5148_v25 = vpack.c.bf16 %v3088_v17, %v3088_v17  ;;  %v2961_v26 = vmax.f32 %v2705_v18, 0.0  ;;  %v3089_v27 = vmax.f32 %v2833_v19, 0.0  ;;  %v5427_v10 = vpop.f32.mrb[44].mxu0  ;;  %v5555_v11 = vpop.f32.mrb[44].mxu1 }
 0x142   :  { %v5018_v28 = vpack.c.bf16 %v2958_v20, %v2958_v20  ;;  %v5146_v29 = vpack.c.bf16 %v3086_v21, %v3086_v21  ;;  %v2959_v30 = vmax.f32 %v2703_v22, 0.0  ;;  %v3087_v52 = vmax.f32 %v2831_v23, 0.0  ;;  %v1549_v16 = vpop.f32.mrb[45].mxu0  ;;  %v2061_v17 = vpop.f32.mrb[45].mxu1 }
 0x143   :  { %4241 = vst.msk [vmem:[%s7908_s4 + $0x98] sm:$0xf] %vm4202_vm2, %v5020_v24  ;;  %4369 = vst.msk [vmem:[%s7908_s4 + $0x298] sm:$0xf] %vm4202_vm2, %v5148_v25  ;;  %v5021_v54 = vpack.c.bf16 %v2961_v26, %v2961_v26  ;;  %v5149_v33 = vpack.c.bf16 %v3089_v27, %v3089_v27  ;;  %v2445_v35 = vmul.f32 %v6807_v34, %v5423_v31  ;;  %v5428_v22 = vpop.f32.mrb[46].mxu0  ;;  %v5556_v23 = vpop.f32.mrb[46].mxu1 }
 0x144   :  { %v2573_v36 = vmul.f32 %v6807_v34, %v5551_v32  ;;  %4239 = vst.msk [vmem:[%s7908_s4 + $0x90] sm:$0xf] %vm4202_vm2, %v5018_v28  ;;  %4367 = vst.msk [vmem:[%s7908_s4 + $0x290] sm:$0xf] %vm4202_vm2, %v5146_v29  ;;  %v5019_v39 = vpack.c.bf16 %v2959_v30, %v2959_v30  ;;  %v5147_v40 = vpack.c.bf16 %v3087_v52, %v3087_v52  ;;  %v1552_v28 = vpop.f32.mrb[47].mxu0  ;;  %v2064_v29 = vpop.f32.mrb[47].mxu1 }
 0x145   :  { %v2443_v41 = vmul.f32 %v6807_v34, %v1533_v37  ;;  %v2571_v42 = vmul.f32 %v6807_v34, %v2045_v38  ;;  %4242 = vst.msk [vmem:[%s7908_s4 + $0x9c] sm:$0xf] %vm4202_vm2, %v5021_v54  ;;  %4370 = vst.msk [vmem:[%s7908_s4 + $0x29c] sm:$0xf] %vm4202_vm2, %v5149_v33  ;;  %v2708_v46 = vadd.f32 %v6832_v45, %v2445_v35 }
 0x146   :  { %v2836_v47 = vadd.f32 %v6832_v45, %v2573_v36  ;;  %v2446_v48 = vmul.f32 %v6807_v34, %v5424_v43  ;;  %v2574_v49 = vmul.f32 %v6807_v34, %v5552_v44  ;;  %4240 = vst.msk [vmem:[%s7908_s4 + $0x94] sm:$0xf] %vm4202_vm2, %v5019_v39  ;;  %4368 = vst.msk [vmem:[%s7908_s4 + $0x294] sm:$0xf] %vm4202_vm2, %v5147_v40 }
 0x147   :  { %v2706_v53 = vadd.f32 %v6832_v45, %v2443_v41  ;;  %v2834_v55 = vadd.f32 %v6832_v45, %v2571_v42  ;;  %v2444_v56 = vmul.f32 %v6807_v34, %v1536_v50  ;;  %v2572_v57 = vmul.f32 %v6807_v34, %v2048_v51 }
 0x148   :  { %v2964_v58 = vmax.f32 %v2708_v46, 0.0  ;;  %v3092_v59 = vmax.f32 %v2836_v47, 0.0  ;;  %v2709_v60 = vadd.f32 %v6832_v45, %v2446_v48  ;;  %v2837_v61 = vadd.f32 %v6832_v45, %v2574_v49 }
 0x149   :  { %v2962_v62 = vmax.f32 %v2706_v53, 0.0  ;;  %v3090_v63 = vmax.f32 %v2834_v55, 0.0  ;;  %v2707_v0 = vadd.f32 %v6832_v45, %v2444_v56  ;;  %v2835_v1 = vadd.f32 %v6832_v45, %v2572_v57  ;;  %v5431_v50 = vpop.f32.mrb[48].mxu0  ;;  %v5559_v51 = vpop.f32.mrb[48].mxu1 }
 0x14a   :  { %v5024_v2 = vpack.c.bf16 %v2964_v58, %v2964_v58  ;;  %v5152_v3 = vpack.c.bf16 %v3092_v59, %v3092_v59  ;;  %v2965_v4 = vmax.f32 %v2709_v60, 0.0  ;;  %v3093_v5 = vmax.f32 %v2837_v61, 0.0  ;;  %v1565_v58 = vpop.f32.mrb[49].mxu0  ;;  %v2077_v59 = vpop.f32.mrb[49].mxu1 }
 0x14b   :  { %v5022_v6 = vpack.c.bf16 %v2962_v62, %v2962_v62  ;;  %v5150_v7 = vpack.c.bf16 %v3090_v63, %v3090_v63  ;;  %v2963_v8 = vmax.f32 %v2707_v0, 0.0  ;;  %v3091_v9 = vmax.f32 %v2835_v1, 0.0  ;;  %v5432_v0 = vpop.f32.mrb[50].mxu0  ;;  %v5560_v1 = vpop.f32.mrb[50].mxu1 }
 0x14c   :  { %4245 = vst.msk [vmem:[%s7908_s4 + $0xa8] sm:$0xf] %vm4202_vm2, %v5024_v2  ;;  %4373 = vst.msk [vmem:[%s7908_s4 + $0x2a8] sm:$0xf] %vm4202_vm2, %v5152_v3  ;;  %v5025_v12 = vpack.c.bf16 %v2965_v4, %v2965_v4  ;;  %v5153_v13 = vpack.c.bf16 %v3093_v5, %v3093_v5  ;;  %v2449_v14 = vmul.f32 %v6807_v34, %v5427_v10 }
 0x14d   :  { %v2577_v15 = vmul.f32 %v6807_v34, %v5555_v11  ;;  %4243 = vst.msk [vmem:[%s7908_s4 + $0xa0] sm:$0xf] %vm4202_vm2, %v5022_v6  ;;  %4371 = vst.msk [vmem:[%s7908_s4 + $0x2a0] sm:$0xf] %vm4202_vm2, %v5150_v7  ;;  %v5023_v18 = vpack.c.bf16 %v2963_v8, %v2963_v8  ;;  %v5151_v19 = vpack.c.bf16 %v3091_v9, %v3091_v9  ;;  %v1568_v6 = vpop.f32.mrb[51].mxu0  ;;  %v2080_v7 = vpop.f32.mrb[51].mxu1 }
 0x14e   :  { %v2447_v20 = vmul.f32 %v6807_v34, %v1549_v16  ;;  %v2575_v21 = vmul.f32 %v6807_v34, %v2061_v17  ;;  %4246 = vst.msk [vmem:[%s7908_s4 + $0xac] sm:$0xf] %vm4202_vm2, %v5025_v12  ;;  %4374 = vst.msk [vmem:[%s7908_s4 + $0x2ac] sm:$0xf] %vm4202_vm2, %v5153_v13  ;;  %v2712_v24 = vadd.f32 %v6832_v45, %v2449_v14 }
 0x14f   :  { %v2840_v25 = vadd.f32 %v6832_v45, %v2577_v15  ;;  %v2450_v26 = vmul.f32 %v6807_v34, %v5428_v22  ;;  %v2578_v27 = vmul.f32 %v6807_v34, %v5556_v23  ;;  %4244 = vst.msk [vmem:[%s7908_s4 + $0xa4] sm:$0xf] %vm4202_vm2, %v5023_v18  ;;  %4372 = vst.msk [vmem:[%s7908_s4 + $0x2a4] sm:$0xf] %vm4202_vm2, %v5151_v19 }
 0x150   :  { %v2710_v30 = vadd.f32 %v6832_v45, %v2447_v20  ;;  %v2838_v52 = vadd.f32 %v6832_v45, %v2575_v21  ;;  %v2448_v31 = vmul.f32 %v6807_v34, %v1552_v28  ;;  %v2576_v32 = vmul.f32 %v6807_v34, %v2064_v29 }
 0x151   :  { %v2968_v54 = vmax.f32 %v2712_v24, 0.0  ;;  %v3096_v33 = vmax.f32 %v2840_v25, 0.0  ;;  %v2713_v35 = vadd.f32 %v6832_v45, %v2450_v26  ;;  %v2841_v36 = vadd.f32 %v6832_v45, %v2578_v27  ;;  %v5435_v28 = vpop.f32.mrb[52].mxu0  ;;  %v5563_v29 = vpop.f32.mrb[52].mxu1 }
 0x152   :  { %v2966_v37 = vmax.f32 %v2710_v30, 0.0  ;;  %v3094_v38 = vmax.f32 %v2838_v52, 0.0  ;;  %v2711_v39 = vadd.f32 %v6832_v45, %v2448_v31  ;;  %v2839_v40 = vadd.f32 %v6832_v45, %v2576_v32 }
 0x153   :  { %v5028_v41 = vpack.c.bf16 %v2968_v54, %v2968_v54  ;;  %v5156_v42 = vpack.c.bf16 %v3096_v33, %v3096_v33  ;;  %v2969_v43 = vmax.f32 %v2713_v35, 0.0  ;;  %v3097_v44 = vmax.f32 %v2841_v36, 0.0  ;;  %v1581_v54 = vpop.f32.mrb[53].mxu0  ;;  %v2093_v33 = vpop.f32.mrb[53].mxu1 }
 0x154   :  { %v5026_v46 = vpack.c.bf16 %v2966_v37, %v2966_v37  ;;  %v5154_v47 = vpack.c.bf16 %v3094_v38, %v3094_v38  ;;  %v2967_v48 = vmax.f32 %v2711_v39, 0.0  ;;  %v3095_v49 = vmax.f32 %v2839_v40, 0.0  ;;  %v5436_v39 = vpop.f32.mrb[54].mxu0  ;;  %v5564_v40 = vpop.f32.mrb[54].mxu1 }
 0x155   :  { %4249 = vst.msk [vmem:[%s7908_s4 + $0xb8] sm:$0xf] %vm4202_vm2, %v5028_v41  ;;  %4377 = vst.msk [vmem:[%s7908_s4 + $0x2b8] sm:$0xf] %vm4202_vm2, %v5156_v42  ;;  %v5029_v53 = vpack.c.bf16 %v2969_v43, %v2969_v43  ;;  %v5157_v55 = vpack.c.bf16 %v3097_v44, %v3097_v44  ;;  %v2453_v56 = vmul.f32 %v6807_v34, %v5431_v50 }
 0x156   :  { %v2581_v57 = vmul.f32 %v6807_v34, %v5559_v51  ;;  %4247 = vst.msk [vmem:[%s7908_s4 + $0xb0] sm:$0xf] %vm4202_vm2, %v5026_v46  ;;  %4375 = vst.msk [vmem:[%s7908_s4 + $0x2b0] sm:$0xf] %vm4202_vm2, %v5154_v47  ;;  %v5027_v60 = vpack.c.bf16 %v2967_v48, %v2967_v48  ;;  %v5155_v61 = vpack.c.bf16 %v3095_v49, %v3095_v49  ;;  %v1584_v46 = vpop.f32.mrb[55].mxu0  ;;  %v2096_v47 = vpop.f32.mrb[55].mxu1 }
 0x157   :  { %v2451_v62 = vmul.f32 %v6807_v34, %v1565_v58  ;;  %v2579_v63 = vmul.f32 %v6807_v34, %v2077_v59  ;;  %4250 = vst.msk [vmem:[%s7908_s4 + $0xbc] sm:$0xf] %vm4202_vm2, %v5029_v53  ;;  %4378 = vst.msk [vmem:[%s7908_s4 + $0x2bc] sm:$0xf] %vm4202_vm2, %v5157_v55  ;;  %v2716_v2 = vadd.f32 %v6832_v45, %v2453_v56 }
 0x158   :  { %v2844_v3 = vadd.f32 %v6832_v45, %v2581_v57  ;;  %v2454_v4 = vmul.f32 %v6807_v34, %v5432_v0  ;;  %v2582_v5 = vmul.f32 %v6807_v34, %v5560_v1  ;;  %4248 = vst.msk [vmem:[%s7908_s4 + $0xb4] sm:$0xf] %vm4202_vm2, %v5027_v60  ;;  %4376 = vst.msk [vmem:[%s7908_s4 + $0x2b4] sm:$0xf] %vm4202_vm2, %v5155_v61 }
 0x159   :  { %v2714_v8 = vadd.f32 %v6832_v45, %v2451_v62  ;;  %v2842_v9 = vadd.f32 %v6832_v45, %v2579_v63  ;;  %v2452_v10 = vmul.f32 %v6807_v34, %v1568_v6  ;;  %v2580_v11 = vmul.f32 %v6807_v34, %v2080_v7  ;;  %v5439_v6 = vpop.f32.mrb[56].mxu0  ;;  %v5567_v7 = vpop.f32.mrb[56].mxu1 }
 0x15a   :  { %v2972_v12 = vmax.f32 %v2716_v2, 0.0  ;;  %v3100_v13 = vmax.f32 %v2844_v3, 0.0  ;;  %v2717_v14 = vadd.f32 %v6832_v45, %v2454_v4  ;;  %v2845_v15 = vadd.f32 %v6832_v45, %v2582_v5 }
 0x15b   :  { %v2970_v16 = vmax.f32 %v2714_v8, 0.0  ;;  %v3098_v17 = vmax.f32 %v2842_v9, 0.0  ;;  %v2715_v18 = vadd.f32 %v6832_v45, %v2452_v10  ;;  %v2843_v19 = vadd.f32 %v6832_v45, %v2580_v11 }
 0x15c   :  { %v5032_v20 = vpack.c.bf16 %v2972_v12, %v2972_v12  ;;  %v5160_v21 = vpack.c.bf16 %v3100_v13, %v3100_v13  ;;  %v2973_v22 = vmax.f32 %v2717_v14, 0.0  ;;  %v3101_v23 = vmax.f32 %v2845_v15, 0.0  ;;  %v1597_v12 = vpop.f32.mrb[57].mxu0  ;;  %v2109_v13 = vpop.f32.mrb[57].mxu1 }
 0x15d   :  { %v5030_v24 = vpack.c.bf16 %v2970_v16, %v2970_v16  ;;  %v5158_v25 = vpack.c.bf16 %v3098_v17, %v3098_v17  ;;  %v2971_v26 = vmax.f32 %v2715_v18, 0.0  ;;  %v3099_v27 = vmax.f32 %v2843_v19, 0.0  ;;  %v5440_v18 = vpop.f32.mrb[58].mxu0  ;;  %v5568_v19 = vpop.f32.mrb[58].mxu1 }
 0x15e   :  { %4253 = vst.msk [vmem:[%s7908_s4 + $0xc8] sm:$0xf] %vm4202_vm2, %v5032_v20  ;;  %4381 = vst.msk [vmem:[%s7908_s4 + $0x2c8] sm:$0xf] %vm4202_vm2, %v5160_v21  ;;  %v5033_v30 = vpack.c.bf16 %v2973_v22, %v2973_v22  ;;  %v5161_v52 = vpack.c.bf16 %v3101_v23, %v3101_v23  ;;  %v2457_v31 = vmul.f32 %v6807_v34, %v5435_v28 }
 0x15f   :  { %v2585_v32 = vmul.f32 %v6807_v34, %v5563_v29  ;;  %4251 = vst.msk [vmem:[%s7908_s4 + $0xc0] sm:$0xf] %vm4202_vm2, %v5030_v24  ;;  %4379 = vst.msk [vmem:[%s7908_s4 + $0x2c0] sm:$0xf] %vm4202_vm2, %v5158_v25  ;;  %v5031_v35 = vpack.c.bf16 %v2971_v26, %v2971_v26  ;;  %v5159_v36 = vpack.c.bf16 %v3099_v27, %v3099_v27  ;;  %v1600_v24 = vpop.f32.mrb[59].mxu0  ;;  %v2112_v25 = vpop.f32.mrb[59].mxu1 }
 0x160   :  { %v2455_v37 = vmul.f32 %v6807_v34, %v1581_v54  ;;  %v2583_v38 = vmul.f32 %v6807_v34, %v2093_v33  ;;  %4254 = vst.msk [vmem:[%s7908_s4 + $0xcc] sm:$0xf] %vm4202_vm2, %v5033_v30  ;;  %4382 = vst.msk [vmem:[%s7908_s4 + $0x2cc] sm:$0xf] %vm4202_vm2, %v5161_v52  ;;  %v2720_v41 = vadd.f32 %v6832_v45, %v2457_v31 }
 0x161   :  { %v2848_v42 = vadd.f32 %v6832_v45, %v2585_v32  ;;  %v2458_v43 = vmul.f32 %v6807_v34, %v5436_v39  ;;  %v2586_v44 = vmul.f32 %v6807_v34, %v5564_v40  ;;  %4252 = vst.msk [vmem:[%s7908_s4 + $0xc4] sm:$0xf] %vm4202_vm2, %v5031_v35  ;;  %4380 = vst.msk [vmem:[%s7908_s4 + $0x2c4] sm:$0xf] %vm4202_vm2, %v5159_v36 }
 0x162   :  { %v2718_v48 = vadd.f32 %v6832_v45, %v2455_v37  ;;  %v2846_v49 = vadd.f32 %v6832_v45, %v2583_v38  ;;  %v2456_v50 = vmul.f32 %v6807_v34, %v1584_v46  ;;  %v2584_v51 = vmul.f32 %v6807_v34, %v2096_v47  ;;  %v5443_v46 = vpop.f32.mrb[60].mxu0  ;;  %v5571_v47 = vpop.f32.mrb[60].mxu1 }
 0x163   :  { %v2976_v53 = vmax.f32 %v2720_v41, 0.0  ;;  %v3104_v55 = vmax.f32 %v2848_v42, 0.0  ;;  %v2721_v56 = vadd.f32 %v6832_v45, %v2458_v43  ;;  %v2849_v57 = vadd.f32 %v6832_v45, %v2586_v44 }
 0x164   :  { %v2974_v58 = vmax.f32 %v2718_v48, 0.0  ;;  %v3102_v59 = vmax.f32 %v2846_v49, 0.0  ;;  %v2719_v60 = vadd.f32 %v6832_v45, %v2456_v50  ;;  %v2847_v61 = vadd.f32 %v6832_v45, %v2584_v51 }
 0x165   :  { %v5036_v62 = vpack.c.bf16 %v2976_v53, %v2976_v53  ;;  %v5164_v63 = vpack.c.bf16 %v3104_v55, %v3104_v55  ;;  %v2977_v0 = vmax.f32 %v2721_v56, 0.0  ;;  %v3105_v1 = vmax.f32 %v2849_v57, 0.0  ;;  %v1613_v53 = vpop.f32.mrb[61].mxu0  ;;  %v2125_v55 = vpop.f32.mrb[61].mxu1 }
 0x166   :  { %v5034_v2 = vpack.c.bf16 %v2974_v58, %v2974_v58  ;;  %v5162_v3 = vpack.c.bf16 %v3102_v59, %v3102_v59  ;;  %v2975_v4 = vmax.f32 %v2719_v60, 0.0  ;;  %v3103_v5 = vmax.f32 %v2847_v61, 0.0  ;;  %v5444_v60 = vpop.f32.mrb[62].mxu0  ;;  %v5572_v61 = vpop.f32.mrb[62].mxu1 }
 0x167   :  { %4257 = vst.msk [vmem:[%s7908_s4 + $0xd8] sm:$0xf] %vm4202_vm2, %v5036_v62  ;;  %4385 = vst.msk [vmem:[%s7908_s4 + $0x2d8] sm:$0xf] %vm4202_vm2, %v5164_v63  ;;  %v5037_v8 = vpack.c.bf16 %v2977_v0, %v2977_v0  ;;  %v5165_v9 = vpack.c.bf16 %v3105_v1, %v3105_v1  ;;  %v2461_v10 = vmul.f32 %v6807_v34, %v5439_v6 }
 0x168   :  { %v2589_v11 = vmul.f32 %v6807_v34, %v5567_v7  ;;  %4255 = vst.msk [vmem:[%s7908_s4 + $0xd0] sm:$0xf] %vm4202_vm2, %v5034_v2  ;;  %4383 = vst.msk [vmem:[%s7908_s4 + $0x2d0] sm:$0xf] %vm4202_vm2, %v5162_v3  ;;  %v5035_v14 = vpack.c.bf16 %v2975_v4, %v2975_v4  ;;  %v5163_v15 = vpack.c.bf16 %v3103_v5, %v3103_v5  ;;  %v1616_v2 = vpop.f32.mrb[63].mxu0  ;;  %v2128_v3 = vpop.f32.mrb[63].mxu1 }
 0x169   :  { %v2459_v16 = vmul.f32 %v6807_v34, %v1597_v12  ;;  %v2587_v17 = vmul.f32 %v6807_v34, %v2109_v13  ;;  %4258 = vst.msk [vmem:[%s7908_s4 + $0xdc] sm:$0xf] %vm4202_vm2, %v5037_v8  ;;  %4386 = vst.msk [vmem:[%s7908_s4 + $0x2dc] sm:$0xf] %vm4202_vm2, %v5165_v9  ;;  %v2724_v20 = vadd.f32 %v6832_v45, %v2461_v10 }
 0x16a   :  { %v2852_v21 = vadd.f32 %v6832_v45, %v2589_v11  ;;  %v2462_v22 = vmul.f32 %v6807_v34, %v5440_v18  ;;  %v2590_v23 = vmul.f32 %v6807_v34, %v5568_v19  ;;  %4256 = vst.msk [vmem:[%s7908_s4 + $0xd4] sm:$0xf] %vm4202_vm2, %v5035_v14  ;;  %4384 = vst.msk [vmem:[%s7908_s4 + $0x2d4] sm:$0xf] %vm4202_vm2, %v5163_v15 }
 0x16b   :  { %v2722_v26 = vadd.f32 %v6832_v45, %v2459_v16  ;;  %v2850_v27 = vadd.f32 %v6832_v45, %v2587_v17  ;;  %v2460_v28 = vmul.f32 %v6807_v34, %v1600_v24  ;;  %v2588_v29 = vmul.f32 %v6807_v34, %v2112_v25  ;;  %v5447_v24 = vpop.f32.mrb[64].mxu0  ;;  %v5575_v25 = vpop.f32.mrb[64].mxu1 }
 0x16c   :  { %v2980_v30 = vmax.f32 %v2724_v20, 0.0  ;;  %v3108_v52 = vmax.f32 %v2852_v21, 0.0  ;;  %v2725_v31 = vadd.f32 %v6832_v45, %v2462_v22  ;;  %v2853_v32 = vadd.f32 %v6832_v45, %v2590_v23 }
 0x16d   :  { %v2978_v54 = vmax.f32 %v2722_v26, 0.0  ;;  %v3106_v33 = vmax.f32 %v2850_v27, 0.0  ;;  %v2723_v35 = vadd.f32 %v6832_v45, %v2460_v28  ;;  %v2851_v36 = vadd.f32 %v6832_v45, %v2588_v29 }
 0x16e   :  { %v5040_v37 = vpack.c.bf16 %v2980_v30, %v2980_v30  ;;  %v5168_v38 = vpack.c.bf16 %v3108_v52, %v3108_v52  ;;  %v2981_v39 = vmax.f32 %v2725_v31, 0.0  ;;  %v3109_v40 = vmax.f32 %v2853_v32, 0.0  ;;  %v1629_v30 = vpop.f32.mrb[65].mxu0  ;;  %v2141_v52 = vpop.f32.mrb[65].mxu1 }
 0x16f   :  { %v5038_v41 = vpack.c.bf16 %v2978_v54, %v2978_v54  ;;  %v5166_v42 = vpack.c.bf16 %v3106_v33, %v3106_v33  ;;  %v2979_v43 = vmax.f32 %v2723_v35, 0.0  ;;  %v3107_v44 = vmax.f32 %v2851_v36, 0.0  ;;  %v5448_v35 = vpop.f32.mrb[66].mxu0  ;;  %v5576_v36 = vpop.f32.mrb[66].mxu1 }
 0x170   :  { %4261 = vst.msk [vmem:[%s7908_s4 + $0xe8] sm:$0xf] %vm4202_vm2, %v5040_v37  ;;  %4389 = vst.msk [vmem:[%s7908_s4 + $0x2e8] sm:$0xf] %vm4202_vm2, %v5168_v38  ;;  %v5041_v48 = vpack.c.bf16 %v2981_v39, %v2981_v39  ;;  %v5169_v49 = vpack.c.bf16 %v3109_v40, %v3109_v40  ;;  %v2465_v50 = vmul.f32 %v6807_v34, %v5443_v46 }
 0x171   :  { %v2593_v51 = vmul.f32 %v6807_v34, %v5571_v47  ;;  %4259 = vst.msk [vmem:[%s7908_s4 + $0xe0] sm:$0xf] %vm4202_vm2, %v5038_v41  ;;  %4387 = vst.msk [vmem:[%s7908_s4 + $0x2e0] sm:$0xf] %vm4202_vm2, %v5166_v42  ;;  %v5039_v56 = vpack.c.bf16 %v2979_v43, %v2979_v43  ;;  %v5167_v57 = vpack.c.bf16 %v3107_v44, %v3107_v44  ;;  %v1632_v41 = vpop.f32.mrb[67].mxu0  ;;  %v2144_v42 = vpop.f32.mrb[67].mxu1 }
 0x172   :  { %v2463_v58 = vmul.f32 %v6807_v34, %v1613_v53  ;;  %v2591_v59 = vmul.f32 %v6807_v34, %v2125_v55  ;;  %4262 = vst.msk [vmem:[%s7908_s4 + $0xec] sm:$0xf] %vm4202_vm2, %v5041_v48  ;;  %4390 = vst.msk [vmem:[%s7908_s4 + $0x2ec] sm:$0xf] %vm4202_vm2, %v5169_v49  ;;  %v2728_v62 = vadd.f32 %v6832_v45, %v2465_v50 }
 0x173   :  { %v2856_v63 = vadd.f32 %v6832_v45, %v2593_v51  ;;  %v2466_v0 = vmul.f32 %v6807_v34, %v5444_v60  ;;  %v2594_v1 = vmul.f32 %v6807_v34, %v5572_v61  ;;  %4260 = vst.msk [vmem:[%s7908_s4 + $0xe4] sm:$0xf] %vm4202_vm2, %v5039_v56  ;;  %4388 = vst.msk [vmem:[%s7908_s4 + $0x2e4] sm:$0xf] %vm4202_vm2, %v5167_v57 }
 0x174   :  { %v2726_v4 = vadd.f32 %v6832_v45, %v2463_v58  ;;  %v2854_v5 = vadd.f32 %v6832_v45, %v2591_v59  ;;  %v2464_v6 = vmul.f32 %v6807_v34, %v1616_v2  ;;  %v2592_v7 = vmul.f32 %v6807_v34, %v2128_v3  ;;  %v5451_v2 = vpop.f32.mrb[68].mxu0  ;;  %v5579_v3 = vpop.f32.mrb[68].mxu1 }
 0x175   :  { %v2984_v8 = vmax.f32 %v2728_v62, 0.0  ;;  %v3112_v9 = vmax.f32 %v2856_v63, 0.0  ;;  %v2729_v10 = vadd.f32 %v6832_v45, %v2466_v0  ;;  %v2857_v11 = vadd.f32 %v6832_v45, %v2594_v1 }
 0x176   :  { %v2982_v12 = vmax.f32 %v2726_v4, 0.0  ;;  %v3110_v13 = vmax.f32 %v2854_v5, 0.0  ;;  %v2727_v14 = vadd.f32 %v6832_v45, %v2464_v6  ;;  %v2855_v15 = vadd.f32 %v6832_v45, %v2592_v7 }
 0x177   :  { %v5044_v16 = vpack.c.bf16 %v2984_v8, %v2984_v8  ;;  %v5172_v17 = vpack.c.bf16 %v3112_v9, %v3112_v9  ;;  %v2985_v18 = vmax.f32 %v2729_v10, 0.0  ;;  %v3113_v19 = vmax.f32 %v2857_v11, 0.0  ;;  %v1645_v8 = vpop.f32.mrb[69].mxu0  ;;  %v2157_v9 = vpop.f32.mrb[69].mxu1 }
 0x178   :  { %v5042_v20 = vpack.c.bf16 %v2982_v12, %v2982_v12  ;;  %v5170_v21 = vpack.c.bf16 %v3110_v13, %v3110_v13  ;;  %v2983_v22 = vmax.f32 %v2727_v14, 0.0  ;;  %v3111_v23 = vmax.f32 %v2855_v15, 0.0  ;;  %v5452_v14 = vpop.f32.mrb[70].mxu0  ;;  %v5580_v15 = vpop.f32.mrb[70].mxu1 }
 0x179   :  { %4265 = vst.msk [vmem:[%s7908_s4 + $0xf8] sm:$0xf] %vm4202_vm2, %v5044_v16  ;;  %4393 = vst.msk [vmem:[%s7908_s4 + $0x2f8] sm:$0xf] %vm4202_vm2, %v5172_v17  ;;  %v5045_v26 = vpack.c.bf16 %v2985_v18, %v2985_v18  ;;  %v5173_v27 = vpack.c.bf16 %v3113_v19, %v3113_v19  ;;  %v2469_v28 = vmul.f32 %v6807_v34, %v5447_v24 }
 0x17a   :  { %v2597_v29 = vmul.f32 %v6807_v34, %v5575_v25  ;;  %4263 = vst.msk [vmem:[%s7908_s4 + $0xf0] sm:$0xf] %vm4202_vm2, %v5042_v20  ;;  %4391 = vst.msk [vmem:[%s7908_s4 + $0x2f0] sm:$0xf] %vm4202_vm2, %v5170_v21  ;;  %v5043_v31 = vpack.c.bf16 %v2983_v22, %v2983_v22  ;;  %v5171_v32 = vpack.c.bf16 %v3111_v23, %v3111_v23  ;;  %v1648_v20 = vpop.f32.mrb[71].mxu0  ;;  %v2160_v21 = vpop.f32.mrb[71].mxu1 }
 0x17b   :  { %v2467_v54 = vmul.f32 %v6807_v34, %v1629_v30  ;;  %v2595_v33 = vmul.f32 %v6807_v34, %v2141_v52  ;;  %4266 = vst.msk [vmem:[%s7908_s4 + $0xfc] sm:$0xf] %vm4202_vm2, %v5045_v26  ;;  %4394 = vst.msk [vmem:[%s7908_s4 + $0x2fc] sm:$0xf] %vm4202_vm2, %v5173_v27  ;;  %v2732_v37 = vadd.f32 %v6832_v45, %v2469_v28 }
 0x17c   :  { %v2860_v38 = vadd.f32 %v6832_v45, %v2597_v29  ;;  %v2470_v39 = vmul.f32 %v6807_v34, %v5448_v35  ;;  %v2598_v40 = vmul.f32 %v6807_v34, %v5576_v36  ;;  %4264 = vst.msk [vmem:[%s7908_s4 + $0xf4] sm:$0xf] %vm4202_vm2, %v5043_v31  ;;  %4392 = vst.msk [vmem:[%s7908_s4 + $0x2f4] sm:$0xf] %vm4202_vm2, %v5171_v32 }
 0x17d   :  { %v2730_v43 = vadd.f32 %v6832_v45, %v2467_v54  ;;  %v2858_v44 = vadd.f32 %v6832_v45, %v2595_v33  ;;  %v2468_v46 = vmul.f32 %v6807_v34, %v1632_v41  ;;  %v2596_v47 = vmul.f32 %v6807_v34, %v2144_v42  ;;  %v5455_v41 = vpop.f32.mrb[72].mxu0  ;;  %v5583_v42 = vpop.f32.mrb[72].mxu1 }
 0x17e   :  { %v2988_v48 = vmax.f32 %v2732_v37, 0.0  ;;  %v3116_v49 = vmax.f32 %v2860_v38, 0.0  ;;  %v2733_v50 = vadd.f32 %v6832_v45, %v2470_v39  ;;  %v2861_v51 = vadd.f32 %v6832_v45, %v2598_v40 }
 0x17f   :  { %v2986_v53 = vmax.f32 %v2730_v43, 0.0  ;;  %v3114_v55 = vmax.f32 %v2858_v44, 0.0  ;;  %v2731_v56 = vadd.f32 %v6832_v45, %v2468_v46  ;;  %v2859_v57 = vadd.f32 %v6832_v45, %v2596_v47 }
 0x180   :  { %v5048_v58 = vpack.c.bf16 %v2988_v48, %v2988_v48  ;;  %v5176_v59 = vpack.c.bf16 %v3116_v49, %v3116_v49  ;;  %v2989_v60 = vmax.f32 %v2733_v50, 0.0  ;;  %v3117_v61 = vmax.f32 %v2861_v51, 0.0  ;;  %v1661_v48 = vpop.f32.mrb[73].mxu0  ;;  %v2173_v49 = vpop.f32.mrb[73].mxu1 }
 0x181   :  { %v5046_v62 = vpack.c.bf16 %v2986_v53, %v2986_v53  ;;  %v5174_v63 = vpack.c.bf16 %v3114_v55, %v3114_v55  ;;  %v2987_v0 = vmax.f32 %v2731_v56, 0.0  ;;  %v3115_v1 = vmax.f32 %v2859_v57, 0.0  ;;  %v5456_v56 = vpop.f32.mrb[74].mxu0  ;;  %v5584_v57 = vpop.f32.mrb[74].mxu1 }
 0x182   :  { %4269 = vst.msk [vmem:[%s7908_s4 + $0x108] sm:$0xf] %vm4202_vm2, %v5048_v58  ;;  %4397 = vst.msk [vmem:[%s7908_s4 + $0x308] sm:$0xf] %vm4202_vm2, %v5176_v59  ;;  %v5049_v4 = vpack.c.bf16 %v2989_v60, %v2989_v60  ;;  %v5177_v5 = vpack.c.bf16 %v3117_v61, %v3117_v61  ;;  %v2473_v6 = vmul.f32 %v6807_v34, %v5451_v2 }
 0x183   :  { %v2601_v7 = vmul.f32 %v6807_v34, %v5579_v3  ;;  %4267 = vst.msk [vmem:[%s7908_s4 + $0x100] sm:$0xf] %vm4202_vm2, %v5046_v62  ;;  %4395 = vst.msk [vmem:[%s7908_s4 + $0x300] sm:$0xf] %vm4202_vm2, %v5174_v63  ;;  %v5047_v10 = vpack.c.bf16 %v2987_v0, %v2987_v0  ;;  %v5175_v11 = vpack.c.bf16 %v3115_v1, %v3115_v1  ;;  %v1664_v62 = vpop.f32.mrb[75].mxu0  ;;  %v2176_v63 = vpop.f32.mrb[75].mxu1 }
 0x184   :  { %v2471_v12 = vmul.f32 %v6807_v34, %v1645_v8  ;;  %v2599_v13 = vmul.f32 %v6807_v34, %v2157_v9  ;;  %4270 = vst.msk [vmem:[%s7908_s4 + $0x10c] sm:$0xf] %vm4202_vm2, %v5049_v4  ;;  %4398 = vst.msk [vmem:[%s7908_s4 + $0x30c] sm:$0xf] %vm4202_vm2, %v5177_v5  ;;  %v2736_v16 = vadd.f32 %v6832_v45, %v2473_v6 }
 0x185   :  { %v2864_v17 = vadd.f32 %v6832_v45, %v2601_v7  ;;  %v2474_v18 = vmul.f32 %v6807_v34, %v5452_v14  ;;  %v2602_v19 = vmul.f32 %v6807_v34, %v5580_v15  ;;  %4268 = vst.msk [vmem:[%s7908_s4 + $0x104] sm:$0xf] %vm4202_vm2, %v5047_v10  ;;  %4396 = vst.msk [vmem:[%s7908_s4 + $0x304] sm:$0xf] %vm4202_vm2, %v5175_v11 }
 0x186   :  { %v2734_v22 = vadd.f32 %v6832_v45, %v2471_v12  ;;  %v2862_v23 = vadd.f32 %v6832_v45, %v2599_v13  ;;  %v2472_v24 = vmul.f32 %v6807_v34, %v1648_v20  ;;  %v2600_v25 = vmul.f32 %v6807_v34, %v2160_v21  ;;  %v5459_v20 = vpop.f32.mrb[76].mxu0  ;;  %v5587_v21 = vpop.f32.mrb[76].mxu1 }
 0x187   :  { %v2992_v26 = vmax.f32 %v2736_v16, 0.0  ;;  %v3120_v27 = vmax.f32 %v2864_v17, 0.0  ;;  %v2737_v28 = vadd.f32 %v6832_v45, %v2474_v18  ;;  %v2865_v29 = vadd.f32 %v6832_v45, %v2602_v19 }
 0x188   :  { %v2990_v30 = vmax.f32 %v2734_v22, 0.0  ;;  %v3118_v52 = vmax.f32 %v2862_v23, 0.0  ;;  %v2735_v31 = vadd.f32 %v6832_v45, %v2472_v24  ;;  %v2863_v32 = vadd.f32 %v6832_v45, %v2600_v25 }
 0x189   :  { %v5052_v54 = vpack.c.bf16 %v2992_v26, %v2992_v26  ;;  %v5180_v33 = vpack.c.bf16 %v3120_v27, %v3120_v27  ;;  %v2993_v35 = vmax.f32 %v2737_v28, 0.0  ;;  %v3121_v36 = vmax.f32 %v2865_v29, 0.0  ;;  %v1677_v26 = vpop.f32.mrb[77].mxu0  ;;  %v2189_v27 = vpop.f32.mrb[77].mxu1 }
 0x18a   :  { %v5050_v37 = vpack.c.bf16 %v2990_v30, %v2990_v30  ;;  %v5178_v38 = vpack.c.bf16 %v3118_v52, %v3118_v52  ;;  %v2991_v39 = vmax.f32 %v2735_v31, 0.0  ;;  %v3119_v40 = vmax.f32 %v2863_v32, 0.0  ;;  %v5460_v31 = vpop.f32.mrb[78].mxu0  ;;  %v5588_v32 = vpop.f32.mrb[78].mxu1 }
 0x18b   :  { %4273 = vst.msk [vmem:[%s7908_s4 + $0x118] sm:$0xf] %vm4202_vm2, %v5052_v54  ;;  %4401 = vst.msk [vmem:[%s7908_s4 + $0x318] sm:$0xf] %vm4202_vm2, %v5180_v33  ;;  %v5053_v43 = vpack.c.bf16 %v2993_v35, %v2993_v35  ;;  %v5181_v44 = vpack.c.bf16 %v3121_v36, %v3121_v36  ;;  %v2477_v46 = vmul.f32 %v6807_v34, %v5455_v41 }
 0x18c   :  { %v2605_v47 = vmul.f32 %v6807_v34, %v5583_v42  ;;  %4271 = vst.msk [vmem:[%s7908_s4 + $0x110] sm:$0xf] %vm4202_vm2, %v5050_v37  ;;  %4399 = vst.msk [vmem:[%s7908_s4 + $0x310] sm:$0xf] %vm4202_vm2, %v5178_v38  ;;  %v5051_v50 = vpack.c.bf16 %v2991_v39, %v2991_v39  ;;  %v5179_v51 = vpack.c.bf16 %v3119_v40, %v3119_v40  ;;  %v1680_v37 = vpop.f32.mrb[79].mxu0  ;;  %v2192_v38 = vpop.f32.mrb[79].mxu1 }
 0x18d   :  { %v2475_v53 = vmul.f32 %v6807_v34, %v1661_v48  ;;  %v2603_v55 = vmul.f32 %v6807_v34, %v2173_v49  ;;  %4274 = vst.msk [vmem:[%s7908_s4 + $0x11c] sm:$0xf] %vm4202_vm2, %v5053_v43  ;;  %4402 = vst.msk [vmem:[%s7908_s4 + $0x31c] sm:$0xf] %vm4202_vm2, %v5181_v44  ;;  %v2740_v58 = vadd.f32 %v6832_v45, %v2477_v46 }
 0x18e   :  { %v2868_v59 = vadd.f32 %v6832_v45, %v2605_v47  ;;  %v2478_v60 = vmul.f32 %v6807_v34, %v5456_v56  ;;  %v2606_v61 = vmul.f32 %v6807_v34, %v5584_v57  ;;  %4272 = vst.msk [vmem:[%s7908_s4 + $0x114] sm:$0xf] %vm4202_vm2, %v5051_v50  ;;  %4400 = vst.msk [vmem:[%s7908_s4 + $0x314] sm:$0xf] %vm4202_vm2, %v5179_v51 }
 0x18f   :  { %v2738_v0 = vadd.f32 %v6832_v45, %v2475_v53  ;;  %v2866_v1 = vadd.f32 %v6832_v45, %v2603_v55  ;;  %v2476_v2 = vmul.f32 %v6807_v34, %v1664_v62  ;;  %v2604_v3 = vmul.f32 %v6807_v34, %v2176_v63  ;;  %v5463_v62 = vpop.f32.mrb[80].mxu0  ;;  %v5591_v63 = vpop.f32.mrb[80].mxu1 }
 0x190   :  { %v2996_v4 = vmax.f32 %v2740_v58, 0.0  ;;  %v3124_v5 = vmax.f32 %v2868_v59, 0.0  ;;  %v2741_v6 = vadd.f32 %v6832_v45, %v2478_v60  ;;  %v2869_v7 = vadd.f32 %v6832_v45, %v2606_v61 }
 0x191   :  { %v2994_v8 = vmax.f32 %v2738_v0, 0.0  ;;  %v3122_v9 = vmax.f32 %v2866_v1, 0.0  ;;  %v2739_v10 = vadd.f32 %v6832_v45, %v2476_v2  ;;  %v2867_v11 = vadd.f32 %v6832_v45, %v2604_v3 }
 0x192   :  { %v5056_v12 = vpack.c.bf16 %v2996_v4, %v2996_v4  ;;  %v5184_v13 = vpack.c.bf16 %v3124_v5, %v3124_v5  ;;  %v2997_v14 = vmax.f32 %v2741_v6, 0.0  ;;  %v3125_v15 = vmax.f32 %v2869_v7, 0.0  ;;  %v1693_v4 = vpop.f32.mrb[81].mxu0  ;;  %v2205_v5 = vpop.f32.mrb[81].mxu1 }
 0x193   :  { %v5054_v16 = vpack.c.bf16 %v2994_v8, %v2994_v8  ;;  %v5182_v17 = vpack.c.bf16 %v3122_v9, %v3122_v9  ;;  %v2995_v18 = vmax.f32 %v2739_v10, 0.0  ;;  %v3123_v19 = vmax.f32 %v2867_v11, 0.0  ;;  %v5464_v10 = vpop.f32.mrb[82].mxu0  ;;  %v5592_v11 = vpop.f32.mrb[82].mxu1 }
 0x194   :  { %4277 = vst.msk [vmem:[%s7908_s4 + $0x128] sm:$0xf] %vm4202_vm2, %v5056_v12  ;;  %4405 = vst.msk [vmem:[%s7908_s4 + $0x328] sm:$0xf] %vm4202_vm2, %v5184_v13  ;;  %v5057_v22 = vpack.c.bf16 %v2997_v14, %v2997_v14  ;;  %v5185_v23 = vpack.c.bf16 %v3125_v15, %v3125_v15  ;;  %v2481_v24 = vmul.f32 %v6807_v34, %v5459_v20 }
 0x195   :  { %v2609_v25 = vmul.f32 %v6807_v34, %v5587_v21  ;;  %4275 = vst.msk [vmem:[%s7908_s4 + $0x120] sm:$0xf] %vm4202_vm2, %v5054_v16  ;;  %4403 = vst.msk [vmem:[%s7908_s4 + $0x320] sm:$0xf] %vm4202_vm2, %v5182_v17  ;;  %v5055_v28 = vpack.c.bf16 %v2995_v18, %v2995_v18  ;;  %v5183_v29 = vpack.c.bf16 %v3123_v19, %v3123_v19  ;;  %v1696_v16 = vpop.f32.mrb[83].mxu0  ;;  %v2208_v17 = vpop.f32.mrb[83].mxu1 }
 0x196   :  { %v2479_v30 = vmul.f32 %v6807_v34, %v1677_v26  ;;  %v2607_v52 = vmul.f32 %v6807_v34, %v2189_v27  ;;  %4278 = vst.msk [vmem:[%s7908_s4 + $0x12c] sm:$0xf] %vm4202_vm2, %v5057_v22  ;;  %4406 = vst.msk [vmem:[%s7908_s4 + $0x32c] sm:$0xf] %vm4202_vm2, %v5185_v23  ;;  %v2744_v54 = vadd.f32 %v6832_v45, %v2481_v24 }
 0x197   :  { %v2872_v33 = vadd.f32 %v6832_v45, %v2609_v25  ;;  %v2482_v35 = vmul.f32 %v6807_v34, %v5460_v31  ;;  %v2610_v36 = vmul.f32 %v6807_v34, %v5588_v32  ;;  %4276 = vst.msk [vmem:[%s7908_s4 + $0x124] sm:$0xf] %vm4202_vm2, %v5055_v28  ;;  %4404 = vst.msk [vmem:[%s7908_s4 + $0x324] sm:$0xf] %vm4202_vm2, %v5183_v29 }
 0x198   :  { %v2742_v39 = vadd.f32 %v6832_v45, %v2479_v30  ;;  %v2870_v40 = vadd.f32 %v6832_v45, %v2607_v52  ;;  %v2480_v41 = vmul.f32 %v6807_v34, %v1680_v37  ;;  %v2608_v42 = vmul.f32 %v6807_v34, %v2192_v38  ;;  %v5595_v37 = vpop.f32.mrb[84].mxu1 }
 0x199   :  { %v3000_v43 = vmax.f32 %v2744_v54, 0.0  ;;  %v3128_v44 = vmax.f32 %v2872_v33, 0.0  ;;  %v2745_v46 = vadd.f32 %v6832_v45, %v2482_v35  ;;  %v2873_v47 = vadd.f32 %v6832_v45, %v2610_v36  ;;  %v5467_v36 = vpop.f32.mrb[84].mxu0 }
 0x19a   :  { %v2998_v48 = vmax.f32 %v2742_v39, 0.0  ;;  %v3126_v49 = vmax.f32 %v2870_v40, 0.0  ;;  %v2743_v50 = vadd.f32 %v6832_v45, %v2480_v41  ;;  %v2871_v51 = vadd.f32 %v6832_v45, %v2608_v42  ;;  %v7345_v39 = vld [vmem:[%s7906_s2] ss:$0 sm:$0xff]  ;;  %v1709_v42 = vpop.f32.mrb[85].mxu0 }
 0x19b   :  { %v5060_v53 = vpack.c.bf16 %v3000_v43, %v3000_v43  ;;  %v5188_v55 = vpack.c.bf16 %v3128_v44, %v3128_v44  ;;  %v3001_v56 = vmax.f32 %v2745_v46, 0.0  ;;  %v3129_v57 = vmax.f32 %v2873_v47, 0.0  ;;  %v2221_v43 = vpop.f32.mrb[85].mxu1 }
 0x19c   :  { %v5058_v58 = vpack.c.bf16 %v2998_v48, %v2998_v48  ;;  %v5186_v59 = vpack.c.bf16 %v3126_v49, %v3126_v49  ;;  %v2999_v60 = vmax.f32 %v2743_v50, 0.0  ;;  %v3127_v61 = vmax.f32 %v2871_v51, 0.0  ;;  %v5468_v49 = vpop.f32.mrb[86].mxu0  ;;  %v5596_v50 = vpop.f32.mrb[86].mxu1  ;;  %v7370_v51 = vld [vmem:[%s7907_s3] ss:$0 sm:$0xff] }
 0x19d   :  { %4281 = vst.msk [vmem:[%s7908_s4 + $0x138] sm:$0xf] %vm4202_vm2, %v5060_v53  ;;  %4409 = vst.msk [vmem:[%s7908_s4 + $0x338] sm:$0xf] %vm4202_vm2, %v5188_v55  ;;  %v5061_v0 = vpack.c.bf16 %v3001_v56, %v3001_v56  ;;  %v5189_v1 = vpack.c.bf16 %v3129_v57, %v3129_v57  ;;  %v2485_v2 = vmul.f32 %v6807_v34, %v5463_v62 }
 0x19e   :  { %v2613_v3 = vmul.f32 %v6807_v34, %v5591_v63  ;;  %4279 = vst.msk [vmem:[%s7908_s4 + $0x130] sm:$0xf] %vm4202_vm2, %v5058_v58  ;;  %4407 = vst.msk [vmem:[%s7908_s4 + $0x330] sm:$0xf] %vm4202_vm2, %v5186_v59  ;;  %v5059_v6 = vpack.c.bf16 %v2999_v60, %v2999_v60  ;;  %v5187_v7 = vpack.c.bf16 %v3127_v61, %v3127_v61  ;;  %v1712_v58 = vpop.f32.mrb[87].mxu0  ;;  %v2224_v59 = vpop.f32.mrb[87].mxu1 }
 0x19f   :  { %v2483_v8 = vmul.f32 %v6807_v34, %v1693_v4  ;;  %v2611_v9 = vmul.f32 %v6807_v34, %v2205_v5  ;;  %4282 = vst.msk [vmem:[%s7908_s4 + $0x13c] sm:$0xf] %vm4202_vm2, %v5061_v0  ;;  %4410 = vst.msk [vmem:[%s7908_s4 + $0x33c] sm:$0xf] %vm4202_vm2, %v5189_v1  ;;  %v2748_v12 = vadd.f32 %v6832_v45, %v2485_v2 }
 0x1a0   :  { %v2876_v13 = vadd.f32 %v6832_v45, %v2613_v3  ;;  %v2486_v14 = vmul.f32 %v6807_v34, %v5464_v10  ;;  %v2614_v15 = vmul.f32 %v6807_v34, %v5592_v11  ;;  %4280 = vst.msk [vmem:[%s7908_s4 + $0x134] sm:$0xf] %vm4202_vm2, %v5059_v6  ;;  %4408 = vst.msk [vmem:[%s7908_s4 + $0x334] sm:$0xf] %vm4202_vm2, %v5187_v7 }
 0x1a1   :  { %v2746_v18 = vadd.f32 %v6832_v45, %v2483_v8  ;;  %v2874_v19 = vadd.f32 %v6832_v45, %v2611_v9  ;;  %v2484_v20 = vmul.f32 %v6807_v34, %v1696_v16  ;;  %v2612_v21 = vmul.f32 %v6807_v34, %v2208_v17  ;;  %v5471_v16 = vpop.f32.mrb[88].mxu0  ;;  %v5599_v17 = vpop.f32.mrb[88].mxu1 }
 0x1a2   :  { %v3004_v22 = vmax.f32 %v2748_v12, 0.0  ;;  %v3132_v23 = vmax.f32 %v2876_v13, 0.0  ;;  %v2749_v24 = vadd.f32 %v6832_v45, %v2486_v14  ;;  %v2877_v25 = vadd.f32 %v6832_v45, %v2614_v15 }
 0x1a3   :  { %v3002_v26 = vmax.f32 %v2746_v18, 0.0  ;;  %v3130_v27 = vmax.f32 %v2874_v19, 0.0  ;;  %v2747_v28 = vadd.f32 %v6832_v45, %v2484_v20  ;;  %v2875_v29 = vadd.f32 %v6832_v45, %v2612_v21 }
 0x1a4   :  { %v5064_v30 = vpack.c.bf16 %v3004_v22, %v3004_v22  ;;  %v5192_v52 = vpack.c.bf16 %v3132_v23, %v3132_v23  ;;  %v3005_v31 = vmax.f32 %v2749_v24, 0.0  ;;  %v3133_v32 = vmax.f32 %v2877_v25, 0.0  ;;  %v1725_v22 = vpop.f32.mrb[89].mxu0  ;;  %v2237_v23 = vpop.f32.mrb[89].mxu1 }
 0x1a5   :  { %v5062_v54 = vpack.c.bf16 %v3002_v26, %v3002_v26  ;;  %v5190_v33 = vpack.c.bf16 %v3130_v27, %v3130_v27  ;;  %v3003_v35 = vmax.f32 %v2747_v28, 0.0  ;;  %v3131_v34 = vmax.f32 %v2875_v29, 0.0  ;;  %v5472_v28 = vpop.f32.mrb[90].mxu0  ;;  %v5600_v29 = vpop.f32.mrb[90].mxu1 }
 0x1a6   :  { %4285 = vst.msk [vmem:[%s7908_s4 + $0x148] sm:$0xf] %vm4202_vm2, %v5064_v30  ;;  %4413 = vst.msk [vmem:[%s7908_s4 + $0x348] sm:$0xf] %vm4202_vm2, %v5192_v52  ;;  %v5065_v45 = vpack.c.bf16 %v3005_v31, %v3005_v31  ;;  %v5193_v38 = vpack.c.bf16 %v3133_v32, %v3133_v32  ;;  %v2489_v40 = vmul.f32 %v7345_v39, %v5467_v36 }
 0x1a7   :  { %v2617_v41 = vmul.f32 %v7345_v39, %v5595_v37  ;;  %4283 = vst.msk [vmem:[%s7908_s4 + $0x140] sm:$0xf] %vm4202_vm2, %v5062_v54  ;;  %4411 = vst.msk [vmem:[%s7908_s4 + $0x340] sm:$0xf] %vm4202_vm2, %v5190_v33  ;;  %v5063_v44 = vpack.c.bf16 %v3003_v35, %v3003_v35  ;;  %v5191_v46 = vpack.c.bf16 %v3131_v34, %v3131_v34  ;;  %v1728_v54 = vpop.f32.mrb[91].mxu0  ;;  %v2240_v33 = vpop.f32.mrb[91].mxu1 }
 0x1a8   :  { %v2487_v47 = vmul.f32 %v7345_v39, %v1709_v42  ;;  %v2615_v48 = vmul.f32 %v7345_v39, %v2221_v43  ;;  %4286 = vst.msk [vmem:[%s7908_s4 + $0x14c] sm:$0xf] %vm4202_vm2, %v5065_v45  ;;  %4414 = vst.msk [vmem:[%s7908_s4 + $0x34c] sm:$0xf] %vm4202_vm2, %v5193_v38  ;;  %v2752_v53 = vadd.f32 %v7370_v51, %v2489_v40 }
 0x1a9   :  { %v2880_v55 = vadd.f32 %v7370_v51, %v2617_v41  ;;  %v2490_v56 = vmul.f32 %v7345_v39, %v5468_v49  ;;  %v2618_v57 = vmul.f32 %v7345_v39, %v5596_v50  ;;  %4284 = vst.msk [vmem:[%s7908_s4 + $0x144] sm:$0xf] %vm4202_vm2, %v5063_v44  ;;  %4412 = vst.msk [vmem:[%s7908_s4 + $0x344] sm:$0xf] %vm4202_vm2, %v5191_v46 }
 0x1aa   :  { %v2750_v60 = vadd.f32 %v7370_v51, %v2487_v47  ;;  %v2878_v61 = vadd.f32 %v7370_v51, %v2615_v48  ;;  %v2488_v62 = vmul.f32 %v7345_v39, %v1712_v58  ;;  %v2616_v63 = vmul.f32 %v7345_v39, %v2224_v59  ;;  %v5475_v58 = vpop.f32.mrb[92].mxu0  ;;  %v5603_v59 = vpop.f32.mrb[92].mxu1 }
 0x1ab   :  { %v3008_v0 = vmax.f32 %v2752_v53, 0.0  ;;  %v3136_v1 = vmax.f32 %v2880_v55, 0.0  ;;  %v2753_v2 = vadd.f32 %v7370_v51, %v2490_v56  ;;  %v2881_v3 = vadd.f32 %v7370_v51, %v2618_v57 }
 0x1ac   :  { %v3006_v4 = vmax.f32 %v2750_v60, 0.0  ;;  %v3134_v5 = vmax.f32 %v2878_v61, 0.0  ;;  %v2751_v6 = vadd.f32 %v7370_v51, %v2488_v62  ;;  %v2879_v7 = vadd.f32 %v7370_v51, %v2616_v63 }
 0x1ad   :  { %v5068_v8 = vpack.c.bf16 %v3008_v0, %v3008_v0  ;;  %v5196_v9 = vpack.c.bf16 %v3136_v1, %v3136_v1  ;;  %v3009_v10 = vmax.f32 %v2753_v2, 0.0  ;;  %v3137_v11 = vmax.f32 %v2881_v3, 0.0  ;;  %v1741_v0 = vpop.f32.mrb[93].mxu0  ;;  %v2253_v1 = vpop.f32.mrb[93].mxu1 }
 0x1ae   :  { %v5066_v12 = vpack.c.bf16 %v3006_v4, %v3006_v4  ;;  %v5194_v13 = vpack.c.bf16 %v3134_v5, %v3134_v5  ;;  %v3007_v14 = vmax.f32 %v2751_v6, 0.0  ;;  %v3135_v15 = vmax.f32 %v2879_v7, 0.0  ;;  %v5476_v6 = vpop.f32.mrb[94].mxu0  ;;  %v5604_v7 = vpop.f32.mrb[94].mxu1 }
 0x1af   :  { %4289 = vst.msk [vmem:[%s7908_s4 + $0x158] sm:$0xf] %vm4202_vm2, %v5068_v8  ;;  %4417 = vst.msk [vmem:[%s7908_s4 + $0x358] sm:$0xf] %vm4202_vm2, %v5196_v9  ;;  %v5069_v18 = vpack.c.bf16 %v3009_v10, %v3009_v10  ;;  %v5197_v19 = vpack.c.bf16 %v3137_v11, %v3137_v11  ;;  %v2493_v20 = vmul.f32 %v7345_v39, %v5471_v16 }
 0x1b0   :  { %v2621_v21 = vmul.f32 %v7345_v39, %v5599_v17  ;;  %4287 = vst.msk [vmem:[%s7908_s4 + $0x150] sm:$0xf] %vm4202_vm2, %v5066_v12  ;;  %4415 = vst.msk [vmem:[%s7908_s4 + $0x350] sm:$0xf] %vm4202_vm2, %v5194_v13  ;;  %v5067_v24 = vpack.c.bf16 %v3007_v14, %v3007_v14  ;;  %v5195_v25 = vpack.c.bf16 %v3135_v15, %v3135_v15  ;;  %v1744_v12 = vpop.f32.mrb[95].mxu0  ;;  %v2256_v13 = vpop.f32.mrb[95].mxu1 }
 0x1b1   :  { %v2491_v26 = vmul.f32 %v7345_v39, %v1725_v22  ;;  %v2619_v27 = vmul.f32 %v7345_v39, %v2237_v23  ;;  %4290 = vst.msk [vmem:[%s7908_s4 + $0x15c] sm:$0xf] %vm4202_vm2, %v5069_v18  ;;  %4418 = vst.msk [vmem:[%s7908_s4 + $0x35c] sm:$0xf] %vm4202_vm2, %v5197_v19  ;;  %v2756_v30 = vadd.f32 %v7370_v51, %v2493_v20 }
 0x1b2   :  { %v2884_v52 = vadd.f32 %v7370_v51, %v2621_v21  ;;  %v2494_v31 = vmul.f32 %v7345_v39, %v5472_v28  ;;  %v2622_v32 = vmul.f32 %v7345_v39, %v5600_v29  ;;  %4288 = vst.msk [vmem:[%s7908_s4 + $0x154] sm:$0xf] %vm4202_vm2, %v5067_v24  ;;  %4416 = vst.msk [vmem:[%s7908_s4 + $0x354] sm:$0xf] %vm4202_vm2, %v5195_v25 }
 0x1b3   :  { %v2754_v35 = vadd.f32 %v7370_v51, %v2491_v26  ;;  %v2882_v34 = vadd.f32 %v7370_v51, %v2619_v27  ;;  %v2492_v36 = vmul.f32 %v7345_v39, %v1728_v54  ;;  %v2620_v37 = vmul.f32 %v7345_v39, %v2240_v33  ;;  %v5479_v54 = vpop.f32.mrb[96].mxu0  ;;  %v5607_v33 = vpop.f32.mrb[96].mxu1 }
 0x1b4   :  { %v3012_v45 = vmax.f32 %v2756_v30, 0.0  ;;  %v3140_v38 = vmax.f32 %v2884_v52, 0.0  ;;  %v2757_v40 = vadd.f32 %v7370_v51, %v2494_v31  ;;  %v2885_v41 = vadd.f32 %v7370_v51, %v2622_v32 }
 0x1b5   :  { %v3010_v42 = vmax.f32 %v2754_v35, 0.0  ;;  %v3138_v43 = vmax.f32 %v2882_v34, 0.0  ;;  %v2755_v44 = vadd.f32 %v7370_v51, %v2492_v36  ;;  %v2883_v46 = vadd.f32 %v7370_v51, %v2620_v37 }
 0x1b6   :  { %v5072_v47 = vpack.c.bf16 %v3012_v45, %v3012_v45  ;;  %v5200_v48 = vpack.c.bf16 %v3140_v38, %v3140_v38  ;;  %v3013_v49 = vmax.f32 %v2757_v40, 0.0  ;;  %v3141_v50 = vmax.f32 %v2885_v41, 0.0  ;;  %v1757_v45 = vpop.f32.mrb[97].mxu0  ;;  %v2269_v38 = vpop.f32.mrb[97].mxu1 }
 0x1b7   :  { %v5070_v53 = vpack.c.bf16 %v3010_v42, %v3010_v42  ;;  %v5198_v55 = vpack.c.bf16 %v3138_v43, %v3138_v43  ;;  %v3011_v56 = vmax.f32 %v2755_v44, 0.0  ;;  %v3139_v57 = vmax.f32 %v2883_v46, 0.0  ;;  %v5480_v44 = vpop.f32.mrb[98].mxu0  ;;  %v5608_v46 = vpop.f32.mrb[98].mxu1 }
 0x1b8   :  { %4293 = vst.msk [vmem:[%s7908_s4 + $0x168] sm:$0xf] %vm4202_vm2, %v5072_v47  ;;  %4421 = vst.msk [vmem:[%s7908_s4 + $0x368] sm:$0xf] %vm4202_vm2, %v5200_v48  ;;  %v5073_v60 = vpack.c.bf16 %v3013_v49, %v3013_v49  ;;  %v5201_v61 = vpack.c.bf16 %v3141_v50, %v3141_v50  ;;  %v2497_v62 = vmul.f32 %v7345_v39, %v5475_v58 }
 0x1b9   :  { %v2625_v63 = vmul.f32 %v7345_v39, %v5603_v59  ;;  %4291 = vst.msk [vmem:[%s7908_s4 + $0x160] sm:$0xf] %vm4202_vm2, %v5070_v53  ;;  %4419 = vst.msk [vmem:[%s7908_s4 + $0x360] sm:$0xf] %vm4202_vm2, %v5198_v55  ;;  %v5071_v2 = vpack.c.bf16 %v3011_v56, %v3011_v56  ;;  %v5199_v3 = vpack.c.bf16 %v3139_v57, %v3139_v57  ;;  %v1760_v53 = vpop.f32.mrb[99].mxu0  ;;  %v2272_v55 = vpop.f32.mrb[99].mxu1 }
 0x1ba   :  { %v2495_v4 = vmul.f32 %v7345_v39, %v1741_v0  ;;  %v2623_v5 = vmul.f32 %v7345_v39, %v2253_v1  ;;  %4294 = vst.msk [vmem:[%s7908_s4 + $0x16c] sm:$0xf] %vm4202_vm2, %v5073_v60  ;;  %4422 = vst.msk [vmem:[%s7908_s4 + $0x36c] sm:$0xf] %vm4202_vm2, %v5201_v61  ;;  %v2760_v8 = vadd.f32 %v7370_v51, %v2497_v62 }
 0x1bb   :  { %v2888_v9 = vadd.f32 %v7370_v51, %v2625_v63  ;;  %v2498_v10 = vmul.f32 %v7345_v39, %v5476_v6  ;;  %v2626_v11 = vmul.f32 %v7345_v39, %v5604_v7  ;;  %4292 = vst.msk [vmem:[%s7908_s4 + $0x164] sm:$0xf] %vm4202_vm2, %v5071_v2  ;;  %4420 = vst.msk [vmem:[%s7908_s4 + $0x364] sm:$0xf] %vm4202_vm2, %v5199_v3 }
 0x1bc   :  { %v2758_v14 = vadd.f32 %v7370_v51, %v2495_v4  ;;  %v2886_v15 = vadd.f32 %v7370_v51, %v2623_v5  ;;  %v2496_v16 = vmul.f32 %v7345_v39, %v1744_v12  ;;  %v2624_v17 = vmul.f32 %v7345_v39, %v2256_v13  ;;  %v5483_v12 = vpop.f32.mrb[100].mxu0  ;;  %v5611_v13 = vpop.f32.mrb[100].mxu1 }
 0x1bd   :  { %v3016_v18 = vmax.f32 %v2760_v8, 0.0  ;;  %v3144_v19 = vmax.f32 %v2888_v9, 0.0  ;;  %v2761_v20 = vadd.f32 %v7370_v51, %v2498_v10  ;;  %v2889_v21 = vadd.f32 %v7370_v51, %v2626_v11 }
 0x1be   :  { %v3014_v22 = vmax.f32 %v2758_v14, 0.0  ;;  %v3142_v23 = vmax.f32 %v2886_v15, 0.0  ;;  %v2759_v24 = vadd.f32 %v7370_v51, %v2496_v16  ;;  %v2887_v25 = vadd.f32 %v7370_v51, %v2624_v17 }
 0x1bf   :  { %v5076_v26 = vpack.c.bf16 %v3016_v18, %v3016_v18  ;;  %v5204_v27 = vpack.c.bf16 %v3144_v19, %v3144_v19  ;;  %v3017_v28 = vmax.f32 %v2761_v20, 0.0  ;;  %v3145_v29 = vmax.f32 %v2889_v21, 0.0  ;;  %v1773_v18 = vpop.f32.mrb[101].mxu0  ;;  %v2285_v19 = vpop.f32.mrb[101].mxu1 }
 0x1c0   :  { %v5074_v30 = vpack.c.bf16 %v3014_v22, %v3014_v22  ;;  %v5202_v52 = vpack.c.bf16 %v3142_v23, %v3142_v23  ;;  %v3015_v31 = vmax.f32 %v2759_v24, 0.0  ;;  %v3143_v32 = vmax.f32 %v2887_v25, 0.0  ;;  %v5484_v24 = vpop.f32.mrb[102].mxu0  ;;  %v5612_v25 = vpop.f32.mrb[102].mxu1 }
 0x1c1   :  { %4297 = vst.msk [vmem:[%s7908_s4 + $0x178] sm:$0xf] %vm4202_vm2, %v5076_v26  ;;  %4425 = vst.msk [vmem:[%s7908_s4 + $0x378] sm:$0xf] %vm4202_vm2, %v5204_v27  ;;  %v5077_v35 = vpack.c.bf16 %v3017_v28, %v3017_v28  ;;  %v5205_v34 = vpack.c.bf16 %v3145_v29, %v3145_v29  ;;  %v2501_v36 = vmul.f32 %v7345_v39, %v5479_v54 }
 0x1c2   :  { %v2629_v37 = vmul.f32 %v7345_v39, %v5607_v33  ;;  %4295 = vst.msk [vmem:[%s7908_s4 + $0x170] sm:$0xf] %vm4202_vm2, %v5074_v30  ;;  %4423 = vst.msk [vmem:[%s7908_s4 + $0x370] sm:$0xf] %vm4202_vm2, %v5202_v52  ;;  %v5075_v40 = vpack.c.bf16 %v3015_v31, %v3015_v31  ;;  %v5203_v41 = vpack.c.bf16 %v3143_v32, %v3143_v32  ;;  %v1776_v30 = vpop.f32.mrb[103].mxu0  ;;  %v2288_v52 = vpop.f32.mrb[103].mxu1 }
 0x1c3   :  { %v2499_v42 = vmul.f32 %v7345_v39, %v1757_v45  ;;  %v2627_v43 = vmul.f32 %v7345_v39, %v2269_v38  ;;  %4298 = vst.msk [vmem:[%s7908_s4 + $0x17c] sm:$0xf] %vm4202_vm2, %v5077_v35  ;;  %4426 = vst.msk [vmem:[%s7908_s4 + $0x37c] sm:$0xf] %vm4202_vm2, %v5205_v34  ;;  %v2764_v47 = vadd.f32 %v7370_v51, %v2501_v36 }
 0x1c4   :  { %v2892_v48 = vadd.f32 %v7370_v51, %v2629_v37  ;;  %v2502_v49 = vmul.f32 %v7345_v39, %v5480_v44  ;;  %v2630_v50 = vmul.f32 %v7345_v39, %v5608_v46  ;;  %4296 = vst.msk [vmem:[%s7908_s4 + $0x174] sm:$0xf] %vm4202_vm2, %v5075_v40  ;;  %4424 = vst.msk [vmem:[%s7908_s4 + $0x374] sm:$0xf] %vm4202_vm2, %v5203_v41 }
 0x1c5   :  { %v2762_v56 = vadd.f32 %v7370_v51, %v2499_v42  ;;  %v2890_v57 = vadd.f32 %v7370_v51, %v2627_v43  ;;  %v2500_v58 = vmul.f32 %v7345_v39, %v1760_v53  ;;  %v2628_v59 = vmul.f32 %v7345_v39, %v2272_v55  ;;  %v5487_v53 = vpop.f32.mrb[104].mxu0  ;;  %v5615_v55 = vpop.f32.mrb[104].mxu1 }
 0x1c6   :  { %v3020_v60 = vmax.f32 %v2764_v47, 0.0  ;;  %v3148_v61 = vmax.f32 %v2892_v48, 0.0  ;;  %v2765_v62 = vadd.f32 %v7370_v51, %v2502_v49  ;;  %v2893_v63 = vadd.f32 %v7370_v51, %v2630_v50 }
 0x1c7   :  { %v3018_v0 = vmax.f32 %v2762_v56, 0.0  ;;  %v3146_v1 = vmax.f32 %v2890_v57, 0.0  ;;  %v2763_v2 = vadd.f32 %v7370_v51, %v2500_v58  ;;  %v2891_v3 = vadd.f32 %v7370_v51, %v2628_v59 }
 0x1c8   :  { %v5080_v4 = vpack.c.bf16 %v3020_v60, %v3020_v60  ;;  %v5208_v5 = vpack.c.bf16 %v3148_v61, %v3148_v61  ;;  %v3021_v6 = vmax.f32 %v2765_v62, 0.0  ;;  %v3149_v7 = vmax.f32 %v2893_v63, 0.0  ;;  %v1789_v60 = vpop.f32.mrb[105].mxu0  ;;  %v2301_v61 = vpop.f32.mrb[105].mxu1 }
 0x1c9   :  { %v5078_v8 = vpack.c.bf16 %v3018_v0, %v3018_v0  ;;  %v5206_v9 = vpack.c.bf16 %v3146_v1, %v3146_v1  ;;  %v3019_v10 = vmax.f32 %v2763_v2, 0.0  ;;  %v3147_v11 = vmax.f32 %v2891_v3, 0.0  ;;  %v5488_v2 = vpop.f32.mrb[106].mxu0  ;;  %v5616_v3 = vpop.f32.mrb[106].mxu1 }
 0x1ca   :  { %4301 = vst.msk [vmem:[%s7908_s4 + $0x188] sm:$0xf] %vm4202_vm2, %v5080_v4  ;;  %4429 = vst.msk [vmem:[%s7908_s4 + $0x388] sm:$0xf] %vm4202_vm2, %v5208_v5  ;;  %v5081_v14 = vpack.c.bf16 %v3021_v6, %v3021_v6  ;;  %v5209_v15 = vpack.c.bf16 %v3149_v7, %v3149_v7  ;;  %v2505_v16 = vmul.f32 %v7345_v39, %v5483_v12 }
 0x1cb   :  { %v2633_v17 = vmul.f32 %v7345_v39, %v5611_v13  ;;  %4299 = vst.msk [vmem:[%s7908_s4 + $0x180] sm:$0xf] %vm4202_vm2, %v5078_v8  ;;  %4427 = vst.msk [vmem:[%s7908_s4 + $0x380] sm:$0xf] %vm4202_vm2, %v5206_v9  ;;  %v5079_v20 = vpack.c.bf16 %v3019_v10, %v3019_v10  ;;  %v5207_v21 = vpack.c.bf16 %v3147_v11, %v3147_v11  ;;  %v1792_v8 = vpop.f32.mrb[107].mxu0  ;;  %v2304_v9 = vpop.f32.mrb[107].mxu1 }
 0x1cc   :  { %v2503_v22 = vmul.f32 %v7345_v39, %v1773_v18  ;;  %v2631_v23 = vmul.f32 %v7345_v39, %v2285_v19  ;;  %4302 = vst.msk [vmem:[%s7908_s4 + $0x18c] sm:$0xf] %vm4202_vm2, %v5081_v14  ;;  %4430 = vst.msk [vmem:[%s7908_s4 + $0x38c] sm:$0xf] %vm4202_vm2, %v5209_v15  ;;  %v2768_v26 = vadd.f32 %v7370_v51, %v2505_v16 }
 0x1cd   :  { %v2896_v27 = vadd.f32 %v7370_v51, %v2633_v17  ;;  %v2506_v28 = vmul.f32 %v7345_v39, %v5484_v24  ;;  %v2634_v29 = vmul.f32 %v7345_v39, %v5612_v25  ;;  %4300 = vst.msk [vmem:[%s7908_s4 + $0x184] sm:$0xf] %vm4202_vm2, %v5079_v20  ;;  %4428 = vst.msk [vmem:[%s7908_s4 + $0x384] sm:$0xf] %vm4202_vm2, %v5207_v21 }
 0x1ce   :  { %v2766_v31 = vadd.f32 %v7370_v51, %v2503_v22  ;;  %v2894_v32 = vadd.f32 %v7370_v51, %v2631_v23  ;;  %v2504_v54 = vmul.f32 %v7345_v39, %v1776_v30  ;;  %v2632_v33 = vmul.f32 %v7345_v39, %v2288_v52  ;;  %v5491_v30 = vpop.f32.mrb[108].mxu0  ;;  %v5619_v52 = vpop.f32.mrb[108].mxu1 }
 0x1cf   :  { %v3024_v35 = vmax.f32 %v2768_v26, 0.0  ;;  %v3152_v34 = vmax.f32 %v2896_v27, 0.0  ;;  %v2769_v36 = vadd.f32 %v7370_v51, %v2506_v28  ;;  %v2897_v37 = vadd.f32 %v7370_v51, %v2634_v29 }
 0x1d0   :  { %v3022_v45 = vmax.f32 %v2766_v31, 0.0  ;;  %v3150_v38 = vmax.f32 %v2894_v32, 0.0  ;;  %v2767_v40 = vadd.f32 %v7370_v51, %v2504_v54  ;;  %v2895_v41 = vadd.f32 %v7370_v51, %v2632_v33 }
 0x1d1   :  { %v5084_v42 = vpack.c.bf16 %v3024_v35, %v3024_v35  ;;  %v5212_v43 = vpack.c.bf16 %v3152_v34, %v3152_v34  ;;  %v3025_v44 = vmax.f32 %v2769_v36, 0.0  ;;  %v3153_v46 = vmax.f32 %v2897_v37, 0.0  ;;  %v1805_v35 = vpop.f32.mrb[109].mxu0  ;;  %v2317_v34 = vpop.f32.mrb[109].mxu1 }
 0x1d2   :  { %v5082_v47 = vpack.c.bf16 %v3022_v45, %v3022_v45  ;;  %v5210_v48 = vpack.c.bf16 %v3150_v38, %v3150_v38  ;;  %v3023_v49 = vmax.f32 %v2767_v40, 0.0  ;;  %v3151_v50 = vmax.f32 %v2895_v41, 0.0  ;;  %v5492_v40 = vpop.f32.mrb[110].mxu0  ;;  %v5620_v41 = vpop.f32.mrb[110].mxu1 }
 0x1d3   :  { %4305 = vst.msk [vmem:[%s7908_s4 + $0x198] sm:$0xf] %vm4202_vm2, %v5084_v42  ;;  %4433 = vst.msk [vmem:[%s7908_s4 + $0x398] sm:$0xf] %vm4202_vm2, %v5212_v43  ;;  %v5085_v56 = vpack.c.bf16 %v3025_v44, %v3025_v44  ;;  %v5213_v57 = vpack.c.bf16 %v3153_v46, %v3153_v46  ;;  %v2509_v58 = vmul.f32 %v7345_v39, %v5487_v53 }
 0x1d4   :  { %v2637_v59 = vmul.f32 %v7345_v39, %v5615_v55  ;;  %4303 = vst.msk [vmem:[%s7908_s4 + $0x190] sm:$0xf] %vm4202_vm2, %v5082_v47  ;;  %4431 = vst.msk [vmem:[%s7908_s4 + $0x390] sm:$0xf] %vm4202_vm2, %v5210_v48  ;;  %v5083_v62 = vpack.c.bf16 %v3023_v49, %v3023_v49  ;;  %v5211_v63 = vpack.c.bf16 %v3151_v50, %v3151_v50  ;;  %v1808_v47 = vpop.f32.mrb[111].mxu0  ;;  %v2320_v48 = vpop.f32.mrb[111].mxu1 }
 0x1d5   :  { %v2507_v0 = vmul.f32 %v7345_v39, %v1789_v60  ;;  %v2635_v1 = vmul.f32 %v7345_v39, %v2301_v61  ;;  %4306 = vst.msk [vmem:[%s7908_s4 + $0x19c] sm:$0xf] %vm4202_vm2, %v5085_v56  ;;  %4434 = vst.msk [vmem:[%s7908_s4 + $0x39c] sm:$0xf] %vm4202_vm2, %v5213_v57  ;;  %v2772_v4 = vadd.f32 %v7370_v51, %v2509_v58 }
 0x1d6   :  { %v2900_v5 = vadd.f32 %v7370_v51, %v2637_v59  ;;  %v2510_v6 = vmul.f32 %v7345_v39, %v5488_v2  ;;  %v2638_v7 = vmul.f32 %v7345_v39, %v5616_v3  ;;  %4304 = vst.msk [vmem:[%s7908_s4 + $0x194] sm:$0xf] %vm4202_vm2, %v5083_v62  ;;  %4432 = vst.msk [vmem:[%s7908_s4 + $0x394] sm:$0xf] %vm4202_vm2, %v5211_v63 }
 0x1d7   :  { %v2770_v10 = vadd.f32 %v7370_v51, %v2507_v0  ;;  %v2898_v11 = vadd.f32 %v7370_v51, %v2635_v1  ;;  %v2508_v12 = vmul.f32 %v7345_v39, %v1792_v8  ;;  %v2636_v13 = vmul.f32 %v7345_v39, %v2304_v9  ;;  %v5495_v8 = vpop.f32.mrb[112].mxu0  ;;  %v5623_v9 = vpop.f32.mrb[112].mxu1 }
 0x1d8   :  { %v3028_v14 = vmax.f32 %v2772_v4, 0.0  ;;  %v3156_v15 = vmax.f32 %v2900_v5, 0.0  ;;  %v2773_v16 = vadd.f32 %v7370_v51, %v2510_v6  ;;  %v2901_v17 = vadd.f32 %v7370_v51, %v2638_v7 }
 0x1d9   :  { %v3026_v18 = vmax.f32 %v2770_v10, 0.0  ;;  %v3154_v19 = vmax.f32 %v2898_v11, 0.0  ;;  %v2771_v20 = vadd.f32 %v7370_v51, %v2508_v12  ;;  %v2899_v21 = vadd.f32 %v7370_v51, %v2636_v13 }
 0x1da   :  { %v5088_v22 = vpack.c.bf16 %v3028_v14, %v3028_v14  ;;  %v5216_v23 = vpack.c.bf16 %v3156_v15, %v3156_v15  ;;  %v3029_v24 = vmax.f32 %v2773_v16, 0.0  ;;  %v3157_v25 = vmax.f32 %v2901_v17, 0.0  ;;  %v1821_v14 = vpop.f32.mrb[113].mxu0  ;;  %v2333_v15 = vpop.f32.mrb[113].mxu1 }
 0x1db   :  { %v5086_v26 = vpack.c.bf16 %v3026_v18, %v3026_v18  ;;  %v5214_v27 = vpack.c.bf16 %v3154_v19, %v3154_v19  ;;  %v3027_v28 = vmax.f32 %v2771_v20, 0.0  ;;  %v3155_v29 = vmax.f32 %v2899_v21, 0.0  ;;  %v5496_v20 = vpop.f32.mrb[114].mxu0  ;;  %v5624_v21 = vpop.f32.mrb[114].mxu1 }
 0x1dc   :  { %4309 = vst.msk [vmem:[%s7908_s4 + $0x1a8] sm:$0xf] %vm4202_vm2, %v5088_v22  ;;  %4437 = vst.msk [vmem:[%s7908_s4 + $0x3a8] sm:$0xf] %vm4202_vm2, %v5216_v23  ;;  %v5089_v31 = vpack.c.bf16 %v3029_v24, %v3029_v24  ;;  %v5217_v32 = vpack.c.bf16 %v3157_v25, %v3157_v25  ;;  %v2513_v54 = vmul.f32 %v7345_v39, %v5491_v30 }
 0x1dd   :  { %v2641_v33 = vmul.f32 %v7345_v39, %v5619_v52  ;;  %4307 = vst.msk [vmem:[%s7908_s4 + $0x1a0] sm:$0xf] %vm4202_vm2, %v5086_v26  ;;  %4435 = vst.msk [vmem:[%s7908_s4 + $0x3a0] sm:$0xf] %vm4202_vm2, %v5214_v27  ;;  %v5087_v36 = vpack.c.bf16 %v3027_v28, %v3027_v28  ;;  %v5215_v37 = vpack.c.bf16 %v3155_v29, %v3155_v29  ;;  %v1824_v26 = vpop.f32.mrb[115].mxu0  ;;  %v2336_v27 = vpop.f32.mrb[115].mxu1 }
 0x1de   :  { %v2511_v45 = vmul.f32 %v7345_v39, %v1805_v35  ;;  %v2639_v38 = vmul.f32 %v7345_v39, %v2317_v34  ;;  %4310 = vst.msk [vmem:[%s7908_s4 + $0x1ac] sm:$0xf] %vm4202_vm2, %v5089_v31  ;;  %4438 = vst.msk [vmem:[%s7908_s4 + $0x3ac] sm:$0xf] %vm4202_vm2, %v5217_v32  ;;  %v2776_v42 = vadd.f32 %v7370_v51, %v2513_v54 }
 0x1df   :  { %v2904_v43 = vadd.f32 %v7370_v51, %v2641_v33  ;;  %v2514_v44 = vmul.f32 %v7345_v39, %v5492_v40  ;;  %v2642_v46 = vmul.f32 %v7345_v39, %v5620_v41  ;;  %4308 = vst.msk [vmem:[%s7908_s4 + $0x1a4] sm:$0xf] %vm4202_vm2, %v5087_v36  ;;  %4436 = vst.msk [vmem:[%s7908_s4 + $0x3a4] sm:$0xf] %vm4202_vm2, %v5215_v37 }
 0x1e0   :  { %v2774_v49 = vadd.f32 %v7370_v51, %v2511_v45  ;;  %v2902_v50 = vadd.f32 %v7370_v51, %v2639_v38  ;;  %v2512_v53 = vmul.f32 %v7345_v39, %v1808_v47  ;;  %v2640_v55 = vmul.f32 %v7345_v39, %v2320_v48  ;;  %v5499_v47 = vpop.f32.mrb[116].mxu0  ;;  %v5627_v48 = vpop.f32.mrb[116].mxu1 }
 0x1e1   :  { %v3032_v56 = vmax.f32 %v2776_v42, 0.0  ;;  %v3160_v57 = vmax.f32 %v2904_v43, 0.0  ;;  %v2777_v58 = vadd.f32 %v7370_v51, %v2514_v44  ;;  %v2905_v59 = vadd.f32 %v7370_v51, %v2642_v46 }
 0x1e2   :  { %v3030_v60 = vmax.f32 %v2774_v49, 0.0  ;;  %v3158_v61 = vmax.f32 %v2902_v50, 0.0  ;;  %v2775_v62 = vadd.f32 %v7370_v51, %v2512_v53  ;;  %v2903_v63 = vadd.f32 %v7370_v51, %v2640_v55 }
 0x1e3   :  { %v5092_v0 = vpack.c.bf16 %v3032_v56, %v3032_v56  ;;  %v5220_v1 = vpack.c.bf16 %v3160_v57, %v3160_v57  ;;  %v3033_v2 = vmax.f32 %v2777_v58, 0.0  ;;  %v3161_v3 = vmax.f32 %v2905_v59, 0.0  ;;  %v1837_v56 = vpop.f32.mrb[117].mxu0  ;;  %v2349_v57 = vpop.f32.mrb[117].mxu1 }
 0x1e4   :  { %v5090_v4 = vpack.c.bf16 %v3030_v60, %v3030_v60  ;;  %v5218_v5 = vpack.c.bf16 %v3158_v61, %v3158_v61  ;;  %v3031_v6 = vmax.f32 %v2775_v62, 0.0  ;;  %v3159_v7 = vmax.f32 %v2903_v63, 0.0  ;;  %v5500_v62 = vpop.f32.mrb[118].mxu0  ;;  %v5628_v63 = vpop.f32.mrb[118].mxu1 }
 0x1e5   :  { %4313 = vst.msk [vmem:[%s7908_s4 + $0x1b8] sm:$0xf] %vm4202_vm2, %v5092_v0  ;;  %4441 = vst.msk [vmem:[%s7908_s4 + $0x3b8] sm:$0xf] %vm4202_vm2, %v5220_v1  ;;  %v5093_v10 = vpack.c.bf16 %v3033_v2, %v3033_v2  ;;  %v5221_v11 = vpack.c.bf16 %v3161_v3, %v3161_v3  ;;  %v2517_v12 = vmul.f32 %v7345_v39, %v5495_v8 }
 0x1e6   :  { %v2645_v13 = vmul.f32 %v7345_v39, %v5623_v9  ;;  %4311 = vst.msk [vmem:[%s7908_s4 + $0x1b0] sm:$0xf] %vm4202_vm2, %v5090_v4  ;;  %4439 = vst.msk [vmem:[%s7908_s4 + $0x3b0] sm:$0xf] %vm4202_vm2, %v5218_v5  ;;  %v5091_v16 = vpack.c.bf16 %v3031_v6, %v3031_v6  ;;  %v5219_v17 = vpack.c.bf16 %v3159_v7, %v3159_v7  ;;  %v1840_v4 = vpop.f32.mrb[119].mxu0  ;;  %v2352_v5 = vpop.f32.mrb[119].mxu1 }
 0x1e7   :  { %v2515_v18 = vmul.f32 %v7345_v39, %v1821_v14  ;;  %v2643_v19 = vmul.f32 %v7345_v39, %v2333_v15  ;;  %4314 = vst.msk [vmem:[%s7908_s4 + $0x1bc] sm:$0xf] %vm4202_vm2, %v5093_v10  ;;  %4442 = vst.msk [vmem:[%s7908_s4 + $0x3bc] sm:$0xf] %vm4202_vm2, %v5221_v11  ;;  %v2780_v22 = vadd.f32 %v7370_v51, %v2517_v12 }
 0x1e8   :  { %v2908_v23 = vadd.f32 %v7370_v51, %v2645_v13  ;;  %v2518_v24 = vmul.f32 %v7345_v39, %v5496_v20  ;;  %v2646_v25 = vmul.f32 %v7345_v39, %v5624_v21  ;;  %4312 = vst.msk [vmem:[%s7908_s4 + $0x1b4] sm:$0xf] %vm4202_vm2, %v5091_v16  ;;  %4440 = vst.msk [vmem:[%s7908_s4 + $0x3b4] sm:$0xf] %vm4202_vm2, %v5219_v17 }
 0x1e9   :  { %v2778_v28 = vadd.f32 %v7370_v51, %v2515_v18  ;;  %v2906_v29 = vadd.f32 %v7370_v51, %v2643_v19  ;;  %v2516_v30 = vmul.f32 %v7345_v39, %v1824_v26  ;;  %v2644_v52 = vmul.f32 %v7345_v39, %v2336_v27  ;;  %v5503_v26 = vpop.f32.mrb[120].mxu0  ;;  %v5631_v27 = vpop.f32.mrb[120].mxu1 }
 0x1ea   :  { %v3036_v31 = vmax.f32 %v2780_v22, 0.0  ;;  %v3164_v32 = vmax.f32 %v2908_v23, 0.0  ;;  %v2781_v54 = vadd.f32 %v7370_v51, %v2518_v24  ;;  %v2909_v33 = vadd.f32 %v7370_v51, %v2646_v25 }
 0x1eb   :  { %v3034_v35 = vmax.f32 %v2778_v28, 0.0  ;;  %v3162_v34 = vmax.f32 %v2906_v29, 0.0  ;;  %v2779_v36 = vadd.f32 %v7370_v51, %v2516_v30  ;;  %v2907_v37 = vadd.f32 %v7370_v51, %v2644_v52 }
 0x1ec   :  { %v5096_v45 = vpack.c.bf16 %v3036_v31, %v3036_v31  ;;  %v5224_v38 = vpack.c.bf16 %v3164_v32, %v3164_v32  ;;  %v3037_v40 = vmax.f32 %v2781_v54, 0.0  ;;  %v3165_v41 = vmax.f32 %v2909_v33, 0.0  ;;  %v1853_v31 = vpop.f32.mrb[121].mxu0  ;;  %v2365_v32 = vpop.f32.mrb[121].mxu1 }
 0x1ed   :  { %v5094_v42 = vpack.c.bf16 %v3034_v35, %v3034_v35  ;;  %v5222_v43 = vpack.c.bf16 %v3162_v34, %v3162_v34  ;;  %v3035_v44 = vmax.f32 %v2779_v36, 0.0  ;;  %v3163_v46 = vmax.f32 %v2907_v37, 0.0  ;;  %v5504_v36 = vpop.f32.mrb[122].mxu0  ;;  %v5632_v37 = vpop.f32.mrb[122].mxu1 }
 0x1ee   :  { %4317 = vst.msk [vmem:[%s7908_s4 + $0x1c8] sm:$0xf] %vm4202_vm2, %v5096_v45  ;;  %4445 = vst.msk [vmem:[%s7908_s4 + $0x3c8] sm:$0xf] %vm4202_vm2, %v5224_v38  ;;  %v5097_v49 = vpack.c.bf16 %v3037_v40, %v3037_v40  ;;  %v5225_v50 = vpack.c.bf16 %v3165_v41, %v3165_v41  ;;  %v2521_v53 = vmul.f32 %v7345_v39, %v5499_v47 }
 0x1ef   :  { %v2649_v55 = vmul.f32 %v7345_v39, %v5627_v48  ;;  %4315 = vst.msk [vmem:[%s7908_s4 + $0x1c0] sm:$0xf] %vm4202_vm2, %v5094_v42  ;;  %4443 = vst.msk [vmem:[%s7908_s4 + $0x3c0] sm:$0xf] %vm4202_vm2, %v5222_v43  ;;  %v5095_v58 = vpack.c.bf16 %v3035_v44, %v3035_v44  ;;  %v5223_v59 = vpack.c.bf16 %v3163_v46, %v3163_v46  ;;  %v1856_v42 = vpop.f32.mrb[123].mxu0  ;;  %v2368_v43 = vpop.f32.mrb[123].mxu1 }
 0x1f0   :  { %v2519_v60 = vmul.f32 %v7345_v39, %v1837_v56  ;;  %v2647_v61 = vmul.f32 %v7345_v39, %v2349_v57  ;;  %4318 = vst.msk [vmem:[%s7908_s4 + $0x1cc] sm:$0xf] %vm4202_vm2, %v5097_v49  ;;  %4446 = vst.msk [vmem:[%s7908_s4 + $0x3cc] sm:$0xf] %vm4202_vm2, %v5225_v50  ;;  %v2784_v0 = vadd.f32 %v7370_v51, %v2521_v53 }
 0x1f1   :  { %v2912_v1 = vadd.f32 %v7370_v51, %v2649_v55  ;;  %v2522_v2 = vmul.f32 %v7345_v39, %v5500_v62  ;;  %v2650_v3 = vmul.f32 %v7345_v39, %v5628_v63  ;;  %4316 = vst.msk [vmem:[%s7908_s4 + $0x1c4] sm:$0xf] %vm4202_vm2, %v5095_v58  ;;  %4444 = vst.msk [vmem:[%s7908_s4 + $0x3c4] sm:$0xf] %vm4202_vm2, %v5223_v59 }
 0x1f2   :  { %v2782_v6 = vadd.f32 %v7370_v51, %v2519_v60  ;;  %v2910_v7 = vadd.f32 %v7370_v51, %v2647_v61  ;;  %v2520_v8 = vmul.f32 %v7345_v39, %v1840_v4  ;;  %v2648_v9 = vmul.f32 %v7345_v39, %v2352_v5  ;;  %v5507_v4 = vpop.f32.mrb[124].mxu0  ;;  %v5635_v5 = vpop.f32.mrb[124].mxu1 }
 0x1f3   :  { %v3040_v10 = vmax.f32 %v2784_v0, 0.0  ;;  %v3168_v11 = vmax.f32 %v2912_v1, 0.0  ;;  %v2785_v12 = vadd.f32 %v7370_v51, %v2522_v2  ;;  %v2913_v13 = vadd.f32 %v7370_v51, %v2650_v3 }
 0x1f4   :  { %v3038_v14 = vmax.f32 %v2782_v6, 0.0  ;;  %v3166_v15 = vmax.f32 %v2910_v7, 0.0  ;;  %v2783_v16 = vadd.f32 %v7370_v51, %v2520_v8  ;;  %v2911_v17 = vadd.f32 %v7370_v51, %v2648_v9 }
 0x1f5   :  { %v5100_v18 = vpack.c.bf16 %v3040_v10, %v3040_v10  ;;  %v5228_v19 = vpack.c.bf16 %v3168_v11, %v3168_v11  ;;  %v3041_v20 = vmax.f32 %v2785_v12, 0.0  ;;  %v3169_v21 = vmax.f32 %v2913_v13, 0.0  ;;  %v1869_v10 = vpop.f32.mrb[125].mxu0  ;;  %v2381_v11 = vpop.f32.mrb[125].mxu1 }
 0x1f6   :  { %v5098_v22 = vpack.c.bf16 %v3038_v14, %v3038_v14  ;;  %v5226_v23 = vpack.c.bf16 %v3166_v15, %v3166_v15  ;;  %v3039_v24 = vmax.f32 %v2783_v16, 0.0  ;;  %v3167_v25 = vmax.f32 %v2911_v17, 0.0  ;;  %v5508_v16 = vpop.f32.mrb[126].mxu0  ;;  %v5636_v17 = vpop.f32.mrb[126].mxu1 }
 0x1f7   :  { %4321 = vst.msk [vmem:[%s7908_s4 + $0x1d8] sm:$0xf] %vm4202_vm2, %v5100_v18  ;;  %4449 = vst.msk [vmem:[%s7908_s4 + $0x3d8] sm:$0xf] %vm4202_vm2, %v5228_v19  ;;  %v5101_v28 = vpack.c.bf16 %v3041_v20, %v3041_v20  ;;  %v5229_v29 = vpack.c.bf16 %v3169_v21, %v3169_v21  ;;  %v2525_v30 = vmul.f32 %v7345_v39, %v5503_v26 }
 0x1f8   :  { %v2653_v52 = vmul.f32 %v7345_v39, %v5631_v27  ;;  %4319 = vst.msk [vmem:[%s7908_s4 + $0x1d0] sm:$0xf] %vm4202_vm2, %v5098_v22  ;;  %4447 = vst.msk [vmem:[%s7908_s4 + $0x3d0] sm:$0xf] %vm4202_vm2, %v5226_v23  ;;  %v5099_v54 = vpack.c.bf16 %v3039_v24, %v3039_v24  ;;  %v5227_v33 = vpack.c.bf16 %v3167_v25, %v3167_v25  ;;  %v1872_v22 = vpop.f32.mrb[127].mxu0  ;;  %v2384_v23 = vpop.f32.mrb[127].mxu1 }
 0x1f9   :  { %v2523_v35 = vmul.f32 %v7345_v39, %v1853_v31  ;;  %v2651_v34 = vmul.f32 %v7345_v39, %v2365_v32  ;;  %4322 = vst.msk [vmem:[%s7908_s4 + $0x1dc] sm:$0xf] %vm4202_vm2, %v5101_v28  ;;  %4450 = vst.msk [vmem:[%s7908_s4 + $0x3dc] sm:$0xf] %vm4202_vm2, %v5229_v29  ;;  %v2788_v45 = vadd.f32 %v7370_v51, %v2525_v30 }
 0x1fa   :  { %v2916_v38 = vadd.f32 %v7370_v51, %v2653_v52  ;;  %v2526_v40 = vmul.f32 %v7345_v39, %v5504_v36  ;;  %v2654_v41 = vmul.f32 %v7345_v39, %v5632_v37  ;;  %4320 = vst.msk [vmem:[%s7908_s4 + $0x1d4] sm:$0xf] %vm4202_vm2, %v5099_v54  ;;  %4448 = vst.msk [vmem:[%s7908_s4 + $0x3d4] sm:$0xf] %vm4202_vm2, %v5227_v33 }
 0x1fb   :  { %v2786_v44 = vadd.f32 %v7370_v51, %v2523_v35  ;;  %v2914_v46 = vadd.f32 %v7370_v51, %v2651_v34  ;;  %v2524_v47 = vmul.f32 %v7345_v39, %v1856_v42  ;;  %v2652_v48 = vmul.f32 %v7345_v39, %v2368_v43 }
 0x1fc   :  { %v3044_v49 = vmax.f32 %v2788_v45, 0.0  ;;  %v3172_v50 = vmax.f32 %v2916_v38, 0.0  ;;  %v2789_v53 = vadd.f32 %v7370_v51, %v2526_v40  ;;  %v2917_v55 = vadd.f32 %v7370_v51, %v2654_v41 }
 0x1fd   :  { %v3042_v56 = vmax.f32 %v2786_v44, 0.0  ;;  %v3170_v57 = vmax.f32 %v2914_v46, 0.0  ;;  %v2787_v58 = vadd.f32 %v7370_v51, %v2524_v47  ;;  %v2915_v59 = vadd.f32 %v7370_v51, %v2652_v48 }
 0x1fe   :  { %v5104_v60 = vpack.c.bf16 %v3044_v49, %v3044_v49  ;;  %v5232_v61 = vpack.c.bf16 %v3172_v50, %v3172_v50  ;;  %v3045_v62 = vmax.f32 %v2789_v53, 0.0  ;;  %v3173_v63 = vmax.f32 %v2917_v55, 0.0 }
 0x1ff   :  { %v5102_v0 = vpack.c.bf16 %v3042_v56, %v3042_v56  ;;  %v5230_v1 = vpack.c.bf16 %v3170_v57, %v3170_v57  ;;  %v3043_v2 = vmax.f32 %v2787_v58, 0.0  ;;  %v3171_v3 = vmax.f32 %v2915_v59, 0.0 }
 0x200   :  { %4325 = vst.msk [vmem:[%s7908_s4 + $0x1e8] sm:$0xf] %vm4202_vm2, %v5104_v60  ;;  %4453 = vst.msk [vmem:[%s7908_s4 + $0x3e8] sm:$0xf] %vm4202_vm2, %v5232_v61  ;;  %v5105_v6 = vpack.c.bf16 %v3045_v62, %v3045_v62  ;;  %v5233_v7 = vpack.c.bf16 %v3173_v63, %v3173_v63  ;;  %v2529_v8 = vmul.f32 %v7345_v39, %v5507_v4 }
 0x201   :  { %v2657_v9 = vmul.f32 %v7345_v39, %v5635_v5  ;;  %4323 = vst.msk [vmem:[%s7908_s4 + $0x1e0] sm:$0xf] %vm4202_vm2, %v5102_v0  ;;  %4451 = vst.msk [vmem:[%s7908_s4 + $0x3e0] sm:$0xf] %vm4202_vm2, %v5230_v1  ;;  %v5103_v12 = vpack.c.bf16 %v3043_v2, %v3043_v2  ;;  %v5231_v13 = vpack.c.bf16 %v3171_v3, %v3171_v3 }
 0x202   :  { %v2527_v14 = vmul.f32 %v7345_v39, %v1869_v10  ;;  %v2655_v15 = vmul.f32 %v7345_v39, %v2381_v11  ;;  %4326 = vst.msk [vmem:[%s7908_s4 + $0x1ec] sm:$0xf] %vm4202_vm2, %v5105_v6  ;;  %4454 = vst.msk [vmem:[%s7908_s4 + $0x3ec] sm:$0xf] %vm4202_vm2, %v5233_v7  ;;  %v2792_v18 = vadd.f32 %v7370_v51, %v2529_v8 }
 0x203   :  { %v2920_v19 = vadd.f32 %v7370_v51, %v2657_v9  ;;  %v2530_v20 = vmul.f32 %v7345_v39, %v5508_v16  ;;  %v2658_v21 = vmul.f32 %v7345_v39, %v5636_v17  ;;  %4324 = vst.msk [vmem:[%s7908_s4 + $0x1e4] sm:$0xf] %vm4202_vm2, %v5103_v12  ;;  %4452 = vst.msk [vmem:[%s7908_s4 + $0x3e4] sm:$0xf] %vm4202_vm2, %v5231_v13 }
 0x204   :  { %v2790_v24 = vadd.f32 %v7370_v51, %v2527_v14  ;;  %v2918_v25 = vadd.f32 %v7370_v51, %v2655_v15  ;;  %v2528_v26 = vmul.f32 %v7345_v39, %v1872_v22  ;;  %v2656_v27 = vmul.f32 %v7345_v39, %v2384_v23 }
 0x205   :  { %v3048_v28 = vmax.f32 %v2792_v18, 0.0  ;;  %v3176_v29 = vmax.f32 %v2920_v19, 0.0  ;;  %v2793_v30 = vadd.f32 %v7370_v51, %v2530_v20  ;;  %v2921_v52 = vadd.f32 %v7370_v51, %v2658_v21 }
 0x206   :  { %v3046_v31 = vmax.f32 %v2790_v24, 0.0  ;;  %v3174_v32 = vmax.f32 %v2918_v25, 0.0  ;;  %v2791_v54 = vadd.f32 %v7370_v51, %v2528_v26  ;;  %v2919_v33 = vadd.f32 %v7370_v51, %v2656_v27 }
 0x207   :  { %v5108_v35 = vpack.c.bf16 %v3048_v28, %v3048_v28  ;;  %v5236_v34 = vpack.c.bf16 %v3176_v29, %v3176_v29  ;;  %v3049_v36 = vmax.f32 %v2793_v30, 0.0  ;;  %v3177_v37 = vmax.f32 %v2921_v52, 0.0 }
 0x208   :  { %v5106_v45 = vpack.c.bf16 %v3046_v31, %v3046_v31  ;;  %v5234_v38 = vpack.c.bf16 %v3174_v32, %v3174_v32  ;;  %v3047_v40 = vmax.f32 %v2791_v54, 0.0  ;;  %v3175_v39 = vmax.f32 %v2919_v33, 0.0 }
 0x209   :  { %4329 = vst.msk [vmem:[%s7908_s4 + $0x1f8] sm:$0xf] %vm4202_vm2, %v5108_v35  ;;  %4457 = vst.msk [vmem:[%s7908_s4 + $0x3f8] sm:$0xf] %vm4202_vm2, %v5236_v34  ;;  %v5109_v41 = vpack.c.bf16 %v3049_v36, %v3049_v36  ;;  %v5237_v51 = vpack.c.bf16 %v3177_v37, %v3177_v37 }
 0x20a   :  { %4327 = vst.msk [vmem:[%s7908_s4 + $0x1f0] sm:$0xf] %vm4202_vm2, %v5106_v45  ;;  %4455 = vst.msk [vmem:[%s7908_s4 + $0x3f0] sm:$0xf] %vm4202_vm2, %v5234_v38  ;;  %v5107_v42 = vpack.c.bf16 %v3047_v40, %v3047_v40  ;;  %v5235_v43 = vpack.c.bf16 %v3175_v39, %v3175_v39 }
 0x20b   :  { %4330 = vst.msk [vmem:[%s7908_s4 + $0x1fc] sm:$0xf] %vm4202_vm2, %v5109_v41  ;;  %4458 = vst.msk [vmem:[%s7908_s4 + $0x3fc] sm:$0xf] %vm4202_vm2, %v5237_v51 }
 0x20c   :  { %4328 = vst.msk [vmem:[%s7908_s4 + $0x1f4] sm:$0xf] %vm4202_vm2, %v5107_v42  ;;  %4456 = vst.msk [vmem:[%s7908_s4 + $0x3f4] sm:$0xf] %vm4202_vm2, %v5235_v43 }

</bundles_post_ra>
